<compile_context>
chip_gen: v6e
topology: v6e:2x2x1
jax: 0.10.0
libtpu: 0.0.40
codegen_flags: <defaults>
</compile_context>

<pallas_src>
import functools

import jax
import jax.numpy as jnp
from jax.experimental import pallas as pl
from jax.experimental.pallas import tpu as pltpu


# ----------------------------------------------------------------------------
# In-kernel helpers
# ----------------------------------------------------------------------------
def _mm(a, b):
    """a @ b with bf16 MXU operands (weights pre-stored bf16), f32 accumulation."""
    return jax.lax.dot_general(
        a.astype(jnp.bfloat16), b.astype(jnp.bfloat16),
        dimension_numbers=(((1,), (0,)), ((), ())),
        preferred_element_type=jnp.float32)


def _mm_t(a, b):
    """a @ b.T (contract last dims), bf16 MXU operands, f32 accumulation."""
    return jax.lax.dot_general(
        a.astype(jnp.bfloat16), b.astype(jnp.bfloat16),
        dimension_numbers=(((1,), (1,)), ((), ())),
        preferred_element_type=jnp.float32)


def _layernorm(x, g, b, eps=1e-5):
    x = x.astype(jnp.float32)
    mu = jnp.mean(x, axis=-1, keepdims=True)
    var = jnp.mean((x - mu) ** 2, axis=-1, keepdims=True)
    return (x - mu) * jax.lax.rsqrt(var + eps) * g + b


# ----------------------------------------------------------------------------
# Fused tokenizer + encoder + final LN + mean-pool kernel
# ----------------------------------------------------------------------------
def _encoder_kernel(x_ref, tok_w, tok_b, pos,
                    ln1_g, ln1_b, qkv_w, qkv_b, proj_w, proj_b,
                    ln2_g, ln2_b, fc1_w, fc1_b, fc2_w, fc2_b,
                    lnf_g, lnf_b,
                    pooled_ref, slab_ref, *, heads, dim, bt, seq):
    """grid = (batch_block, layer).

    The (Bt, S, D) residual slab lives in the VMEM scratch `slab_ref` across
    the (arbitrary) layer axis; layer weights are streamed (bf16) per step.
    l == 0 fuses the tokenizer; l == L-1 fuses the final LN + mean-pool.
    """
    l = pl.program_id(1)
    n_layers = pl.num_programs(1)
    dh = dim // heads
    scale = dh ** -0.5

    # ---- Fused tokenizer: patchify projection + ReLU + positional embedding -
    @pl.when(l == 0)
    def _():
        xi = x_ref[...].reshape(bt * seq, -1)                 # (Bt*S, C*p*p)
        y = jnp.maximum(_mm(xi, tok_w[...]) + tok_b[...], 0.0)
        slab_ref[...] = y.reshape(bt, seq, dim) + pos[...]

    x2 = slab_ref[...].reshape(bt * seq, dim).astype(jnp.float32)

    # ---- Multi-head self-attention (pre-norm) --------------------------------
    h1 = _layernorm(x2, ln1_g[0, 0], ln1_b[0, 0])
    qkv = _mm(h1, qkv_w[0]) + qkv_b[0]                        # (Bt*S, 3D) [q|k|v]
    # TODO(synk): at real S this single-block (S,S) score must become a
    # flash-style kv-tiled loop and the static loops lax.fori_loop(unroll=True).
    per_b = []
    for bi in range(bt):
        rows = slice(bi * seq, (bi + 1) * seq)
        head_outs = []
        for hd in range(heads):
            qh = qkv[rows, hd * dh:(hd + 1) * dh]                      # (S, dh)
            kh = qkv[rows, dim + hd * dh:dim + (hd + 1) * dh]          # (S, dh)
            vh = qkv[rows, 2 * dim + hd * dh:2 * dim + (hd + 1) * dh]  # (S, dh)
            s = _mm_t(qh, kh) * scale                                  # (S, S)
            s = s - jnp.max(s, axis=-1, keepdims=True)
            e = jnp.exp(s)
            p = e * pl.reciprocal(jnp.sum(e, axis=-1, keepdims=True), approx=True)
            head_outs.append(_mm(p, vh))                               # (S, dh)
        per_b.append(jnp.concatenate(head_outs, axis=-1))              # (S, D)
    attn_cat = jnp.concatenate(per_b, axis=0)                          # (Bt*S, D)
    # single K=D output-projection matmul (instead of per-head K=dh folds)
    x2 = x2 + _mm(attn_cat, proj_w[0]) + proj_b[0]

    # ---- MLP (pre-norm) -------------------------------------------------------
    h2 = _layernorm(x2, ln2_g[0, 0], ln2_b[0, 0])
    # TODO(synk): PyTorch nn.GELU default is exact erf-GELU; tanh approx used.
    h2 = jax.nn.gelu(_mm(h2, fc1_w[0]) + fc1_b[0], approximate=True)
    x2 = x2 + _mm(h2, fc2_w[0]) + fc2_b[0]

    slab_ref[...] = x2.reshape(bt, seq, dim)

    # ---- Final LayerNorm + mean-pool fused into the last layer step ----------
    @pl.when(l == n_layers - 1)
    def _():
        xf = _layernorm(x2, lnf_g[0], lnf_b[0])                        # (Bt*S, D)
        pooled = jnp.mean(xf.reshape(bt, seq, dim), axis=1)            # (Bt, D)
        pooled_ref[...] = pooled.reshape(bt, 1, dim).astype(pooled_ref.dtype)


# ----------------------------------------------------------------------------
# ConceptTransformer head: pooled-query cross-attention over concepts
# ----------------------------------------------------------------------------
def _concept_kernel(pooled_ref, c_ref, wq_ref, wkv_ref, wproj_ref, bproj_ref,
                    out_ref, attn_ref, *, heads, dim):
    p3 = pooled_ref[...].astype(jnp.float32)           # (B, 1, D)
    pooled = p3.reshape(p3.shape[0], dim)              # (B, D)
    q = _mm(pooled, wq_ref[...])                       # (B, D), no bias
    kv = _mm(c_ref[...], wkv_ref[...])                 # (nc, 2D), no bias
    k = kv[:, :dim]
    v = kv[:, dim:]
    dh = dim // heads
    scale = dh ** -0.5

    ctxs = []
    attn_sum = None
    for hd in range(heads):
        qh = q[:, hd * dh:(hd + 1) * dh]               # (B, dh)
        kh = k[:, hd * dh:(hd + 1) * dh]               # (nc, dh)
        vh = v[:, hd * dh:(hd + 1) * dh]               # (nc, dh)
        s = _mm_t(qh, kh) * scale                      # (B, nc)
        s = s - jnp.max(s, axis=-1, keepdims=True)
        e = jnp.exp(s)
        p = e / jnp.sum(e, axis=-1, keepdims=True)     # exact: returned to user
        attn_sum = p if attn_sum is None else attn_sum + p
        ctxs.append(_mm(p, vh))                        # (B, dh)
    ctx = jnp.concatenate(ctxs, axis=-1)               # (B, D)
    # one K=D projection to the lane-padded class dim; sliced to 20 in wrapper
    out_ref[...] = (_mm(ctx, wproj_ref[...]) + bproj_ref[...]).astype(out_ref.dtype)
    attn_ref[...] = (attn_sum * (1.0 / heads)).astype(attn_ref.dtype)


# ----------------------------------------------------------------------------
# Parameter initialization (deterministic, synthetic; per-layer params stacked)
# ----------------------------------------------------------------------------
def init_params(key, *, dim, n_layers, mlp_ratio, n_tokens, n_concepts,
                n_classes, n_classes_padded, patch, in_ch=3):
    ks = iter(jax.random.split(key, 32))

    def nrm(shape, std=0.02):
        return (std * jax.random.normal(next(ks), shape)).astype(jnp.float32)

    hidden = dim * mlp_ratio
    L = n_layers
    ct_proj_w = nrm((dim, n_classes))
    ct_proj_w = jnp.pad(ct_proj_w, ((0, 0), (0, n_classes_padded - n_classes)))
    return {
        # big matmul weights stored bf16 (halves weight DMA + VMEM footprint)
        "tok_w": nrm((in_ch * patch * patch, dim)).astype(jnp.bfloat16),
        "tok_b": jnp.zeros((1, dim), jnp.float32),
        "pos": nrm((1, n_tokens, dim)),
        "lnf_g": jnp.ones((1, dim), jnp.float32),
        "lnf_b": jnp.zeros((1, dim), jnp.float32),
        # stacked encoder layer params (leading layer axis)
        "ln1_g": jnp.ones((L, 1, dim), jnp.float32),
        "ln1_b": jnp.zeros((L, 1, dim), jnp.float32),
        "qkv_w": nrm((L, dim, 3 * dim)).astype(jnp.bfloat16),
        "qkv_b": jnp.zeros((L, 1, 3 * dim), jnp.float32),
        "proj_w": nrm((L, dim, dim)).astype(jnp.bfloat16),
        "proj_b": jnp.zeros((L, 1, dim), jnp.float32),
        "ln2_g": jnp.ones((L, 1, dim), jnp.float32),
        "ln2_b": jnp.zeros((L, 1, dim), jnp.float32),
        "fc1_w": nrm((L, dim, hidden)).astype(jnp.bfloat16),
        "fc1_b": jnp.zeros((L, 1, hidden), jnp.float32),
        "fc2_w": nrm((L, hidden, dim)).astype(jnp.bfloat16),
        "fc2_b": jnp.zeros((L, 1, dim), jnp.float32),
        # ConceptTransformer params (concepts ~ normal(std=1/sqrt(dim)))
        "concepts": nrm((n_concepts, dim), std=1.0 / (dim ** 0.5)),
        "ct_q_w": nrm((dim, dim)),
        "ct_kv_w": nrm((dim, 2 * dim)),
        "ct_proj_w": ct_proj_w,                        # (dim, n_classes_padded)
        "ct_proj_b": jnp.zeros((1, n_classes_padded), jnp.float32),
    }


# ----------------------------------------------------------------------------
# Forward pass
# ----------------------------------------------------------------------------
def ct_apy_forward(params, images, *, cct_heads, ct_heads, patch, n_classes,
                   batch_block=2):
    B, C, H, W = images.shape
    hp, wp = H // patch, W // patch
    S = hp * wp
    D = params["pos"].shape[-1]
    Cpp = C * patch * patch
    n_layers = params["qkv_w"].shape[0]
    hidden = params["fc1_w"].shape[-1]
    n_concepts = params["concepts"].shape[0]
    ncp = params["ct_proj_w"].shape[1]                 # lane-padded class dim

    Bt = batch_block if B % batch_block == 0 else 1    # batch block per grid step

    # --- im2col patchify (XLA glue for the "conv") ---------------------------
    x = images.reshape(B, C, hp, patch, wp, patch)
    x = x.transpose(0, 2, 4, 1, 3, 5).reshape(B, S, Cpp)

    # --- explicit VMEM budget: slab + double-buffered bf16 layer weights -----
    per_layer_bytes = (2 * (D * 3 * D + D * D + D * hidden + hidden * D)
                       + 4 * (4 * D + 3 * D + hidden + D))
    resident_bytes = (Bt * S * D * 4            # residual slab (scratch)
                      + 2 * Bt * S * Cpp * 4    # im2col input, double-buffered
                      + S * D * 4 + Cpp * D * 2 + 8 * D * 4
                      + 2 * Bt * D * 4)         # pooled output, double-buffered
    vmem_limit = int(min(48 << 20,
                         (16 << 20) + 2 * (resident_bytes + 2 * per_layer_bytes)))

    # --- fused tokenizer + encoder + final LN + mean-pool (one pallas_call) --
    enc_kernel = functools.partial(_encoder_kernel, heads=cct_heads, dim=D,
                                   bt=Bt, seq=S)
    layer_spec = lambda shape: pl.BlockSpec(shape, lambda b, l: (l, 0, 0))
    pooled = pl.pallas_call(
        enc_kernel,
        grid=(B // Bt, n_layers),
        in_specs=[
            pl.BlockSpec((Bt, S, Cpp), lambda b, l: (b, 0, 0)),   # im2col x
            pl.BlockSpec((Cpp, D), lambda b, l: (0, 0)),          # tok_w (bf16)
            pl.BlockSpec((1, D), lambda b, l: (0, 0)),            # tok_b
            pl.BlockSpec((1, S, D), lambda b, l: (0, 0, 0)),      # pos
            layer_spec((1, 1, D)),                                # ln1_g
            layer_spec((1, 1, D)),                                # ln1_b
            layer_spec((1, D, 3 * D)),                            # qkv_w (bf16)
            layer_spec((1, 1, 3 * D)),                            # qkv_b
            layer_spec((1, D, D)),                                # proj_w (bf16)
            layer_spec((1, 1, D)),                                # proj_b
            layer_spec((1, 1, D)),                                # ln2_g
            layer_spec((1, 1, D)),                                # ln2_b
            layer_spec((1, D, hidden)),                           # fc1_w (bf16)
            layer_spec((1, 1, hidden)),                           # fc1_b
            layer_spec((1, hidden, D)),                           # fc2_w (bf16)
            layer_spec((1, 1, D)),                                # fc2_b
            pl.BlockSpec((1, D), lambda b, l: (0, 0)),            # lnf_g
            pl.BlockSpec((1, D), lambda b, l: (0, 0)),            # lnf_b
        ],
        out_specs=pl.BlockSpec((Bt, 1, D), lambda b, l: (b, 0, 0)),
        out_shape=jax.ShapeDtypeStruct((B, 1, D), jnp.float32),
        scratch_shapes=[pltpu.VMEM((Bt, S, D), jnp.float32)],
        compiler_params=pltpu.CompilerParams(
            dimension_semantics=("parallel", "arbitrary"),
            vmem_limit_bytes=vmem_limit),
    )(x, params["tok_w"], params["tok_b"], params["pos"],
      params["ln1_g"], params["ln1_b"], params["qkv_w"], params["qkv_b"],
      params["proj_w"], params["proj_b"], params["ln2_g"], params["ln2_b"],
      params["fc1_w"], params["fc1_b"], params["fc2_w"], params["fc2_b"],
      params["lnf_g"], params["lnf_b"])

    # --- ConceptTransformer head (tiny; reads only the pooled (B,1,D) query) -
    ct_kernel = functools.partial(_concept_kernel, heads=ct_heads, dim=D)
    logits_p, attn = pl.pallas_call(
        ct_kernel,
        out_shape=(jax.ShapeDtypeStruct((B, ncp), jnp.float32),
                   jax.ShapeDtypeStruct((B, n_concepts), jnp.float32)),
    )(pooled, params["concepts"], params["ct_q_w"], params["ct_kv_w"],
      params["ct_proj_w"], params["ct_proj_b"])

    return logits_p[:, :n_classes], attn.reshape(B, 1, n_concepts)


# ----------------------------------------------------------------------------
# Main
# ----------------------------------------------------------------------------
if __name__ == "__main__":
    N_CLASSES = 20        # class attribute of CT_aPY_torch
    N_CONCEPTS = 64       # class attribute of CT_aPY_torch
    N_CLASSES_PADDED = 128  # lane-dense logits store; sliced to 20 in wrapper
    B = 2
    IMG = 32              # small stand-in for image_size=224
    DIM = 32
    CCT_LAYERS = 2
    CCT_HEADS = 2
    CCT_MLP_RATIO = 2
    CT_HEADS = 2
    PATCH = 4
    N_TOKENS = (IMG // PATCH) ** 2

    key = jax.random.PRNGKey(0)
    kp, kx = jax.random.split(key)
    params = init_params(
        kp, dim=DIM, n_layers=CCT_LAYERS, mlp_ratio=CCT_MLP_RATIO,
        n_tokens=N_TOKENS, n_concepts=N_CONCEPTS, n_classes=N_CLASSES,
        n_classes_padded=N_CLASSES_PADDED, patch=PATCH, in_ch=3)
    images = jax.random.normal(kx, (B, 3, IMG, IMG), jnp.float32)

    fwd = jax.jit(functools.partial(
        ct_apy_forward, cct_heads=CCT_HEADS, ct_heads=CT_HEADS, patch=PATCH,
        n_classes=N_CLASSES, batch_block=2))
    out, attn = fwd(params, images)
    jax.block_until_ready((out, attn))

    assert out.shape == (B, N_CLASSES), out.shape
    assert attn.shape == (B, 1, N_CONCEPTS), attn.shape
    assert bool(jnp.all(jnp.isfinite(out))) and bool(jnp.all(jnp.isfinite(attn)))
    # attention rows are a softmax (averaged over heads) -> sum to 1
    assert bool(jnp.allclose(jnp.sum(attn, axis=-1), 1.0, atol=1e-4))
    print("KERNEL_OK")
</pallas_src>

<mosaic_0001>
module attributes {stable_mosaic.version = 11 : i64} {
  func.func @_concept_kernel(%arg0: memref<2x1x32xf32, #tpu.memory_space<vmem>>, %arg1: memref<64x32xf32, #tpu.memory_space<vmem>>, %arg2: memref<32x32xf32, #tpu.memory_space<vmem>>, %arg3: memref<32x64xf32, #tpu.memory_space<vmem>>, %arg4: memref<32x128xf32, #tpu.memory_space<vmem>>, %arg5: memref<1x128xf32, #tpu.memory_space<vmem>>, %arg6: memref<2x128xf32, #tpu.memory_space<vmem>>, %arg7: memref<2x64xf32, #tpu.memory_space<vmem>>) attributes {dimension_semantics = [], scalar_prefetch = 0 : i64, scratch_operands = 0 : i64, tpu.core_type = #tpu.core_type<tc>} {
    %c0 = arith.constant 0 : index
    %c0_0 = arith.constant 0 : index
    %c0_1 = arith.constant 0 : index
    %0 = vector.load %arg0[%c0, %c0_0, %c0_1] : memref<2x1x32xf32, #tpu.memory_space<vmem>>, vector<2x1x32xf32>
    %1 = vector.shape_cast %0 : vector<2x1x32xf32> to vector<2x32xf32>
    %c0_2 = arith.constant 0 : index
    %c0_3 = arith.constant 0 : index
    %2 = vector.load %arg2[%c0_2, %c0_3] : memref<32x32xf32, #tpu.memory_space<vmem>>, vector<32x32xf32>
    %3 = arith.truncf %1 : vector<2x32xf32> to vector<2x32xbf16>
    %4 = arith.truncf %2 : vector<32x32xf32> to vector<32x32xbf16>
    %cst = arith.constant dense<0.000000e+00> : vector<2x32xf32>
    %5 = tpu.matmul %3, %4, %cst {dimension_numbers = #tpu.dot_dimension_numbers<[1], [0], [0], [1], [0, 0, 1, 1], [], []>} : vector<2x32xbf16>, vector<32x32xbf16>, vector<2x32xf32> -> vector<2x32xf32>
    %c0_4 = arith.constant 0 : index
    %c0_5 = arith.constant 0 : index
    %6 = vector.load %arg1[%c0_4, %c0_5] : memref<64x32xf32, #tpu.memory_space<vmem>>, vector<64x32xf32>
    %c0_6 = arith.constant 0 : index
    %c0_7 = arith.constant 0 : index
    %7 = vector.load %arg3[%c0_6, %c0_7] : memref<32x64xf32, #tpu.memory_space<vmem>>, vector<32x64xf32>
    %8 = arith.truncf %6 : vector<64x32xf32> to vector<64x32xbf16>
    %9 = arith.truncf %7 : vector<32x64xf32> to vector<32x64xbf16>
    %cst_8 = arith.constant dense<0.000000e+00> : vector<64x64xf32>
    %10 = tpu.matmul %8, %9, %cst_8 {dimension_numbers = #tpu.dot_dimension_numbers<[1], [0], [0], [1], [0, 0, 1, 1], [], []>} : vector<64x32xbf16>, vector<32x64xbf16>, vector<64x64xf32> -> vector<64x64xf32>
    %11 = vector.extract_strided_slice %10 {offsets = [0, 0], sizes = [64, 32], strides = [1, 1]} : vector<64x64xf32> to vector<64x32xf32>
    %12 = vector.extract_strided_slice %10 {offsets = [0, 32], sizes = [64, 32], strides = [1, 1]} : vector<64x64xf32> to vector<64x32xf32>
    %13 = vector.extract_strided_slice %5 {offsets = [0, 0], sizes = [2, 16], strides = [1, 1]} : vector<2x32xf32> to vector<2x16xf32>
    %14 = vector.extract_strided_slice %11 {offsets = [0, 0], sizes = [64, 16], strides = [1, 1]} : vector<64x32xf32> to vector<64x16xf32>
    %15 = vector.extract_strided_slice %12 {offsets = [0, 0], sizes = [64, 16], strides = [1, 1]} : vector<64x32xf32> to vector<64x16xf32>
    %16 = arith.truncf %13 : vector<2x16xf32> to vector<2x16xbf16>
    %17 = arith.truncf %14 : vector<64x16xf32> to vector<64x16xbf16>
    %cst_9 = arith.constant dense<0.000000e+00> : vector<2x64xf32>
    %18 = tpu.matmul %16, %17, %cst_9 {dimension_numbers = #tpu.dot_dimension_numbers<[1], [1], [0], [0], [0, 0, 1, 0], [], []>} : vector<2x16xbf16>, vector<64x16xbf16>, vector<2x64xf32> -> vector<2x64xf32>
    %cst_10 = arith.constant 2.500000e-01 : f32
    %19 = vector.broadcast %cst_10 : f32 to vector<2x64xf32>
    %20 = arith.mulf %18, %19 : vector<2x64xf32>
    %cst_11 = arith.constant dense<0xFF800000> : vector<2xf32>
    %21 = vector.multi_reduction <maximumf>, %20, %cst_11 [1] : vector<2x64xf32> to vector<2xf32>
    %22 = vector.shape_cast %21 : vector<2xf32> to vector<2x1xf32>
    %23 = vector.broadcast %22 : vector<2x1xf32> to vector<2x64xf32>
    %24 = arith.subf %20, %23 : vector<2x64xf32>
    %25 = math.exp %24 : vector<2x64xf32>
    %cst_12 = arith.constant dense<0.000000e+00> : vector<2xf32>
    %26 = vector.multi_reduction <add>, %25, %cst_12 [1] : vector<2x64xf32> to vector<2xf32>
    %27 = vector.shape_cast %26 : vector<2xf32> to vector<2x1xf32>
    %28 = vector.broadcast %27 : vector<2x1xf32> to vector<2x64xf32>
    %29 = arith.divf %25, %28 : vector<2x64xf32>
    %30 = arith.truncf %29 : vector<2x64xf32> to vector<2x64xbf16>
    %31 = arith.truncf %15 : vector<64x16xf32> to vector<64x16xbf16>
    %cst_13 = arith.constant dense<0.000000e+00> : vector<2x16xf32>
    %32 = tpu.matmul %30, %31, %cst_13 {dimension_numbers = #tpu.dot_dimension_numbers<[1], [0], [0], [1], [0, 0, 1, 1], [], []>} : vector<2x64xbf16>, vector<64x16xbf16>, vector<2x16xf32> -> vector<2x16xf32>
    %33 = vector.extract_strided_slice %5 {offsets = [0, 16], sizes = [2, 16], strides = [1, 1]} : vector<2x32xf32> to vector<2x16xf32>
    %34 = vector.extract_strided_slice %11 {offsets = [0, 16], sizes = [64, 16], strides = [1, 1]} : vector<64x32xf32> to vector<64x16xf32>
    %35 = vector.extract_strided_slice %12 {offsets = [0, 16], sizes = [64, 16], strides = [1, 1]} : vector<64x32xf32> to vector<64x16xf32>
    %36 = arith.truncf %33 : vector<2x16xf32> to vector<2x16xbf16>
    %37 = arith.truncf %34 : vector<64x16xf32> to vector<64x16xbf16>
    %cst_14 = arith.constant dense<0.000000e+00> : vector<2x64xf32>
    %38 = tpu.matmul %36, %37, %cst_14 {dimension_numbers = #tpu.dot_dimension_numbers<[1], [1], [0], [0], [0, 0, 1, 0], [], []>} : vector<2x16xbf16>, vector<64x16xbf16>, vector<2x64xf32> -> vector<2x64xf32>
    %cst_15 = arith.constant 2.500000e-01 : f32
    %39 = vector.broadcast %cst_15 : f32 to vector<2x64xf32>
    %40 = arith.mulf %38, %39 : vector<2x64xf32>
    %cst_16 = arith.constant dense<0xFF800000> : vector<2xf32>
    %41 = vector.multi_reduction <maximumf>, %40, %cst_16 [1] : vector<2x64xf32> to vector<2xf32>
    %42 = vector.shape_cast %41 : vector<2xf32> to vector<2x1xf32>
    %43 = vector.broadcast %42 : vector<2x1xf32> to vector<2x64xf32>
    %44 = arith.subf %40, %43 : vector<2x64xf32>
    %45 = math.exp %44 : vector<2x64xf32>
    %cst_17 = arith.constant dense<0.000000e+00> : vector<2xf32>
    %46 = vector.multi_reduction <add>, %45, %cst_17 [1] : vector<2x64xf32> to vector<2xf32>
    %47 = vector.shape_cast %46 : vector<2xf32> to vector<2x1xf32>
    %48 = vector.broadcast %47 : vector<2x1xf32> to vector<2x64xf32>
    %49 = arith.divf %45, %48 : vector<2x64xf32>
    %50 = arith.addf %29, %49 : vector<2x64xf32>
    %51 = arith.truncf %49 : vector<2x64xf32> to vector<2x64xbf16>
    %52 = arith.truncf %35 : vector<64x16xf32> to vector<64x16xbf16>
    %cst_18 = arith.constant dense<0.000000e+00> : vector<2x16xf32>
    %53 = tpu.matmul %51, %52, %cst_18 {dimension_numbers = #tpu.dot_dimension_numbers<[1], [0], [0], [1], [0, 0, 1, 1], [], []>} : vector<2x64xbf16>, vector<64x16xbf16>, vector<2x16xf32> -> vector<2x16xf32>
    %54 = tpu.concatenate %32, %53 in 1 : vector<2x16xf32>, vector<2x16xf32> -> vector<2x32xf32>
    %c0_19 = arith.constant 0 : index
    %c0_20 = arith.constant 0 : index
    %55 = vector.load %arg4[%c0_19, %c0_20] : memref<32x128xf32, #tpu.memory_space<vmem>>, vector<32x128xf32>
    %56 = arith.truncf %54 : vector<2x32xf32> to vector<2x32xbf16>
    %57 = arith.truncf %55 : vector<32x128xf32> to vector<32x128xbf16>
    %cst_21 = arith.constant dense<0.000000e+00> : vector<2x128xf32>
    %58 = tpu.matmul %56, %57, %cst_21 {dimension_numbers = #tpu.dot_dimension_numbers<[1], [0], [0], [1], [0, 0, 1, 1], [], []>} : vector<2x32xbf16>, vector<32x128xbf16>, vector<2x128xf32> -> vector<2x128xf32>
    %c0_22 = arith.constant 0 : index
    %c0_23 = arith.constant 0 : index
    %59 = vector.load %arg5[%c0_22, %c0_23] : memref<1x128xf32, #tpu.memory_space<vmem>>, vector<1x128xf32>
    %60 = vector.broadcast %59 : vector<1x128xf32> to vector<2x128xf32>
    %61 = arith.addf %58, %60 : vector<2x128xf32>
    %c0_24 = arith.constant 0 : index
    %c0_25 = arith.constant 0 : index
    %62 = vector.load %arg6[%c0_24, %c0_25] : memref<2x128xf32, #tpu.memory_space<vmem>>, vector<2x128xf32>
    tpu.vector_store %arg6[%c0_24, %c0_25], %61 {strides = array<i32>} : memref<2x128xf32, #tpu.memory_space<vmem>>, vector<2x128xf32>,
    %cst_26 = arith.constant 5.000000e-01 : f32
    %63 = vector.broadcast %cst_26 : f32 to vector<2x64xf32>
    %64 = arith.mulf %50, %63 : vector<2x64xf32>
    %c0_27 = arith.constant 0 : index
    %c0_28 = arith.constant 0 : index
    %65 = vector.load %arg7[%c0_27, %c0_28] : memref<2x64xf32, #tpu.memory_space<vmem>>, vector<2x64xf32>
    tpu.vector_store %arg7[%c0_27, %c0_28], %64 {strides = array<i32>} : memref<2x64xf32, #tpu.memory_space<vmem>>, vector<2x64xf32>,
    return
  }
}

module attributes {stable_mosaic.version = 11 : i64} {
  func.func @_encoder_kernel(%arg0: i32, %arg1: i32, %arg2: memref<2x64x48xf32, #tpu.memory_space<vmem>>, %arg3: memref<48x32xbf16, #tpu.memory_space<vmem>>, %arg4: memref<1x32xf32, #tpu.memory_space<vmem>>, %arg5: memref<1x64x32xf32, #tpu.memory_space<vmem>>, %arg6: memref<1x1x32xf32, #tpu.memory_space<vmem>>, %arg7: memref<1x1x32xf32, #tpu.memory_space<vmem>>, %arg8: memref<1x32x96xbf16, #tpu.memory_space<vmem>>, %arg9: memref<1x1x96xf32, #tpu.memory_space<vmem>>, %arg10: memref<1x32x32xbf16, #tpu.memory_space<vmem>>, %arg11: memref<1x1x32xf32, #tpu.memory_space<vmem>>, %arg12: memref<1x1x32xf32, #tpu.memory_space<vmem>>, %arg13: memref<1x1x32xf32, #tpu.memory_space<vmem>>, %arg14: memref<1x32x64xbf16, #tpu.memory_space<vmem>>, %arg15: memref<1x1x64xf32, #tpu.memory_space<vmem>>, %arg16: memref<1x64x32xbf16, #tpu.memory_space<vmem>>, %arg17: memref<1x1x32xf32, #tpu.memory_space<vmem>>, %arg18: memref<1x32xf32, #tpu.memory_space<vmem>>, %arg19: memref<1x32xf32, #tpu.memory_space<vmem>>, %arg20: memref<2x1x32xf32, #tpu.memory_space<vmem>>, %arg21: memref<2x64x32xf32, #tpu.memory_space<vmem>>) attributes {dimension_semantics = [#tpu.dimension_semantics<parallel>, #tpu.dimension_semantics<arbitrary>], iteration_bounds = array<i64: 1, 2>, scalar_prefetch = 0 : i64, scratch_operands = 1 : i64, tpu.core_type = #tpu.core_type<tc>, window_params = [{transform_indices = @transform_0, window_bounds = array<i64: 2, 64, 48>}, {pipeline_mode = #tpu.pipeline_mode<synchronous>, transform_indices = @transform_1, window_bounds = array<i64: 48, 32>}, {pipeline_mode = #tpu.pipeline_mode<synchronous>, transform_indices = @transform_2, window_bounds = array<i64: 1, 32>}, {pipeline_mode = #tpu.pipeline_mode<synchronous>, transform_indices = @transform_3, window_bounds = array<i64: 1, 64, 32>}, {transform_indices = @transform_4, window_bounds = array<i64: 1, 1, 32>}, {transform_indices = @transform_5, window_bounds = array<i64: 1, 1, 32>}, {transform_indices = @transform_6, window_bounds = array<i64: 1, 32, 96>}, {transform_indices = @transform_7, window_bounds = array<i64: 1, 1, 96>}, {transform_indices = @transform_8, window_bounds = array<i64: 1, 32, 32>}, {transform_indices = @transform_9, window_bounds = array<i64: 1, 1, 32>}, {transform_indices = @transform_10, window_bounds = array<i64: 1, 1, 32>}, {transform_indices = @transform_11, window_bounds = array<i64: 1, 1, 32>}, {transform_indices = @transform_12, window_bounds = array<i64: 1, 32, 64>}, {transform_indices = @transform_13, window_bounds = array<i64: 1, 1, 64>}, {transform_indices = @transform_14, window_bounds = array<i64: 1, 64, 32>}, {transform_indices = @transform_15, window_bounds = array<i64: 1, 1, 32>}, {pipeline_mode = #tpu.pipeline_mode<synchronous>, transform_indices = @transform_16, window_bounds = array<i64: 1, 32>}, {pipeline_mode = #tpu.pipeline_mode<synchronous>, transform_indices = @transform_17, window_bounds = array<i64: 1, 32>}, {transform_indices = @transform_18, window_bounds = array<i64: 2, 1, 32>}]} {
    %c0_i32 = arith.constant 0 : i32
    %0 = arith.cmpi eq, %arg1, %c0_i32 : i32
    %1 = arith.extui %0 : i1 to i32
    %c0_i32_0 = arith.constant 0 : i32
    %2 = arith.cmpi ne, %1, %c0_i32_0 : i32
    scf.if %2 {
      %c0_80 = arith.constant 0 : index
      %c0_81 = arith.constant 0 : index
      %c0_82 = arith.constant 0 : index
      %200 = vector.load %arg2[%c0_80, %c0_81, %c0_82] : memref<2x64x48xf32, #tpu.memory_space<vmem>>, vector<2x64x48xf32>
      %201 = vector.shape_cast %200 : vector<2x64x48xf32> to vector<128x48xf32>
      %c0_83 = arith.constant 0 : index
      %c0_84 = arith.constant 0 : index
      %202 = vector.load %arg3[%c0_83, %c0_84] : memref<48x32xbf16, #tpu.memory_space<vmem>>, vector<48x32xbf16>
      %203 = arith.truncf %201 : vector<128x48xf32> to vector<128x48xbf16>
      %cst_85 = arith.constant dense<0.000000e+00> : vector<128x32xf32>
      %204 = tpu.matmul %203, %202, %cst_85 {dimension_numbers = #tpu.dot_dimension_numbers<[1], [0], [0], [1], [0, 0, 1, 1], [], []>} : vector<128x48xbf16>, vector<48x32xbf16>, vector<128x32xf32> -> vector<128x32xf32>
      %c0_86 = arith.constant 0 : index
      %c0_87 = arith.constant 0 : index
      %205 = vector.load %arg4[%c0_86, %c0_87] : memref<1x32xf32, #tpu.memory_space<vmem>>, vector<1x32xf32>
      %206 = vector.broadcast %205 : vector<1x32xf32> to vector<128x32xf32>
      %207 = arith.addf %204, %206 : vector<128x32xf32>
      %cst_88 = arith.constant 0.000000e+00 : f32
      %208 = vector.broadcast %cst_88 : f32 to vector<128x32xf32>
      %209 = arith.maximumf %207, %208 : vector<128x32xf32>
      %210 = vector.shape_cast %209 : vector<128x32xf32> to vector<2x64x32xf32>
      %c0_89 = arith.constant 0 : index
      %c0_90 = arith.constant 0 : index
      %c0_91 = arith.constant 0 : index
      %211 = vector.load %arg5[%c0_89, %c0_90, %c0_91] : memref<1x64x32xf32, #tpu.memory_space<vmem>>, vector<1x64x32xf32>
      %212 = vector.broadcast %211 : vector<1x64x32xf32> to vector<2x64x32xf32>
      %213 = arith.addf %210, %212 : vector<2x64x32xf32>
      %c0_92 = arith.constant 0 : index
      %c0_93 = arith.constant 0 : index
      %c0_94 = arith.constant 0 : index
      %214 = vector.load %arg21[%c0_92, %c0_93, %c0_94] : memref<2x64x32xf32, #tpu.memory_space<vmem>>, vector<2x64x32xf32>
      tpu.vector_store %arg21[%c0_92, %c0_93, %c0_94], %213 {strides = array<i32>} : memref<2x64x32xf32, #tpu.memory_space<vmem>>, vector<2x64x32xf32>,
    } else {
    }
    %c0 = arith.constant 0 : index
    %c0_1 = arith.constant 0 : index
    %c0_2 = arith.constant 0 : index
    %3 = vector.load %arg21[%c0, %c0_1, %c0_2] : memref<2x64x32xf32, #tpu.memory_space<vmem>>, vector<2x64x32xf32>
    %4 = vector.shape_cast %3 : vector<2x64x32xf32> to vector<128x32xf32>
    %c0_3 = arith.constant 0 : index
    %c0_4 = arith.constant 0 : index
    %c0_5 = arith.constant 0 : index
    %5 = vector.load %arg6[%c0_3, %c0_4, %c0_5] : memref<1x1x32xf32, #tpu.memory_space<vmem>>, vector<1x1x32xf32>
    %6 = vector.shape_cast %5 : vector<1x1x32xf32> to vector<32xf32>
    %c0_6 = arith.constant 0 : index
    %c0_7 = arith.constant 0 : index
    %c0_8 = arith.constant 0 : index
    %7 = vector.load %arg7[%c0_6, %c0_7, %c0_8] : memref<1x1x32xf32, #tpu.memory_space<vmem>>, vector<1x1x32xf32>
    %8 = vector.shape_cast %7 : vector<1x1x32xf32> to vector<32xf32>
    %cst = arith.constant dense<0.000000e+00> : vector<128xf32>
    %9 = vector.multi_reduction <add>, %4, %cst [1] : vector<128x32xf32> to vector<128xf32>
    %10 = vector.shape_cast %9 : vector<128xf32> to vector<128x1xf32>
    %cst_9 = arith.constant 3.200000e+01 : f32
    %11 = vector.broadcast %cst_9 : f32 to vector<128x1xf32>
    %12 = arith.divf %10, %11 : vector<128x1xf32>
    %13 = vector.broadcast %12 : vector<128x1xf32> to vector<128x32xf32>
    %14 = arith.subf %4, %13 : vector<128x32xf32>
    %15 = arith.mulf %14, %14 : vector<128x32xf32>
    %cst_10 = arith.constant dense<0.000000e+00> : vector<128xf32>
    %16 = vector.multi_reduction <add>, %15, %cst_10 [1] : vector<128x32xf32> to vector<128xf32>
    %17 = vector.shape_cast %16 : vector<128xf32> to vector<128x1xf32>
    %cst_11 = arith.constant 3.200000e+01 : f32
    %18 = vector.broadcast %cst_11 : f32 to vector<128x1xf32>
    %19 = arith.divf %17, %18 : vector<128x1xf32>
    %20 = vector.broadcast %12 : vector<128x1xf32> to vector<128x32xf32>
    %21 = arith.subf %4, %20 : vector<128x32xf32>
    %cst_12 = arith.constant 9.99999974E-6 : f32
    %22 = vector.broadcast %cst_12 : f32 to vector<128x1xf32>
    %23 = arith.addf %19, %22 : vector<128x1xf32>
    %24 = math.rsqrt %23 : vector<128x1xf32>
    %25 = vector.broadcast %24 : vector<128x1xf32> to vector<128x32xf32>
    %26 = arith.mulf %21, %25 : vector<128x32xf32>
    %27 = vector.shape_cast %6 : vector<32xf32> to vector<1x32xf32>
    %28 = vector.broadcast %27 : vector<1x32xf32> to vector<128x32xf32>
    %29 = arith.mulf %26, %28 : vector<128x32xf32>
    %30 = vector.shape_cast %8 : vector<32xf32> to vector<1x32xf32>
    %31 = vector.broadcast %30 : vector<1x32xf32> to vector<128x32xf32>
    %32 = arith.addf %29, %31 : vector<128x32xf32>
    %c0_13 = arith.constant 0 : index
    %c0_14 = arith.constant 0 : index
    %c0_15 = arith.constant 0 : index
    %33 = vector.load %arg8[%c0_13, %c0_14, %c0_15] : memref<1x32x96xbf16, #tpu.memory_space<vmem>>, vector<1x32x96xbf16>
    %34 = vector.shape_cast %33 : vector<1x32x96xbf16> to vector<32x96xbf16>
    %35 = arith.truncf %32 : vector<128x32xf32> to vector<128x32xbf16>
    %cst_16 = arith.constant dense<0.000000e+00> : vector<128x96xf32>
    %36 = tpu.matmul %35, %34, %cst_16 {dimension_numbers = #tpu.dot_dimension_numbers<[1], [0], [0], [1], [0, 0, 1, 1], [], []>} : vector<128x32xbf16>, vector<32x96xbf16>, vector<128x96xf32> -> vector<128x96xf32>
    %c0_17 = arith.constant 0 : index
    %c0_18 = arith.constant 0 : index
    %c0_19 = arith.constant 0 : index
    %37 = vector.load %arg9[%c0_17, %c0_18, %c0_19] : memref<1x1x96xf32, #tpu.memory_space<vmem>>, vector<1x1x96xf32>
    %38 = vector.shape_cast %37 : vector<1x1x96xf32> to vector<1x96xf32>
    %39 = vector.broadcast %38 : vector<1x96xf32> to vector<128x96xf32>
    %40 = arith.addf %36, %39 : vector<128x96xf32>
    %41 = vector.extract_strided_slice %40 {offsets = [0, 0], sizes = [64, 16], strides = [1, 1]} : vector<128x96xf32> to vector<64x16xf32>
    %42 = vector.extract_strided_slice %40 {offsets = [0, 32], sizes = [64, 16], strides = [1, 1]} : vector<128x96xf32> to vector<64x16xf32>
    %43 = vector.extract_strided_slice %40 {offsets = [0, 64], sizes = [64, 16], strides = [1, 1]} : vector<128x96xf32> to vector<64x16xf32>
    %44 = arith.truncf %41 : vector<64x16xf32> to vector<64x16xbf16>
    %45 = arith.truncf %42 : vector<64x16xf32> to vector<64x16xbf16>
    %cst_20 = arith.constant dense<0.000000e+00> : vector<64x64xf32>
    %46 = tpu.matmul %44, %45, %cst_20 {dimension_numbers = #tpu.dot_dimension_numbers<[1], [1], [0], [0], [0, 0, 1, 0], [], []>} : vector<64x16xbf16>, vector<64x16xbf16>, vector<64x64xf32> -> vector<64x64xf32>
    %cst_21 = arith.constant 2.500000e-01 : f32
    %47 = vector.broadcast %cst_21 : f32 to vector<64x64xf32>
    %48 = arith.mulf %46, %47 : vector<64x64xf32>
    %cst_22 = arith.constant dense<0xFF800000> : vector<64xf32>
    %49 = vector.multi_reduction <maximumf>, %48, %cst_22 [1] : vector<64x64xf32> to vector<64xf32>
    %50 = vector.shape_cast %49 : vector<64xf32> to vector<64x1xf32>
    %51 = vector.broadcast %50 : vector<64x1xf32> to vector<64x64xf32>
    %52 = arith.subf %48, %51 : vector<64x64xf32>
    %53 = math.exp %52 : vector<64x64xf32>
    %cst_23 = arith.constant dense<0.000000e+00> : vector<64xf32>
    %54 = vector.multi_reduction <add>, %53, %cst_23 [1] : vector<64x64xf32> to vector<64xf32>
    %55 = vector.shape_cast %54 : vector<64xf32> to vector<64x1xf32>
    %56 = tpu.reciprocal %55 {approx = true} : vector<64x1xf32> -> vector<64x1xf32>
    %57 = vector.broadcast %56 : vector<64x1xf32> to vector<64x64xf32>
    %58 = arith.mulf %53, %57 : vector<64x64xf32>
    %59 = arith.truncf %58 : vector<64x64xf32> to vector<64x64xbf16>
    %60 = arith.truncf %43 : vector<64x16xf32> to vector<64x16xbf16>
    %cst_24 = arith.constant dense<0.000000e+00> : vector<64x16xf32>
    %61 = tpu.matmul %59, %60, %cst_24 {dimension_numbers = #tpu.dot_dimension_numbers<[1], [0], [0], [1], [0, 0, 1, 1], [], []>} : vector<64x64xbf16>, vector<64x16xbf16>, vector<64x16xf32> -> vector<64x16xf32>
    %62 = vector.extract_strided_slice %40 {offsets = [0, 16], sizes = [64, 16], strides = [1, 1]} : vector<128x96xf32> to vector<64x16xf32>
    %63 = vector.extract_strided_slice %40 {offsets = [0, 48], sizes = [64, 16], strides = [1, 1]} : vector<128x96xf32> to vector<64x16xf32>
    %64 = vector.extract_strided_slice %40 {offsets = [0, 80], sizes = [64, 16], strides = [1, 1]} : vector<128x96xf32> to vector<64x16xf32>
    %65 = arith.truncf %62 : vector<64x16xf32> to vector<64x16xbf16>
    %66 = arith.truncf %63 : vector<64x16xf32> to vector<64x16xbf16>
    %cst_25 = arith.constant dense<0.000000e+00> : vector<64x64xf32>
    %67 = tpu.matmul %65, %66, %cst_25 {dimension_numbers = #tpu.dot_dimension_numbers<[1], [1], [0], [0], [0, 0, 1, 0], [], []>} : vector<64x16xbf16>, vector<64x16xbf16>, vector<64x64xf32> -> vector<64x64xf32>
    %cst_26 = arith.constant 2.500000e-01 : f32
    %68 = vector.broadcast %cst_26 : f32 to vector<64x64xf32>
    %69 = arith.mulf %67, %68 : vector<64x64xf32>
    %cst_27 = arith.constant dense<0xFF800000> : vector<64xf32>
    %70 = vector.multi_reduction <maximumf>, %69, %cst_27 [1] : vector<64x64xf32> to vector<64xf32>
    %71 = vector.shape_cast %70 : vector<64xf32> to vector<64x1xf32>
    %72 = vector.broadcast %71 : vector<64x1xf32> to vector<64x64xf32>
    %73 = arith.subf %69, %72 : vector<64x64xf32>
    %74 = math.exp %73 : vector<64x64xf32>
    %cst_28 = arith.constant dense<0.000000e+00> : vector<64xf32>
    %75 = vector.multi_reduction <add>, %74, %cst_28 [1] : vector<64x64xf32> to vector<64xf32>
    %76 = vector.shape_cast %75 : vector<64xf32> to vector<64x1xf32>
    %77 = tpu.reciprocal %76 {approx = true} : vector<64x1xf32> -> vector<64x1xf32>
    %78 = vector.broadcast %77 : vector<64x1xf32> to vector<64x64xf32>
    %79 = arith.mulf %74, %78 : vector<64x64xf32>
    %80 = arith.truncf %79 : vector<64x64xf32> to vector<64x64xbf16>
    %81 = arith.truncf %64 : vector<64x16xf32> to vector<64x16xbf16>
    %cst_29 = arith.constant dense<0.000000e+00> : vector<64x16xf32>
    %82 = tpu.matmul %80, %81, %cst_29 {dimension_numbers = #tpu.dot_dimension_numbers<[1], [0], [0], [1], [0, 0, 1, 1], [], []>} : vector<64x64xbf16>, vector<64x16xbf16>, vector<64x16xf32> -> vector<64x16xf32>
    %83 = tpu.concatenate %61, %82 in 1 : vector<64x16xf32>, vector<64x16xf32> -> vector<64x32xf32>
    %84 = vector.extract_strided_slice %40 {offsets = [64, 0], sizes = [64, 16], strides = [1, 1]} : vector<128x96xf32> to vector<64x16xf32>
    %85 = vector.extract_strided_slice %40 {offsets = [64, 32], sizes = [64, 16], strides = [1, 1]} : vector<128x96xf32> to vector<64x16xf32>
    %86 = vector.extract_strided_slice %40 {offsets = [64, 64], sizes = [64, 16], strides = [1, 1]} : vector<128x96xf32> to vector<64x16xf32>
    %87 = arith.truncf %84 : vector<64x16xf32> to vector<64x16xbf16>
    %88 = arith.truncf %85 : vector<64x16xf32> to vector<64x16xbf16>
    %cst_30 = arith.constant dense<0.000000e+00> : vector<64x64xf32>
    %89 = tpu.matmul %87, %88, %cst_30 {dimension_numbers = #tpu.dot_dimension_numbers<[1], [1], [0], [0], [0, 0, 1, 0], [], []>} : vector<64x16xbf16>, vector<64x16xbf16>, vector<64x64xf32> -> vector<64x64xf32>
    %cst_31 = arith.constant 2.500000e-01 : f32
    %90 = vector.broadcast %cst_31 : f32 to vector<64x64xf32>
    %91 = arith.mulf %89, %90 : vector<64x64xf32>
    %cst_32 = arith.constant dense<0xFF800000> : vector<64xf32>
    %92 = vector.multi_reduction <maximumf>, %91, %cst_32 [1] : vector<64x64xf32> to vector<64xf32>
    %93 = vector.shape_cast %92 : vector<64xf32> to vector<64x1xf32>
    %94 = vector.broadcast %93 : vector<64x1xf32> to vector<64x64xf32>
    %95 = arith.subf %91, %94 : vector<64x64xf32>
    %96 = math.exp %95 : vector<64x64xf32>
    %cst_33 = arith.constant dense<0.000000e+00> : vector<64xf32>
    %97 = vector.multi_reduction <add>, %96, %cst_33 [1] : vector<64x64xf32> to vector<64xf32>
    %98 = vector.shape_cast %97 : vector<64xf32> to vector<64x1xf32>
    %99 = tpu.reciprocal %98 {approx = true} : vector<64x1xf32> -> vector<64x1xf32>
    %100 = vector.broadcast %99 : vector<64x1xf32> to vector<64x64xf32>
    %101 = arith.mulf %96, %100 : vector<64x64xf32>
    %102 = arith.truncf %101 : vector<64x64xf32> to vector<64x64xbf16>
    %103 = arith.truncf %86 : vector<64x16xf32> to vector<64x16xbf16>
    %cst_34 = arith.constant dense<0.000000e+00> : vector<64x16xf32>
    %104 = tpu.matmul %102, %103, %cst_34 {dimension_numbers = #tpu.dot_dimension_numbers<[1], [0], [0], [1], [0, 0, 1, 1], [], []>} : vector<64x64xbf16>, vector<64x16xbf16>, vector<64x16xf32> -> vector<64x16xf32>
    %105 = vector.extract_strided_slice %40 {offsets = [64, 16], sizes = [64, 16], strides = [1, 1]} : vector<128x96xf32> to vector<64x16xf32>
    %106 = vector.extract_strided_slice %40 {offsets = [64, 48], sizes = [64, 16], strides = [1, 1]} : vector<128x96xf32> to vector<64x16xf32>
    %107 = vector.extract_strided_slice %40 {offsets = [64, 80], sizes = [64, 16], strides = [1, 1]} : vector<128x96xf32> to vector<64x16xf32>
    %108 = arith.truncf %105 : vector<64x16xf32> to vector<64x16xbf16>
    %109 = arith.truncf %106 : vector<64x16xf32> to vector<64x16xbf16>
    %cst_35 = arith.constant dense<0.000000e+00> : vector<64x64xf32>
    %110 = tpu.matmul %108, %109, %cst_35 {dimension_numbers = #tpu.dot_dimension_numbers<[1], [1], [0], [0], [0, 0, 1, 0], [], []>} : vector<64x16xbf16>, vector<64x16xbf16>, vector<64x64xf32> -> vector<64x64xf32>
    %cst_36 = arith.constant 2.500000e-01 : f32
    %111 = vector.broadcast %cst_36 : f32 to vector<64x64xf32>
    %112 = arith.mulf %110, %111 : vector<64x64xf32>
    %cst_37 = arith.constant dense<0xFF800000> : vector<64xf32>
    %113 = vector.multi_reduction <maximumf>, %112, %cst_37 [1] : vector<64x64xf32> to vector<64xf32>
    %114 = vector.shape_cast %113 : vector<64xf32> to vector<64x1xf32>
    %115 = vector.broadcast %114 : vector<64x1xf32> to vector<64x64xf32>
    %116 = arith.subf %112, %115 : vector<64x64xf32>
    %117 = math.exp %116 : vector<64x64xf32>
    %cst_38 = arith.constant dense<0.000000e+00> : vector<64xf32>
    %118 = vector.multi_reduction <add>, %117, %cst_38 [1] : vector<64x64xf32> to vector<64xf32>
    %119 = vector.shape_cast %118 : vector<64xf32> to vector<64x1xf32>
    %120 = tpu.reciprocal %119 {approx = true} : vector<64x1xf32> -> vector<64x1xf32>
    %121 = vector.broadcast %120 : vector<64x1xf32> to vector<64x64xf32>
    %122 = arith.mulf %117, %121 : vector<64x64xf32>
    %123 = arith.truncf %122 : vector<64x64xf32> to vector<64x64xbf16>
    %124 = arith.truncf %107 : vector<64x16xf32> to vector<64x16xbf16>
    %cst_39 = arith.constant dense<0.000000e+00> : vector<64x16xf32>
    %125 = tpu.matmul %123, %124, %cst_39 {dimension_numbers = #tpu.dot_dimension_numbers<[1], [0], [0], [1], [0, 0, 1, 1], [], []>} : vector<64x64xbf16>, vector<64x16xbf16>, vector<64x16xf32> -> vector<64x16xf32>
    %126 = tpu.concatenate %104, %125 in 1 : vector<64x16xf32>, vector<64x16xf32> -> vector<64x32xf32>
    %127 = tpu.concatenate %83, %126 in 0 : vector<64x32xf32>, vector<64x32xf32> -> vector<128x32xf32>
    %c0_40 = arith.constant 0 : index
    %c0_41 = arith.constant 0 : index
    %c0_42 = arith.constant 0 : index
    %128 = vector.load %arg10[%c0_40, %c0_41, %c0_42] : memref<1x32x32xbf16, #tpu.memory_space<vmem>>, vector<1x32x32xbf16>
    %129 = vector.shape_cast %128 : vector<1x32x32xbf16> to vector<32x32xbf16>
    %130 = arith.truncf %127 : vector<128x32xf32> to vector<128x32xbf16>
    %cst_43 = arith.constant dense<0.000000e+00> : vector<128x32xf32>
    %131 = tpu.matmul %130, %129, %cst_43 {dimension_numbers = #tpu.dot_dimension_numbers<[1], [0], [0], [1], [0, 0, 1, 1], [], []>} : vector<128x32xbf16>, vector<32x32xbf16>, vector<128x32xf32> -> vector<128x32xf32>
    %132 = arith.addf %4, %131 : vector<128x32xf32>
    %c0_44 = arith.constant 0 : index
    %c0_45 = arith.constant 0 : index
    %c0_46 = arith.constant 0 : index
    %133 = vector.load %arg11[%c0_44, %c0_45, %c0_46] : memref<1x1x32xf32, #tpu.memory_space<vmem>>, vector<1x1x32xf32>
    %134 = vector.shape_cast %133 : vector<1x1x32xf32> to vector<1x32xf32>
    %135 = vector.broadcast %134 : vector<1x32xf32> to vector<128x32xf32>
    %136 = arith.addf %132, %135 : vector<128x32xf32>
    %c0_47 = arith.constant 0 : index
    %c0_48 = arith.constant 0 : index
    %c0_49 = arith.constant 0 : index
    %137 = vector.load %arg12[%c0_47, %c0_48, %c0_49] : memref<1x1x32xf32, #tpu.memory_space<vmem>>, vector<1x1x32xf32>
    %138 = vector.shape_cast %137 : vector<1x1x32xf32> to vector<32xf32>
    %c0_50 = arith.constant 0 : index
    %c0_51 = arith.constant 0 : index
    %c0_52 = arith.constant 0 : index
    %139 = vector.load %arg13[%c0_50, %c0_51, %c0_52] : memref<1x1x32xf32, #tpu.memory_space<vmem>>, vector<1x1x32xf32>
    %140 = vector.shape_cast %139 : vector<1x1x32xf32> to vector<32xf32>
    %cst_53 = arith.constant dense<0.000000e+00> : vector<128xf32>
    %141 = vector.multi_reduction <add>, %136, %cst_53 [1] : vector<128x32xf32> to vector<128xf32>
    %142 = vector.shape_cast %141 : vector<128xf32> to vector<128x1xf32>
    %cst_54 = arith.constant 3.200000e+01 : f32
    %143 = vector.broadcast %cst_54 : f32 to vector<128x1xf32>
    %144 = arith.divf %142, %143 : vector<128x1xf32>
    %145 = vector.broadcast %144 : vector<128x1xf32> to vector<128x32xf32>
    %146 = arith.subf %136, %145 : vector<128x32xf32>
    %147 = arith.mulf %146, %146 : vector<128x32xf32>
    %cst_55 = arith.constant dense<0.000000e+00> : vector<128xf32>
    %148 = vector.multi_reduction <add>, %147, %cst_55 [1] : vector<128x32xf32> to vector<128xf32>
    %149 = vector.shape_cast %148 : vector<128xf32> to vector<128x1xf32>
    %cst_56 = arith.constant 3.200000e+01 : f32
    %150 = vector.broadcast %cst_56 : f32 to vector<128x1xf32>
    %151 = arith.divf %149, %150 : vector<128x1xf32>
    %152 = vector.broadcast %144 : vector<128x1xf32> to vector<128x32xf32>
    %153 = arith.subf %136, %152 : vector<128x32xf32>
    %cst_57 = arith.constant 9.99999974E-6 : f32
    %154 = vector.broadcast %cst_57 : f32 to vector<128x1xf32>
    %155 = arith.addf %151, %154 : vector<128x1xf32>
    %156 = math.rsqrt %155 : vector<128x1xf32>
    %157 = vector.broadcast %156 : vector<128x1xf32> to vector<128x32xf32>
    %158 = arith.mulf %153, %157 : vector<128x32xf32>
    %159 = vector.shape_cast %138 : vector<32xf32> to vector<1x32xf32>
    %160 = vector.broadcast %159 : vector<1x32xf32> to vector<128x32xf32>
    %161 = arith.mulf %158, %160 : vector<128x32xf32>
    %162 = vector.shape_cast %140 : vector<32xf32> to vector<1x32xf32>
    %163 = vector.broadcast %162 : vector<1x32xf32> to vector<128x32xf32>
    %164 = arith.addf %161, %163 : vector<128x32xf32>
    %c0_58 = arith.constant 0 : index
    %c0_59 = arith.constant 0 : index
    %c0_60 = arith.constant 0 : index
    %165 = vector.load %arg14[%c0_58, %c0_59, %c0_60] : memref<1x32x64xbf16, #tpu.memory_space<vmem>>, vector<1x32x64xbf16>
    %166 = vector.shape_cast %165 : vector<1x32x64xbf16> to vector<32x64xbf16>
    %167 = arith.truncf %164 : vector<128x32xf32> to vector<128x32xbf16>
    %cst_61 = arith.constant dense<0.000000e+00> : vector<128x64xf32>
    %168 = tpu.matmul %167, %166, %cst_61 {dimension_numbers = #tpu.dot_dimension_numbers<[1], [0], [0], [1], [0, 0, 1, 1], [], []>} : vector<128x32xbf16>, vector<32x64xbf16>, vector<128x64xf32> -> vector<128x64xf32>
    %c0_62 = arith.constant 0 : index
    %c0_63 = arith.constant 0 : index
    %c0_64 = arith.constant 0 : index
    %169 = vector.load %arg15[%c0_62, %c0_63, %c0_64] : memref<1x1x64xf32, #tpu.memory_space<vmem>>, vector<1x1x64xf32>
    %170 = vector.shape_cast %169 : vector<1x1x64xf32> to vector<1x64xf32>
    %171 = vector.broadcast %170 : vector<1x64xf32> to vector<128x64xf32>
    %172 = arith.addf %168, %171 : vector<128x64xf32>
    %173 = arith.mulf %172, %172 : vector<128x64xf32>
    %174 = arith.mulf %172, %173 : vector<128x64xf32>
    %cst_65 = arith.constant 4.471500e-02 : f32
    %175 = vector.broadcast %cst_65 : f32 to vector<128x64xf32>
    %176 = arith.mulf %175, %174 : vector<128x64xf32>
    %177 = arith.addf %172, %176 : vector<128x64xf32>
    %cst_66 = arith.constant 0.797884583 : f32
    %178 = vector.broadcast %cst_66 : f32 to vector<128x64xf32>
    %179 = arith.mulf %178, %177 : vector<128x64xf32>
    %180 = math.tanh %179 : vector<128x64xf32>
    %cst_67 = arith.constant 1.000000e+00 : f32
    %181 = vector.broadcast %cst_67 : f32 to vector<128x64xf32>
    %182 = arith.addf %181, %180 : vector<128x64xf32>
    %cst_68 = arith.constant 5.000000e-01 : f32
    %183 = vector.broadcast %cst_68 : f32 to vector<128x64xf32>
    %184 = arith.mulf %183, %182 : vector<128x64xf32>
    %185 = arith.mulf %172, %184 : vector<128x64xf32>
    %c0_69 = arith.constant 0 : index
    %c0_70 = arith.constant 0 : index
    %c0_71 = arith.constant 0 : index
    %186 = vector.load %arg16[%c0_69, %c0_70, %c0_71] : memref<1x64x32xbf16, #tpu.memory_space<vmem>>, vector<1x64x32xbf16>
    %187 = vector.shape_cast %186 : vector<1x64x32xbf16> to vector<64x32xbf16>
    %188 = arith.truncf %185 : vector<128x64xf32> to vector<128x64xbf16>
    %cst_72 = arith.constant dense<0.000000e+00> : vector<128x32xf32>
    %189 = tpu.matmul %188, %187, %cst_72 {dimension_numbers = #tpu.dot_dimension_numbers<[1], [0], [0], [1], [0, 0, 1, 1], [], []>} : vector<128x64xbf16>, vector<64x32xbf16>, vector<128x32xf32> -> vector<128x32xf32>
    %190 = arith.addf %136, %189 : vector<128x32xf32>
    %c0_73 = arith.constant 0 : index
    %c0_74 = arith.constant 0 : index
    %c0_75 = arith.constant 0 : index
    %191 = vector.load %arg17[%c0_73, %c0_74, %c0_75] : memref<1x1x32xf32, #tpu.memory_space<vmem>>, vector<1x1x32xf32>
    %192 = vector.shape_cast %191 : vector<1x1x32xf32> to vector<1x32xf32>
    %193 = vector.broadcast %192 : vector<1x32xf32> to vector<128x32xf32>
    %194 = arith.addf %190, %193 : vector<128x32xf32>
    %195 = vector.shape_cast %194 : vector<128x32xf32> to vector<2x64x32xf32>
    %c0_76 = arith.constant 0 : index
    %c0_77 = arith.constant 0 : index
    %c0_78 = arith.constant 0 : index
    %196 = vector.load %arg21[%c0_76, %c0_77, %c0_78] : memref<2x64x32xf32, #tpu.memory_space<vmem>>, vector<2x64x32xf32>
    tpu.vector_store %arg21[%c0_76, %c0_77, %c0_78], %195 {strides = array<i32>} : memref<2x64x32xf32, #tpu.memory_space<vmem>>, vector<2x64x32xf32>,
    %c1_i32 = arith.constant 1 : i32
    %197 = arith.cmpi eq, %arg1, %c1_i32 : i32
    %198 = arith.extui %197 : i1 to i32
    %c0_i32_79 = arith.constant 0 : i32
    %199 = arith.cmpi ne, %198, %c0_i32_79 : i32
    scf.if %199 {
      %c0_80 = arith.constant 0 : index
      %c0_81 = arith.constant 0 : index
      %200 = vector.load %arg18[%c0_80, %c0_81] : memref<1x32xf32, #tpu.memory_space<vmem>>, vector<1x32xf32>
      %201 = vector.shape_cast %200 : vector<1x32xf32> to vector<32xf32>
      %c0_82 = arith.constant 0 : index
      %c0_83 = arith.constant 0 : index
      %202 = vector.load %arg19[%c0_82, %c0_83] : memref<1x32xf32, #tpu.memory_space<vmem>>, vector<1x32xf32>
      %203 = vector.shape_cast %202 : vector<1x32xf32> to vector<32xf32>
      %cst_84 = arith.constant dense<0.000000e+00> : vector<128xf32>
      %204 = vector.multi_reduction <add>, %194, %cst_84 [1] : vector<128x32xf32> to vector<128xf32>
      %205 = vector.shape_cast %204 : vector<128xf32> to vector<128x1xf32>
      %cst_85 = arith.constant 3.200000e+01 : f32
      %206 = vector.broadcast %cst_85 : f32 to vector<128x1xf32>
      %207 = arith.divf %205, %206 : vector<128x1xf32>
      %208 = vector.broadcast %207 : vector<128x1xf32> to vector<128x32xf32>
      %209 = arith.subf %194, %208 : vector<128x32xf32>
      %210 = arith.mulf %209, %209 : vector<128x32xf32>
      %cst_86 = arith.constant dense<0.000000e+00> : vector<128xf32>
      %211 = vector.multi_reduction <add>, %210, %cst_86 [1] : vector<128x32xf32> to vector<128xf32>
      %212 = vector.shape_cast %211 : vector<128xf32> to vector<128x1xf32>
      %cst_87 = arith.constant 3.200000e+01 : f32
      %213 = vector.broadcast %cst_87 : f32 to vector<128x1xf32>
      %214 = arith.divf %212, %213 : vector<128x1xf32>
      %215 = vector.broadcast %207 : vector<128x1xf32> to vector<128x32xf32>
      %216 = arith.subf %194, %215 : vector<128x32xf32>
      %cst_88 = arith.constant 9.99999974E-6 : f32
      %217 = vector.broadcast %cst_88 : f32 to vector<128x1xf32>
      %218 = arith.addf %214, %217 : vector<128x1xf32>
      %219 = math.rsqrt %218 : vector<128x1xf32>
      %220 = vector.broadcast %219 : vector<128x1xf32> to vector<128x32xf32>
      %221 = arith.mulf %216, %220 : vector<128x32xf32>
      %222 = vector.shape_cast %201 : vector<32xf32> to vector<1x32xf32>
      %223 = vector.broadcast %222 : vector<1x32xf32> to vector<128x32xf32>
      %224 = arith.mulf %221, %223 : vector<128x32xf32>
      %225 = vector.shape_cast %203 : vector<32xf32> to vector<1x32xf32>
      %226 = vector.broadcast %225 : vector<1x32xf32> to vector<128x32xf32>
      %227 = arith.addf %224, %226 : vector<128x32xf32>
      %228 = vector.shape_cast %227 : vector<128x32xf32> to vector<2x64x32xf32>
      %cst_89 = arith.constant dense<0.000000e+00> : vector<2x32xf32>
      %229 = vector.multi_reduction <add>, %228, %cst_89 [1] : vector<2x64x32xf32> to vector<2x32xf32>
      %cst_90 = arith.constant 6.400000e+01 : f32
      %230 = vector.broadcast %cst_90 : f32 to vector<2x32xf32>
      %231 = arith.divf %229, %230 : vector<2x32xf32>
      %232 = vector.shape_cast %231 : vector<2x32xf32> to vector<2x1x32xf32>
      %c0_91 = arith.constant 0 : index
      %c0_92 = arith.constant 0 : index
      %c0_93 = arith.constant 0 : index
      %233 = vector.load %arg20[%c0_91, %c0_92, %c0_93] : memref<2x1x32xf32, #tpu.memory_space<vmem>>, vector<2x1x32xf32>
      tpu.vector_store %arg20[%c0_91, %c0_92, %c0_93], %232 {strides = array<i32>} : memref<2x1x32xf32, #tpu.memory_space<vmem>>, vector<2x1x32xf32>,
    } else {
    }
    return
  }
  func.func @transform_0(%arg0: i32, %arg1: i32) -> (i32, i32, i32) {
    %c0_i32 = arith.constant 0 : i32
    %c0_i32_0 = arith.constant 0 : i32
    %c0_i32_1 = arith.constant 0 : i32
    return %arg0, %c0_i32, %c0_i32_0 : i32, i32, i32
  }
  func.func @transform_1(%arg0: i32, %arg1: i32) -> (i32, i32) {
    %c0_i32 = arith.constant 0 : i32
    %c0_i32_0 = arith.constant 0 : i32
    %c0_i32_1 = arith.constant 0 : i32
    return %c0_i32, %c0_i32_0 : i32, i32
  }
  func.func @transform_2(%arg0: i32, %arg1: i32) -> (i32, i32) {
    %c0_i32 = arith.constant 0 : i32
    %c0_i32_0 = arith.constant 0 : i32
    %c0_i32_1 = arith.constant 0 : i32
    return %c0_i32, %c0_i32_0 : i32, i32
  }
  func.func @transform_3(%arg0: i32, %arg1: i32) -> (i32, i32, i32) {
    %c0_i32 = arith.constant 0 : i32
    %c0_i32_0 = arith.constant 0 : i32
    %c0_i32_1 = arith.constant 0 : i32
    %c0_i32_2 = arith.constant 0 : i32
    return %c0_i32, %c0_i32_0, %c0_i32_1 : i32, i32, i32
  }
  func.func @transform_4(%arg0: i32, %arg1: i32) -> (i32, i32, i32) {
    %c0_i32 = arith.constant 0 : i32
    %c0_i32_0 = arith.constant 0 : i32
    %c0_i32_1 = arith.constant 0 : i32
    return %arg1, %c0_i32, %c0_i32_0 : i32, i32, i32
  }
  func.func @transform_5(%arg0: i32, %arg1: i32) -> (i32, i32, i32) {
    %c0_i32 = arith.constant 0 : i32
    %c0_i32_0 = arith.constant 0 : i32
    %c0_i32_1 = arith.constant 0 : i32
    return %arg1, %c0_i32, %c0_i32_0 : i32, i32, i32
  }
  func.func @transform_6(%arg0: i32, %arg1: i32) -> (i32, i32, i32) {
    %c0_i32 = arith.constant 0 : i32
    %c0_i32_0 = arith.constant 0 : i32
    %c0_i32_1 = arith.constant 0 : i32
    return %arg1, %c0_i32, %c0_i32_0 : i32, i32, i32
  }
  func.func @transform_7(%arg0: i32, %arg1: i32) -> (i32, i32, i32) {
    %c0_i32 = arith.constant 0 : i32
    %c0_i32_0 = arith.constant 0 : i32
    %c0_i32_1 = arith.constant 0 : i32
    return %arg1, %c0_i32, %c0_i32_0 : i32, i32, i32
  }
  func.func @transform_8(%arg0: i32, %arg1: i32) -> (i32, i32, i32) {
    %c0_i32 = arith.constant 0 : i32
    %c0_i32_0 = arith.constant 0 : i32
    %c0_i32_1 = arith.constant 0 : i32
    return %arg1, %c0_i32, %c0_i32_0 : i32, i32, i32
  }
  func.func @transform_9(%arg0: i32, %arg1: i32) -> (i32, i32, i32) {
    %c0_i32 = arith.constant 0 : i32
    %c0_i32_0 = arith.constant 0 : i32
    %c0_i32_1 = arith.constant 0 : i32
    return %arg1, %c0_i32, %c0_i32_0 : i32, i32, i32
  }
  func.func @transform_10(%arg0: i32, %arg1: i32) -> (i32, i32, i32) {
    %c0_i32 = arith.constant 0 : i32
    %c0_i32_0 = arith.constant 0 : i32
    %c0_i32_1 = arith.constant 0 : i32
    return %arg1, %c0_i32, %c0_i32_0 : i32, i32, i32
  }
  func.func @transform_11(%arg0: i32, %arg1: i32) -> (i32, i32, i32) {
    %c0_i32 = arith.constant 0 : i32
    %c0_i32_0 = arith.constant 0 : i32
    %c0_i32_1 = arith.constant 0 : i32
    return %arg1, %c0_i32, %c0_i32_0 : i32, i32, i32
  }
  func.func @transform_12(%arg0: i32, %arg1: i32) -> (i32, i32, i32) {
    %c0_i32 = arith.constant 0 : i32
    %c0_i32_0 = arith.constant 0 : i32
    %c0_i32_1 = arith.constant 0 : i32
    return %arg1, %c0_i32, %c0_i32_0 : i32, i32, i32
  }
  func.func @transform_13(%arg0: i32, %arg1: i32) -> (i32, i32, i32) {
    %c0_i32 = arith.constant 0 : i32
    %c0_i32_0 = arith.constant 0 : i32
    %c0_i32_1 = arith.constant 0 : i32
    return %arg1, %c0_i32, %c0_i32_0 : i32, i32, i32
  }
  func.func @transform_14(%arg0: i32, %arg1: i32) -> (i32, i32, i32) {
    %c0_i32 = arith.constant 0 : i32
    %c0_i32_0 = arith.constant 0 : i32
    %c0_i32_1 = arith.constant 0 : i32
    return %arg1, %c0_i32, %c0_i32_0 : i32, i32, i32
  }
  func.func @transform_15(%arg0: i32, %arg1: i32) -> (i32, i32, i32) {
    %c0_i32 = arith.constant 0 : i32
    %c0_i32_0 = arith.constant 0 : i32
    %c0_i32_1 = arith.constant 0 : i32
    return %arg1, %c0_i32, %c0_i32_0 : i32, i32, i32
  }
  func.func @transform_16(%arg0: i32, %arg1: i32) -> (i32, i32) {
    %c0_i32 = arith.constant 0 : i32
    %c0_i32_0 = arith.constant 0 : i32
    %c0_i32_1 = arith.constant 0 : i32
    return %c0_i32, %c0_i32_0 : i32, i32
  }
  func.func @transform_17(%arg0: i32, %arg1: i32) -> (i32, i32) {
    %c0_i32 = arith.constant 0 : i32
    %c0_i32_0 = arith.constant 0 : i32
    %c0_i32_1 = arith.constant 0 : i32
    return %c0_i32, %c0_i32_0 : i32, i32
  }
  func.func @transform_18(%arg0: i32, %arg1: i32) -> (i32, i32, i32) {
    %c0_i32 = arith.constant 0 : i32
    %c0_i32_0 = arith.constant 0 : i32
    %c0_i32_1 = arith.constant 0 : i32
    return %arg0, %c0_i32, %c0_i32_0 : i32, i32, i32
  }
}

</mosaic_0001>

<bundles_post_ra>
// kernel: ct_apy_forward.3
= control target key start
LH: loop header
LB: loop body
LE: loop exit
PB: predicated region body
PF: predicated region fallthrough
CT: control target
= control target key end

     0   :  { %13 = vsyncpa [#allocation3], 0  ;;  %vm46_vm0 = vcmask 261120   ;;  %v727_v7 = vmov 0.0   ;;  %vm728_vm1 = vmmov 0   ;;  %s932_s0 = inlined_call_operand.vmem [shape: f32[2,1,32], index: 0, kind: input, shape index: {}]   ;;  %s933_s1 = inlined_call_operand.vmem [shape: f32[64,32], index: 1, kind: input, shape index: {}]   ;;  %s934_s2 = inlined_call_operand.vmem [shape: f32[32,32], index: 2, kind: input, shape index: {}]   ;;  %s935_s3 = inlined_call_operand.vmem [shape: f32[32,64], index: 3, kind: input, shape index: {}]   ;;  %s936_s4 = inlined_call_operand.vmem [shape: f32[32,128], index: 4, kind: input, shape index: {}]   ;;  %s937_s5 = inlined_call_operand.vmem [shape: f32[1,128], index: 5, kind: input, shape index: {}]   ;;  %s938_s6 = inlined_call_operand.hbm [shape: f32[2,128], index: 6, kind: output, shape index: {0}]   ;;  %s939_s7 = inlined_call_operand.hbm [shape: f32[2,64], index: 7, kind: output, shape index: {1}]  }
   0x1   :  { %v100_v0 = vld [vmem:[%s935_s3 + $0x10] sm:$0xff]  ;;  %v101_v1 = vld [vmem:[%s935_s3 + $0x18] sm:$0xff]  ;;  %v98_v2 = vld [vmem:[%s935_s3] sm:$0xff]  ;;  %591 = vmatprep.subr.bf16.mxu0 %v727_v7  ;;  %595 = vmatprep.mubr.msk.bf16.mxu0 %vm728_vm1, %v727_v7 }
   0x2   :  { %v107_v3 = vpack.c.bf16 %v101_v1, %v100_v0  ;;  %v99_v4 = vld [vmem:[%s935_s3 + $0x8] sm:$0xff]  ;;  %v90_v5 = vld [vmem:[%s933_s1] sm:$0xff]  ;;  %v92_v10 = vld [vmem:[%s933_s1 + $0x10] sm:$0xff] }
   0x3   :  { %v91_v6 = vld [vmem:[%s933_s1 + $0x8] sm:$0xff]  ;;  %v106_v8 = vpack.c.bf16 %v99_v4, %v98_v2  ;;  %v93_v11 = vld [vmem:[%s933_s1 + $0x18] sm:$0xff]  ;;  %v94_v12 = vld [vmem:[%s933_s1 + $0x20] sm:$0xff] }
   0x4   :  { %v102_v9 = vpack.c.bf16 %v91_v6, %v90_v5  ;;  %599 = vmatprep.subr.bf16.mxu1 %v107_v3  ;;  %v95_v13 = vld [vmem:[%s933_s1 + $0x28] sm:$0xff]  ;;  %v32_v14 = vld [vmem:[%s934_s2 + $0x10] sm:$0xff]  ;;  %v33_v15 = vld [vmem:[%s934_s2 + $0x18] sm:$0xff] }
   0x5   :  { %600 = vmatpush3.bf16.msra.mxu1 %v107_v3  ;;  %v30_v16 = vld [vmem:[%s934_s2] sm:$0xff]  ;;  %v37_v17 = vpack.c.bf16 %v33_v15, %v32_v14  ;;  %v31_v18 = vld [vmem:[%s934_s2 + $0x8] sm:$0xff] }
   0x6   :  { %603 = vmatprep.mubr.msk.bf16.mxu1 %vm46_vm0, %v102_v9  ;;  %601 = vmatprep.subr.bf16.mxu1 %v106_v8  ;;  %v28_v19 = vld [vmem:[%s932_s0] sm:$0x1]  ;;  %v29_v20 = vld [vmem:[%s932_s0 + $0x1] sm:$0x1] }
   0x7   :  { %v34_v21 = vpack.c.bf16 %v28_v19, %v28_v19  ;;  %v35_v22 = vpack.c.bf16 %v29_v20, %v29_v20 }
   0x8   :  { %14 = vsyncpa [#allocation5], 0  ;;  %v103_v23 = vpack.c.bf16 %v93_v11, %v92_v10  ;;  %592 = vmatpush3.bf16.msra.mxu0 %v37_v17  ;;  %v36_v24 = vpack.c.bf16 %v31_v18, %v30_v16  ;;  %v104_v25 = vpack.c.bf16 %v95_v13, %v94_v12  ;;  %vm43_vm2 = vcmask 1041409   ;;  %v96_v29 = vld [vmem:[%s933_s1 + $0x30] sm:$0xff]  ;;  %v97_v30 = vld [vmem:[%s933_s1 + $0x38] sm:$0xff]  ;;  %s729_s1 = smov 96  }
   0x9   :  { %602 = vmatpush3.bf16.msra.mxu1 %v106_v8  ;;  %593 = vmatprep.subr.bf16.mxu0 %v727_v7  ;;  %v40_v26 = vunpack.c.l.b16 %v34_v21  ;;  %v41_v27 = vunpack.c.l.b16 %v35_v22  ;;  %v105_v33 = vpack.c.bf16 %v97_v30, %v96_v29  ;;  %vm190_vm3 = vcmask 130048   ;;  %s730_s11 = smov 112   ;;  %s731_s12 = smov 80  }
   0xa   :  { %623 = vmatprep.subr.bf16.mxu1 %v727_v7  ;;  %vm247_vm4 = vcmask 517120   ;;  %vm276_vm5 = vcmask 523264   ;;  %s732_s20 = smov 16   ;;  %s733_s21 = smov [#allocation4]  }
   0xb   :  { %v42_v28 = vrot.slane %v41_v27, 7  ;;  %s536_s22 = sshll.u32 %s733_s21, 4  ;;  %s537_s22 = int_to_ptr.vmem [resolvable:$true] %s536_s22 }
   0xc   :  { %604 = vmatmul.mubr.msk.bf16.vlgmr.msra.gmra.mxu1 %vm46_vm0, %v103_v23  ;;  %594 = vmatpush3.bf16.msra.mxu0 %v36_v24  ;;  %p688_p1 = scmp.lt.s32.totalorder %s537_s22, %s537_s22 }
   0xd   :  { %607 = vmatprep.mubr.msk.bf16.mxu1 %vm46_vm0, %v104_v25  ;;  %v44_v31 = vsel %vm43_vm2, %v42_v28, %v40_v26  ;;  %611 = vmatprep.subr.bf16.mxu0 %v727_v7 }
   0xe   :  { %v45_v32 = vpack.c.b16 %v44_v31, %v44_v31 }
  0x10   :  { %596 = vmatmul.mubr.msk.bf16.vlgmr.msra.gmra.mxu0 %vm46_vm0, %v45_v32 }
  0x11   :  { %619 = vmatprep.mubr.msk.bf16.mxu0 %vm728_vm1, %v727_v7 }
  0x14   :  { %608 = vmatmul.mubr.msk.bf16.gmra.mxu1 %vm46_vm0, %v105_v33 }
  0x15   :  { %631 = vmatprep.mubr.msk.bf16.mxu1 %vm728_vm1, %v727_v7 }
  0xcc   :  { %v605_v34 = vpop.f32.mrf.mxu1 }
  0xce   :  { %v154_v35 = vpop.f32.mrf.mxu1 }
  0xd0   :  { %v606_v36 = vpop.f32.mrf.mxu1  ;;  %v84_v37 = vpop.f32.mrf.mxu0 }
  0xd1   :  { %v858_v51 = vpack.c.bf16 %v606_v36, %v605_v34  ;;  %v185_v53 = vpack.c.bf16 %v84_v37, %v84_v37 }
  0xd2   :  { %v157_v38 = vpop.f32.mrf.mxu1  ;;  %v597_v39 = vpop.f32.mrf.mxu0 }
  0xd3   :  { %v852_v49 = vpack.c.bf16 %v157_v38, %v154_v35  ;;  %v198_v52 = vsel %vm190_vm3, %v858_v51, 0 }
  0xd4   :  { %v609_v40 = vpop.f32.mrf.mxu1  ;;  %v87_v41 = vpop.f32.mrf.mxu0 }
  0xd5   :  { %v195_v54 = vsel %vm190_vm3, %v852_v49, 0 }
  0xd6   :  { %v170_v42 = vpop.f32.mrf.mxu1  ;;  %v598_v43 = vpop.f32.mrf.mxu0 }
  0xd8   :  { %v610_v44 = vpop.f32.mrf.mxu1 }
  0xd9   :  { %v844_v45 = vpack.c.bf16 %v610_v44, %v609_v40 }
  0xda   :  { %v173_v46 = vpop.f32.mrf.mxu1 }
  0xdb   :  { %270 = vrot.lane.b32.xlu1 %v844_v45, %s729_s1  ;;  %v204_v47 = vsel %vm190_vm3, %v844_v45, 0  ;;  %v188_v48 = vpack.c.bf16 %v173_v46, %v170_v42  ;;  %v463_v46 = vld [vmem:[%s936_s4 + $0x18] sm:$0xff] }
  0xdc   :  { %612 = vmatpush3.bf16.xpose.msra.mxu0 %v204_v47  ;;  %v460_v47 = vld [vmem:[%s936_s4] sm:$0xff] }
  0xdd   :  { %613 = vmatprep.subr.bf16.mxu0 %v727_v7  ;;  %v201_v50 = vsel %vm190_vm3, %v188_v48, 0 }
  0xdf   :  { %268 = vrot.lane.b32.xlu1 %v188_v48, %s729_s1 }
  0xe3   :  { %264 = vrot.lane.b32.xlu1 %v852_v49, %s729_s1 }
  0xe4   :  { %614 = vmatpush3.bf16.xpose.msra.mxu0 %v201_v50 }
  0xe5   :  { %615 = vmatprep.subr.bf16.mxu0 %v727_v7 }
  0xe7   :  { %329 = vrot.lane.b32.xlu1 %v844_v45, %s730_s11 }
  0xeb   :  { %327 = vrot.lane.b32.xlu1 %v188_v48, %s730_s11 }
  0xec   :  { %616 = vmatpush3.bf16.xpose.msra.mxu0 %v198_v52 }
  0xed   :  { %617 = vmatprep.subr.bf16.mxu0 %v727_v7 }
  0xef   :  { %325 = vrot.lane.b32.xlu1 %v858_v51, %s730_s11 }
  0xf3   :  { %323 = vrot.lane.b32.xlu1 %v852_v49, %s730_s11 }
  0xf4   :  { %618 = vmatpush3.bf16.xpose.msra.mxu0 %v195_v54 }
  0xf5   :  { %647 = vmatprep.subr.bf16.mxu0 %v727_v7 }
  0xf7   :  { %321 = vrot.lane.b32.xlu1 %v185_v53, %s730_s11 }
  0xfb   :  { %404 = vrot.lane.b32.xlu1 %v188_v48, %s731_s12  ;;  %620 = vmatmul.mubr.msk.bf16.vlgmr.msra.gmra.mxu0 %vm190_vm3, %v185_v53 }
  0xfc   :  { %655 = vmatprep.mubr.msk.bf16.mxu0 %vm728_vm1, %v727_v7 }
 0x14d   :  { %v271_v55 = vpop.permute.xlu1 %270 }
 0x14e   :  { %624 = vmatpush3.bf16.msra.mxu1 %v271_v55 }
 0x14f   :  { %625 = vmatprep.subr.bf16.mxu1 %v727_v7 }
 0x151   :  { %v269_v56 = vpop.permute.xlu1 %268 }
 0x152   :  { %626 = vmatpush3.bf16.msra.mxu1 %v269_v56 }
 0x153   :  { %627 = vmatprep.subr.bf16.mxu1 %v727_v7 }
 0x155   :  { %v265_v6 = vpop.permute.xlu1 %264 }
 0x159   :  { %v330_v10 = vpop.permute.xlu1 %329 }
 0x15a   :  { %v344_v12 = vsel %vm190_vm3, %v330_v10, 0 }
 0x15d   :  { %v328_v13 = vpop.permute.xlu1 %327 }
 0x15e   :  { %v341_v14 = vsel %vm190_vm3, %v328_v13, 0 }
 0x161   :  { %v326_v15 = vpop.permute.xlu1 %325 }
 0x162   :  { %v338_v16 = vsel %vm190_vm3, %v326_v15, 0 }
 0x165   :  { %v324_v17 = vpop.permute.xlu1 %323 }
 0x166   :  { %v335_v18 = vsel %vm190_vm3, %v324_v17, 0 }
 0x169   :  { %v322_v19 = vpop.permute.xlu1 %321 }
 0x16d   :  { %v405_v34 = vpop.permute.xlu1 %404 }
 0x1bb   :  { %v240_v57 = vpop.f32.mrf.mxu0 }
 0x1bc   :  { %v246_v58 = vmul.f32 0.25, %v240_v57 }
 0x1bd   :  { %v621_v59 = vpop.f32.mrf.mxu0 }
 0x1be   :  { %v248_v60 = vsel %vm247_vm4, %v246_v58, -inf }
 0x1bf   :  { %249 = vmax.xlane.f32.xlu0 %v248_v60  ;;  %v243_v61 = vpop.f32.mrf.mxu0 }
 0x1c1   :  { %v622_v62 = vpop.f32.mrf.mxu0 }
 0x248   :  { %v250_v63 = vpop.xlane.xlu0 %249 }
 0x249   :  { %v251_v0 = vsub.f32 %v246_v58, %v250_v63 }
 0x24b   :  { %v252_v1 = vmul.f32 1.442695, %v251_v0 }
 0x24d   :  { %675 = vpow2.f32 %v252_v1 }
 0x25a   :  { %v676_v2 = vpop.eup %675 }
 0x25b   :  { %v254_v3 = vsel %vm247_vm4, %v676_v2, 0.0 }
 0x25c   :  { %255 = vadd.xlane.f32.xlu0 %v254_v3 }
 0x272   :  { %266 = vrot.lane.b32.xlu0 %v858_v51, %s729_s1 }
 0x2e5   :  { %v256_v4 = vpop.xlane.xlu0 %255 }
 0x2e6   :  { %677 = vrcp.f32 %v256_v4 }
 0x2e9   :  { %v267_v5 = vpop.permute.xlu0 %266 }
 0x2ea   :  { %628 = vmatpush3.bf16.msra.mxu1 %v267_v5 }
 0x2eb   :  { %629 = vmatprep.subr.bf16.mxu1 %v727_v7 }
 0x2ee   :  { %630 = vmatpush3.bf16.msra.mxu1 %v265_v6 }
 0x2ef   :  { %635 = vmatprep.subr.bf16.mxu1 %v727_v7 }
 0x2f3   :  { %v678_v8 = vpop.eup %677 }
 0x2f4   :  { %v258_v9 = vmul.f32 %v678_v8, %v676_v2 }
 0x2f6   :  { %v259_v11 = vpack.c.bf16 %v258_v9, %v258_v9 }
 0x2f8   :  { %632 = vmatmul.mubr.msk.bf16.vlgmr.msra.gmra.mxu1 %vm276_vm5, %v259_v11 }
 0x2f9   :  { %636 = vmatpush3.bf16.xpose.msra.mxu1 %v344_v12  ;;  %643 = vmatprep.mubr.msk.bf16.mxu1 %vm728_vm1, %v727_v7 }
 0x2fa   :  { %637 = vmatprep.subr.bf16.mxu1 %v727_v7 }
 0x301   :  { %638 = vmatpush3.bf16.xpose.msra.mxu1 %v341_v14 }
 0x302   :  { %639 = vmatprep.subr.bf16.mxu1 %v727_v7 }
 0x309   :  { %640 = vmatpush3.bf16.xpose.msra.mxu1 %v338_v16 }
 0x30a   :  { %641 = vmatprep.subr.bf16.mxu1 %v727_v7 }
 0x311   :  { %642 = vmatpush3.bf16.xpose.msra.mxu1 %v335_v18 }
 0x318   :  { %644 = vmatmul.mubr.msk.bf16.vlgmr.msra.gmra.mxu1 %vm190_vm3, %v322_v19 }
 0x3b8   :  { %v314_v20 = vpop.f32.mrf.mxu1 }
 0x3ba   :  { %v633_v21 = vpop.f32.mrf.mxu1 }
 0x3bc   :  { %v317_v22 = vpop.f32.mrf.mxu1 }
 0x3be   :  { %v634_v23 = vpop.f32.mrf.mxu1 }
 0x3d8   :  { %v380_v24 = vpop.f32.mrf.mxu1 }
 0x3d9   :  { %v386_v25 = vmul.f32 0.25, %v380_v24 }
 0x3da   :  { %v645_v26 = vpop.f32.mrf.mxu1 }
 0x3db   :  { %v387_v27 = vsel %vm247_vm4, %v386_v25, -inf }
 0x3dc   :  { %388 = vmax.xlane.f32.xlu0 %v387_v27  ;;  %v383_v28 = vpop.f32.mrf.mxu1 }
 0x3de   :  { %v646_v29 = vpop.f32.mrf.mxu1 }
 0x3f2   :  { %406 = vrot.lane.b32.xlu0 %v844_v45, %s731_s12  ;;  %v462_v45 = vld [vmem:[%s936_s4 + $0x10] sm:$0xff] }
 0x3f3   :  { %v466_v48 = vpack.c.bf16 %v463_v46, %v462_v45 }
 0x3f6   :  { %402 = vrot.lane.b32.xlu0 %v858_v51, %s731_s12 }
 0x465   :  { %v389_v30 = vpop.xlane.xlu0 %388 }
 0x466   :  { %v390_v31 = vsub.f32 %v386_v25, %v389_v30 }
 0x468   :  { %v391_v32 = vmul.f32 1.442695, %v390_v31 }
 0x469   :  { %v407_v33 = vpop.permute.xlu0 %406 }
 0x46a   :  { %679 = vpow2.f32 %v391_v32  ;;  %648 = vmatpush3.bf16.msra.mxu0 %v407_v33 }
 0x46b   :  { %649 = vmatprep.subr.bf16.mxu0 %v727_v7 }
 0x46d   :  { %v403_v35 = vpop.permute.xlu0 %402 }
 0x46e   :  { %650 = vmatpush3.bf16.msra.mxu0 %v405_v34 }
 0x46f   :  { %651 = vmatprep.subr.bf16.mxu0 %v727_v7 }
 0x472   :  { %652 = vmatpush3.bf16.msra.mxu0 %v403_v35 }
 0x473   :  { %653 = vmatprep.subr.bf16.mxu0 %v727_v7 }
 0x477   :  { %v680_v36 = vpop.eup %679 }
 0x478   :  { %v393_v37 = vsel %vm247_vm4, %v680_v36, 0.0 }
 0x479   :  { %394 = vadd.xlane.f32.xlu1 %v393_v37 }
 0x48a   :  { %400 = vrot.lane.b32.xlu1 %v852_v49, %s731_s12  ;;  %v461_v49 = vld [vmem:[%s936_s4 + $0x8] sm:$0xff]  ;;  %s683_s4 = scalar_lea.vmem %s537_s22, 32 }
 0x48b   :  { %v465_v50 = vpack.c.bf16 %v461_v49, %v460_v47  ;;  %p684_p0 = scmp.ne.s32.totalorder %s537_s22, %s683_s4  ;;  %p689_p2 = scmp.lt.s32.totalorder %s683_s4, %s683_s4 }
 0x48d   :  { %p690_p3 = por %p689_p2, %p688_p1 }
 0x48f   :  { %p691_p4 = pnand %p690_p3, %p684_p0 }
 0x502   :  { %v395_v38 = vpop.xlane.xlu1 %394 }
 0x503   :  { %681 = vrcp.f32 %v395_v38 }
 0x506   :  { %v401_v39 = vpop.permute.xlu1 %400 }
 0x507   :  { %654 = vmatpush3.bf16.msra.mxu0 %v401_v39 }
 0x508   :  { %659 = vmatprep.subr.bf16.mxu0 %v727_v7 }
 0x510   :  { %v682_v40 = vpop.eup %681 }
 0x511   :  { %v397_v41 = vmul.f32 %v682_v40, %v680_v36 }
 0x513   :  { %v399_v42 = vpack.c.bf16 %v397_v41, %v397_v41  ;;  %v398_v43 = vadd.f32 %v397_v41, %v258_v9 }
 0x515   :  { %656 = vmatmul.mubr.msk.bf16.vlgmr.msra.gmra.mxu0 %vm276_vm5, %v399_v42  ;;  %v518_v44 = vmul.f32 0.5, %v398_v43 }
 0x516   :  { %663 = vmatprep.mubr.msk.bf16.mxu0 %vm728_vm1, %v727_v7  ;;  %660 = vmatpush3.bf16.msra.mxu0 %v466_v48 }
 0x517   :  { %519 = vst.msk [vmem:[#allocation4] sm:$0x3] %vm247_vm4, %v518_v44  ;;  %661 = vmatprep.subr.bf16.mxu0 %v727_v7 }
 0x51a   :  { %662 = vmatpush3.bf16.msra.mxu0 %v465_v50 }
 0x5d5   :  { %v449_v51 = vpop.f32.mrf.mxu0 }
 0x5d6   :  { %456 = vrot.lane.b32.xlu0 %v449_v51, %s732_s20 }
 0x5d7   :  { %v657_v52 = vpop.f32.mrf.mxu0 }
 0x5d9   :  { %v452_v53 = vpop.f32.mrf.mxu0 }
 0x5db   :  { %v658_v54 = vpop.f32.mrf.mxu0 }
 0x648   :  { %v457_v55 = vpop.permute.xlu0 %456 }
 0x649   :  { %v459_v56 = vsel %vm190_vm3, %v314_v20, %v457_v55 }
 0x64a   :  { %v464_v57 = vpack.c.bf16 %v459_v56, %v459_v56 }
 0x64c   :  { %664 = vmatmul.mubr.msk.bf16.vlgmr.msra.gmra.mxu0 %vm46_vm0, %v464_v57 }
 0x64d   :  { %694 = shalt.err (!%p691_p4)
}
 0x64e   :  { %539 = dma.vmem_to_hbm [thread:$0]  %s537_s22, 32, %s939_s7, [#allocation5]   ;;  %v557_v7 = vld [vmem:[%s937_s5] ss:$0 sm:$0xff] }
 0x64f   :  { %s734_s27 = smov [#allocation2]  }
 0x650   :  { %s526_s28 = sshll.u32 %s734_s27, 4  ;;  %s527_s28 = int_to_ptr.vmem [resolvable:$true] %s526_s28 }
 0x651   :  { %s703_s29 = scalar_lea.vmem %s527_s28, 32  ;;  %p708_p6 = scmp.lt.s32.totalorder %s527_s28, %s527_s28 }
 0x652   :  { %p704_p5 = scmp.ne.s32.totalorder %s527_s28, %s703_s29  ;;  %p709_p7 = scmp.lt.s32.totalorder %s703_s29, %s703_s29 }
 0x654   :  { %p710_p8 = por %p709_p7, %p708_p6 }
 0x656   :  { %p711_p9 = pnand %p710_p8, %p704_p5 }
 0x70c   :  { %v511_v58 = vpop.f32.mrf.mxu0 }
 0x70d   :  { %v512_v59 = vadd.f32 %v557_v7, %v511_v58 }
 0x70e   :  { %v665_v60 = vpop.f32.mrf.mxu0 }
 0x70f   :  { %517 = vst [vmem:[#allocation2] sm:$0x3] %v512_v59 }
 0x710   :  { %v514_v61 = vpop.f32.mrf.mxu0 }
 0x711   :  { %714 = shalt.err (!%p711_p9)
}
 0x712   :  { %529 = dma.vmem_to_hbm [thread:$0]  %s527_s28, 32, %s938_s6, [#allocation3]   ;;  %v666_v62 = vpop.f32.mrf.mxu0 }
 0x713   :  { %723 = dma.done.wait [#allocation3], 32  }
 0x714   :  { %724 = vsyncadd [#allocation3], 4294967264 }
 0x715   :  { %725 = dma.done.wait [#allocation5], 32  }
 0x716   :  { %726 = vsyncadd [#allocation5], 4294967264 }
 0x717   :  { %546 = vsyncpa [#allocation3], 1 }
 0x718   :  { %547 = vsyncpa [#allocation5], 1 }

// kernel: ct_apy_forward.2
= control target key start
LH: loop header
LB: loop body
LE: loop exit
PB: predicated region body
PF: predicated region fallthrough
CT: control target
= control target key end

     0   :  { %s5112_s27 = smov 0   ;;  %s5114_s28 = smov 0   ;;  %s6737_s0 = inlined_call_operand.vmem [shape: f32[2,64,48], index: 0, kind: input, shape index: {}]   ;;  %s6738_s1 = inlined_call_operand.vmem [shape: bf16[48,32], index: 1, kind: input, shape index: {}]   ;;  %s6739_s2 = inlined_call_operand.vmem [shape: f32[1,32], index: 2, kind: input, shape index: {}]   ;;  %s6740_s3 = inlined_call_operand.vmem [shape: f32[1,64,32], index: 3, kind: input, shape index: {}]   ;;  %s6741_s4 = inlined_call_operand.vmem [shape: f32[2,1,32], index: 4, kind: input, shape index: {}]   ;;  %s6742_s5 = inlined_call_operand.vmem [shape: f32[2,1,32], index: 5, kind: input, shape index: {}]   ;;  %s6743_s6 = inlined_call_operand.vmem [shape: bf16[2,32,96], index: 6, kind: input, shape index: {}]   ;;  %s6744_s7 = inlined_call_operand.vmem [shape: f32[2,1,96], index: 7, kind: input, shape index: {}]   ;;  %s6745_s8 = inlined_call_operand.vmem [shape: bf16[2,32,32], index: 8, kind: input, shape index: {}]   ;;  %s6746_s9 = inlined_call_operand.vmem [shape: f32[2,1,32], index: 9, kind: input, shape index: {}]   ;;  %s6747_s10 = inlined_call_operand.vmem [shape: f32[2,1,32], index: 10, kind: input, shape index: {}]   ;;  %s6748_s11 = inlined_call_operand.vmem [shape: f32[2,1,32], index: 11, kind: input, shape index: {}]   ;;  %s6749_s12 = inlined_call_operand.vmem [shape: bf16[2,32,64], index: 12, kind: input, shape index: {}]   ;;  %s6750_s13 = inlined_call_operand.vmem [shape: f32[2,1,64], index: 13, kind: input, shape index: {}]   ;;  %s6751_s14 = inlined_call_operand.vmem [shape: bf16[2,64,32], index: 14, kind: input, shape index: {}]   ;;  %s6752_s15 = inlined_call_operand.vmem [shape: f32[2,1,32], index: 15, kind: input, shape index: {}]   ;;  %s6753_s16 = inlined_call_operand.vmem [shape: f32[1,32], index: 16, kind: input, shape index: {}]   ;;  %s6754_s17 = inlined_call_operand.vmem [shape: f32[1,32], index: 17, kind: input, shape index: {}]   ;;  %s6755_s18 = inlined_call_operand.vmem [shape: f32[2,1,32], index: 18, kind: output, shape index: {}]  }
   0x1   :  { %6762 = sst [smem:[#allocation7_spill]] %s6737_s0  ;;  %s5116_s29 = smov 0  }
   0x2   :  { %6763 = sst [smem:[#allocation8_spill]] %s6738_s1 }
   0x3   :  { %6764 = sst [smem:[#allocation9_spill]] %s6739_s2 }
   0x4   :  { %6765 = sst [smem:[#allocation10_spill]] %s6743_s6 }
   0x5   :  { %6766 = sst [smem:[#allocation11_spill]] %s6745_s8 }
   0x6   :  { %6767 = sst [smem:[#allocation12_spill]] %s6753_s16 }
   0x7   :  { %6768 = sst [smem:[#allocation13_spill]] %s6754_s17 }
   0x8   :  { %6769 = sst [smem:[#allocation14_spill]] %s6755_s18 }
   0x9 LB: > { %6770 = sst [smem:[#allocation3_spill]] %s5005_s28  ;;  %s37_s30 = sadd.s32 1, %s5005_s28  ;;  %s5009_s29 = sphi %s5116_s29, %s28_s29   ;;  %s5005_s28 = sphi %s5114_s28, %s6791_s28   ;;  %s5001_s27 = sphi %s5112_s27, %s6790_s27  }
   0xa   : > { %6771 = sst [smem:[#allocation4_spill]] %s5009_s29  ;;  %p4144_p0 = scmp.ge.s32.totalorder %s5009_s29, 1 }
   0xb   : > { %p38_p1 = scmp.ge.s32.totalorder %s37_s30, 2  ;;  %p630_p2 = scmp.lt.s32.totalorder %s5009_s29, 3 }
   0xd   : > { %s6793_s30 = smov (%p38_p1, %s37_s30), 0  ;;  %p631_p3 = pnand %p4144_p0, %p630_p2 }
   0xe   : > { %6772 = sst [smem:[#allocation5_spill]] %s6793_s30 }
   0xf   : > { %634 = sbr.rel (%p631_p3) target bundleno = 4332 (0x10ec), region = 92 }
  0x14   : > { %p735_p4 = scmp.lt.s32.totalorder %s5001_s27, 1  ;;  %s6773_s6 = sld [smem:[#allocation10_spill]] }
  0x15   : > { %s6774_s8 = sld [smem:[#allocation11_spill]]  ;;  %p4153_p5 = scmp.ne.s32.totalorder %s5001_s27, 0 }
  0x16   : > { %s5134_s0 = scalar_select %p735_p4, %s5001_s27, 1 }
  0x17   : > { %s6776_s19 = sld [smem:[#allocation8_spill]] (!%p4153_p5) }
  0x18   : > { %s4255_s23 = sshll.u32 %s5134_s0, 4  ;;  %s759_s16 = scalar_lea.vmem %s6747_s10, %s5134_s0 }
  0x19   : > { %s762_s26 = scalar_lea.vmem %s6748_s11, %s5134_s0  ;;  %788 = sbr.rel (%p4153_p5) target bundleno = 257 (0x101), region = 96 }
  0x1a   : > { %s5152_s30 = scalar_lea.vmem %s6773_s6, %s4255_s23  ;;  %s5174_s6 = scalar_lea.vmem %s6749_s12, %s4255_s23 }
  0x1b   : > { %s5157_s18 = scalar_lea.vmem %s6774_s8, %s4255_s23  ;;  %s770_s8 = scalar_lea.vmem %s6750_s13, %s5134_s0 }
  0x1c   : > { %6775 = sst [smem:[#allocation6_spill]] %s5157_s18  ;;  %s4258_s18 = sshll.u32 %s5134_s0, 5 }
  0x1d   : > { %s5184_s21 = scalar_lea.vmem %s6751_s14, %s4258_s18  ;;  %s6777_s17 = sld [smem:[#allocation7_spill]] (!%p4153_p5) }
  0x1e   : > { %v4662_v0 = vld [vmem:[%s6776_s19 + $0x10] sm:$0xff]   ;;  %v4663_v1 = vld [vmem:[%s6776_s19 + $0x8] sm:$0xff]   ;;  %vm844_vm0 = vcmask 392192   ;;  %v4664_v5 = vld [vmem:[%s6776_s19] sm:$0xff]   ;;  %s6778_s23 = sld [smem:[#allocation9_spill]]  ;;  %vm1006_vm1 = vcmask 261120  }
  0x1f   : > { %4376 = vmatprep.subr.bf16.mxu0 %v4662_v0  ;;  %4610 = vmatprep.subr.bf16.mxu1 %v4662_v0  ;;  %v984_v32 = vld [vmem:[%s6740_s3 + $0x10] sm:$0xff]  ;;  %v982_v39 = vld [vmem:[%s6740_s3] sm:$0xff]  ;;  %v985_v52 = vld [vmem:[%s6740_s3 + $0x18] sm:$0xff] }
  0x20   : > { %4377 = vmatpush3.bf16.msra.mxu0 %v4662_v0  ;;  %4613 = vmatpush3.bf16.msra.mxu1 %v4662_v0  ;;  %v983_v57 = vld [vmem:[%s6740_s3 + $0x8] sm:$0xff] }
  0x21   : > { %4378 = vmatprep.subr.bf16.mxu0 %v4663_v1  ;;  %4611 = vmatprep.subr.bf16.mxu1 %v4663_v1 }
  0x23   : > { %v789_v2 = vld [vmem:[%s6777_s17] sm:$0xff]  ;;  %v790_v3 = vld [vmem:[%s6777_s17 + $0x8] sm:$0xff]  ;;  %v791_v9 = vld [vmem:[%s6777_s17 + $0x10] sm:$0xff] }
  0x24   : > { %v797_v4 = vld [vmem:[%s6777_s17 + $0x40] sm:$0xff]  ;;  %v811_v6 = vpack.c.bf16 %v790_v3, %v789_v2  ;;  %v798_v7 = vld [vmem:[%s6777_s17 + $0x48] sm:$0xff]  ;;  %v792_v10 = vld [vmem:[%s6777_s17 + $0x18] sm:$0xff]  ;;  %4379 = vmatpush3.bf16.msra.mxu0 %v4663_v1  ;;  %4614 = vmatpush3.bf16.msra.mxu1 %v4663_v1 }
  0x25   : > { %v815_v8 = vpack.c.bf16 %v798_v7, %v797_v4  ;;  %v799_v11 = vld [vmem:[%s6777_s17 + $0x50] sm:$0xff]  ;;  %v800_v12 = vld [vmem:[%s6777_s17 + $0x58] sm:$0xff]  ;;  %v793_v13 = vld [vmem:[%s6777_s17 + $0x20] sm:$0xff]  ;;  %4380 = vmatprep.subr.bf16.mxu0 %v4664_v5  ;;  %4612 = vmatprep.subr.bf16.mxu1 %v4664_v5  ;;  %v812_v17 = vpack.c.bf16 %v792_v10, %v791_v9 }
  0x26   : > { %4382 = vmatprep.mubr.msk.bf16.mxu0 %vm844_vm0, %v811_v6  ;;  %v794_v14 = vld [vmem:[%s6777_s17 + $0x28] sm:$0xff]  ;;  %v801_v15 = vld [vmem:[%s6777_s17 + $0x60] sm:$0xff]  ;;  %v816_v18 = vpack.c.bf16 %v800_v12, %v799_v11  ;;  %v795_v21 = vld [vmem:[%s6777_s17 + $0x30] sm:$0xff] }
  0x27   : > { %v802_v16 = vld [vmem:[%s6777_s17 + $0x68] sm:$0xff]  ;;  %4390 = vmatprep.mubr.msk.bf16.mxu1 %vm844_vm0, %v815_v8  ;;  %v813_v19 = vpack.c.bf16 %v794_v14, %v793_v13  ;;  %v796_v22 = vld [vmem:[%s6777_s17 + $0x38] sm:$0xff]  ;;  %v803_v23 = vld [vmem:[%s6777_s17 + $0x70] sm:$0xff] }
  0x28   : > { %4381 = vmatpush3.bf16.msra.mxu0 %v4664_v5  ;;  %4615 = vmatpush3.bf16.msra.mxu1 %v4664_v5  ;;  %v817_v20 = vpack.c.bf16 %v802_v16, %v801_v15  ;;  %v804_v24 = vld [vmem:[%s6777_s17 + $0x78] sm:$0xff]  ;;  %v814_v25 = vpack.c.bf16 %v796_v22, %v795_v21  ;;  %v5259_v27 = vld [vmem:[%s6778_s23] ss:$0 sm:$0xff]  ;;  %v988_v2 = vld [vmem:[%s6740_s3 + $0x30] sm:$0xff] }
  0x29   : > { %v818_v26 = vpack.c.bf16 %v804_v24, %v803_v23  ;;  %v986_v15 = vld [vmem:[%s6740_s3 + $0x20] sm:$0xff] }
  0x2b   : > { %4383 = vmatmul.mubr.msk.bf16.vlgmr.msra.gmra.mxu0 %vm844_vm0, %v812_v17  ;;  %4391 = vmatmul.mubr.msk.bf16.vlgmr.msra.gmra.mxu1 %vm844_vm0, %v816_v18 }
  0x2c   : > { %4386 = vmatprep.mubr.msk.bf16.mxu0 %vm844_vm0, %v813_v19  ;;  %4394 = vmatprep.mubr.msk.bf16.mxu1 %vm844_vm0, %v817_v20  ;;  %v989_v20 = vld [vmem:[%s6740_s3 + $0x38] sm:$0xff] }
  0x33   : > { %4387 = vmatmul.mubr.msk.bf16.gmra.mxu0 %vm844_vm0, %v814_v25  ;;  %4395 = vmatmul.mubr.msk.bf16.gmra.mxu1 %vm844_vm0, %v818_v26 }
  0xeb   : > { %v4384_v28 = vpop.f32.mrf.mxu0  ;;  %v4392_v29 = vpop.f32.mrf.mxu1 }
  0xec   : > { %v912_v30 = vadd.f32 %v4384_v28, %v5259_v27  ;;  %v944_v31 = vadd.f32 %v4392_v29, %v5259_v27 }
  0xed   : > { %v903_v33 = vpop.f32.mrf.mxu0  ;;  %v935_v34 = vpop.f32.mrf.mxu1 }
  0xee   : > { %v968_v35 = vmax.f32 %v912_v30, 0.0  ;;  %v976_v36 = vmax.f32 %v944_v31, 0.0  ;;  %v904_v37 = vadd.f32 %v5259_v27, %v903_v33  ;;  %v936_v38 = vadd.f32 %v5259_v27, %v935_v34  ;;  %v987_v30 = vld [vmem:[%s6740_s3 + $0x28] sm:$0xff] }
  0xef   : > { %v4385_v40 = vpop.f32.mrf.mxu0  ;;  %v4393_v41 = vpop.f32.mrf.mxu1 }
  0xf0   : > { %v992_v42 = vadd.f32 %v984_v32, %v968_v35  ;;  %v1000_v43 = vadd.f32 %v984_v32, %v976_v36  ;;  %v966_v44 = vmax.f32 %v904_v37, 0.0  ;;  %v974_v45 = vmax.f32 %v936_v38, 0.0 }
  0xf1   : > { %v915_v46 = vadd.f32 %v4385_v40, %v5259_v27  ;;  %v947_v47 = vadd.f32 %v4393_v41, %v5259_v27  ;;  %v906_v48 = vpop.f32.mrf.mxu0  ;;  %v938_v49 = vpop.f32.mrf.mxu1 }
  0xf2   : > { %1009 = vst.msk [vmem:[#allocation2 + $0x10] sm:$0xff] %vm1006_vm1, %v992_v42  ;;  %1017 = vst.msk [vmem:[#allocation2 + $0x50] sm:$0xff] %vm1006_vm1, %v1000_v43  ;;  %v990_v50 = vadd.f32 %v982_v39, %v966_v44  ;;  %v998_v51 = vadd.f32 %v982_v39, %v974_v45  ;;  %v907_v53 = vadd.f32 %v5259_v27, %v906_v48 }
  0xf3   : > { %v939_v54 = vadd.f32 %v5259_v27, %v938_v49  ;;  %v969_v55 = vmax.f32 %v915_v46, 0.0  ;;  %v977_v56 = vmax.f32 %v947_v47, 0.0  ;;  %v4388_v58 = vpop.f32.mrf.mxu0  ;;  %v4396_v59 = vpop.f32.mrf.mxu1 }
  0xf4   : > { %1007 = vst.msk [vmem:[#allocation2] sm:$0xff] %vm1006_vm1, %v990_v50  ;;  %1015 = vst.msk [vmem:[#allocation2 + $0x40] sm:$0xff] %vm1006_vm1, %v998_v51  ;;  %v967_v60 = vmax.f32 %v907_v53, 0.0  ;;  %v928_v62 = vadd.f32 %v4388_v58, %v5259_v27  ;;  %v960_v63 = vadd.f32 %v4396_v59, %v5259_v27 }
  0xf5   : > { %v975_v61 = vmax.f32 %v939_v54, 0.0  ;;  %v993_v0 = vadd.f32 %v985_v52, %v969_v55  ;;  %v1001_v1 = vadd.f32 %v985_v52, %v977_v56  ;;  %v919_v3 = vpop.f32.mrf.mxu0  ;;  %v951_v4 = vpop.f32.mrf.mxu1 }
  0xf6   : > { %v991_v5 = vadd.f32 %v983_v57, %v967_v60  ;;  %v972_v7 = vmax.f32 %v928_v62, 0.0  ;;  %v980_v8 = vmax.f32 %v960_v63, 0.0  ;;  %v920_v9 = vadd.f32 %v5259_v27, %v919_v3 }
  0xf7   : > { %v999_v6 = vadd.f32 %v983_v57, %v975_v61  ;;  %1010 = vst.msk [vmem:[#allocation2 + $0x18] sm:$0xff] %vm1006_vm1, %v993_v0  ;;  %1018 = vst.msk [vmem:[#allocation2 + $0x58] sm:$0xff] %vm1006_vm1, %v1001_v1  ;;  %v952_v10 = vadd.f32 %v5259_v27, %v951_v4  ;;  %v4389_v11 = vpop.f32.mrf.mxu0  ;;  %v4397_v12 = vpop.f32.mrf.mxu1 }
  0xf8   : > { %1008 = vst.msk [vmem:[#allocation2 + $0x8] sm:$0xff] %vm1006_vm1, %v991_v5  ;;  %v996_v13 = vadd.f32 %v988_v2, %v972_v7  ;;  %v1004_v14 = vadd.f32 %v988_v2, %v980_v8  ;;  %v931_v16 = vadd.f32 %v4389_v11, %v5259_v27  ;;  %v963_v17 = vadd.f32 %v4397_v12, %v5259_v27 }
  0xf9   : > { %1016 = vst.msk [vmem:[#allocation2 + $0x48] sm:$0xff] %vm1006_vm1, %v999_v6  ;;  %v970_v18 = vmax.f32 %v920_v9, 0.0  ;;  %v978_v19 = vmax.f32 %v952_v10, 0.0  ;;  %v922_v21 = vpop.f32.mrf.mxu0  ;;  %v954_v22 = vpop.f32.mrf.mxu1 }
  0xfa   : > { %1013 = vst.msk [vmem:[#allocation2 + $0x30] sm:$0xff] %vm1006_vm1, %v996_v13  ;;  %1021 = vst.msk [vmem:[#allocation2 + $0x70] sm:$0xff] %vm1006_vm1, %v1004_v14  ;;  %v973_v23 = vmax.f32 %v931_v16, 0.0  ;;  %v981_v24 = vmax.f32 %v963_v17, 0.0  ;;  %v923_v25 = vadd.f32 %v5259_v27, %v922_v21  ;;  %v955_v26 = vadd.f32 %v5259_v27, %v954_v22 }
  0xfb   : > { %v994_v28 = vadd.f32 %v986_v15, %v970_v18  ;;  %v1002_v29 = vadd.f32 %v986_v15, %v978_v19 }
  0xfc   : > { %v997_v31 = vadd.f32 %v989_v20, %v973_v23  ;;  %v1005_v32 = vadd.f32 %v989_v20, %v981_v24  ;;  %v971_v33 = vmax.f32 %v923_v25, 0.0  ;;  %v979_v34 = vmax.f32 %v955_v26, 0.0 }
  0xfd   : > { %1011 = vst.msk [vmem:[#allocation2 + $0x20] sm:$0xff] %vm1006_vm1, %v994_v28  ;;  %1019 = vst.msk [vmem:[#allocation2 + $0x60] sm:$0xff] %vm1006_vm1, %v1002_v29 }
  0xfe   : > { %1014 = vst.msk [vmem:[#allocation2 + $0x38] sm:$0xff] %vm1006_vm1, %v997_v31  ;;  %1022 = vst.msk [vmem:[#allocation2 + $0x78] sm:$0xff] %vm1006_vm1, %v1005_v32  ;;  %v995_v35 = vadd.f32 %v987_v30, %v971_v33  ;;  %v1003_v27 = vadd.f32 %v987_v30, %v979_v34 }
 0x100   : > { %1012 = vst.msk [vmem:[#allocation2 + $0x28] sm:$0xff] %vm1006_vm1, %v995_v35  ;;  %1020 = vst.msk [vmem:[#allocation2 + $0x68] sm:$0xff] %vm1006_vm1, %v1003_v27 }
 0x101 PF: > { %v1023_v36 = vld [vmem:[#allocation2] sm:$0xff]  ;;  %vm1041_vm2 = vcmask 261120   ;;  %v1025_v37 = vld [vmem:[#allocation2 + $0x10] sm:$0xff]  ;;  %v1024_v38 = vld [vmem:[#allocation2 + $0x8] sm:$0xff]  ;;  %s6779_s22 = scalar_lea.vmem %s6741_s4, %s5134_s0  ;;  %s6780_s24 = scalar_lea.vmem %s6742_s5, %s5134_s0  ;;  %vm1463_vm3 = vcmask 130048   ;;  %vm1561_vm4 = vcmask 523264  }
 0x102   : > { %v1042_v39 = vsel %vm1041_vm2, %v1023_v36, 0.0  ;;  %v1048_v40 = vsel %vm1041_vm2, %v1025_v37, 0.0  ;;  %v1026_v41 = vld [vmem:[#allocation2 + $0x18] sm:$0xff]  ;;  %v1045_v44 = vsel %vm1041_vm2, %v1024_v38, 0.0  ;;  %v1029_v48 = vld [vmem:[#allocation2 + $0x30] sm:$0xff]  ;;  %v5363_v26 = vld [vmem:[#allocation2 + $0x40] sm:$0xff]  ;;  %s6781_s18 = scalar_lea.vmem %s6744_s7, %s5134_s0  ;;  %s6783_s28 = scalar_lea.vmem %s6746_s9, %s5134_s0 }
 0x103   : > { %1043 = vadd.xlane.f32.xlu0 %v1042_v39  ;;  %1049 = vadd.xlane.f32.xlu1 %v1048_v40  ;;  %v1051_v45 = vsel %vm1041_vm2, %v1026_v41, 0.0  ;;  %v1060_v50 = vsel %vm1041_vm2, %v1029_v48, 0.0  ;;  %v1066_v30 = vsel %vm1041_vm2, %v5363_v26, 0.0  ;;  %v5369_v31 = vld [vmem:[#allocation2 + $0x48] sm:$0xff]  ;;  %v5371_v32 = vld [vmem:[#allocation2 + $0x50] sm:$0xff]  ;;  %v5377_v35 = vld [vmem:[#allocation2 + $0x58] sm:$0xff] }
 0x104   : > { %v1027_v42 = vld [vmem:[#allocation2 + $0x20] sm:$0xff]  ;;  %v1069_v33 = vsel %vm1041_vm2, %v5369_v31, 0.0  ;;  %v1072_v34 = vsel %vm1041_vm2, %v5371_v32, 0.0  ;;  %v5387_v39 = vld [vmem:[#allocation2 + $0x70] sm:$0xff]  ;;  %s5011_s29 = smov 96   ;;  %s5012_s20 = smov 80  }
 0x105   : > { %v1054_v46 = vsel %vm1041_vm2, %v1027_v42, 0.0  ;;  %v1030_v49 = vld [vmem:[#allocation2 + $0x38] sm:$0xff]  ;;  %v5379_v27 = vld [vmem:[#allocation2 + $0x60] sm:$0xff]  ;;  %s5014_s2 = smov 64   ;;  %s5016_s25 = smov 16  }
 0x106   : > { %v1063_v51 = vsel %vm1041_vm2, %v1030_v49, 0.0  ;;  %s6782_s23 = sld [smem:[#allocation6_spill]]  ;;  %p4248_p6 = scmp.ne.s32.totalorder %s5001_s27, 1 }
 0x107   : > { %v1028_v43 = vld [vmem:[#allocation2 + $0x28] sm:$0xff]  ;;  %1046 = vadd.xlane.f32.xlu0 %v1045_v44  ;;  %1052 = vadd.xlane.f32.xlu1 %v1051_v45  ;;  %v4706_v45 = vld [vmem:[%s5152_s30] sm:$0xff]  }
 0x108   : > { %v1057_v47 = vsel %vm1041_vm2, %v1028_v43, 0.0  ;;  %v4705_v44 = vld [vmem:[%s5152_s30 + $0x8] sm:$0xff]   ;;  %s5013_s30 = smov 112  }
 0x109   : > { %4398 = vmatprep.subr.bf16.mxu1 %v4705_v44 }
 0x10a   : > { %4399 = vmatpush3.bf16.msra.mxu1 %v4705_v44 }
 0x10b   : > { %1055 = vadd.xlane.f32.xlu0 %v1054_v46  ;;  %1058 = vadd.xlane.f32.xlu1 %v1057_v47 }
 0x10c   : > { %4400 = vmatprep.subr.bf16.mxu1 %v4706_v45 }
 0x10e   : > { %4401 = vmatpush3.bf16.msra.mxu1 %v4706_v45 }
 0x10f   : > { %1061 = vadd.xlane.f32.xlu0 %v1060_v50  ;;  %1064 = vadd.xlane.f32.xlu1 %v1063_v51 }
 0x18c   : > { %v1044_v52 = vpop.xlane.xlu0 %1043  ;;  %v1050_v53 = vpop.xlane.xlu1 %1049 }
 0x18d   : > { %v1091_v54 = vmul.f32 0.03125, %v1044_v52  ;;  %v1093_v55 = vmul.f32 0.03125, %v1050_v53 }
 0x18f   : > { %v5325_v56 = vsub.f32 %v1023_v36, %v1091_v54  ;;  %v5327_v57 = vsub.f32 %v1025_v37, %v1093_v55  ;;  %v1075_v36 = vsel %vm1041_vm2, %v5377_v35, 0.0  ;;  %v1078_v37 = vsel %vm1041_vm2, %v5379_v27, 0.0 }
 0x190   : > { %v1047_v58 = vpop.xlane.xlu0 %1046  ;;  %v1053_v59 = vpop.xlane.xlu1 %1052 }
 0x191   : > { %v1092_v60 = vmul.f32 0.03125, %v1047_v58  ;;  %v1094_v61 = vmul.f32 0.03125, %v1053_v59  ;;  %v1123_v62 = vmul.f32 %v5325_v56, %v5325_v56  ;;  %v1125_v63 = vmul.f32 %v5327_v57, %v5327_v57 }
 0x193   : > { %v5333_v0 = vsub.f32 %v1024_v38, %v1092_v60  ;;  %v5335_v1 = vsub.f32 %v1026_v41, %v1094_v61  ;;  %v1139_v2 = vsel %vm1041_vm2, %v1123_v62, 0.0  ;;  %v1145_v5 = vsel %vm1041_vm2, %v1125_v63, 0.0  ;;  %v5385_v38 = vld [vmem:[#allocation2 + $0x68] sm:$0xff] }
 0x194   : > { %1140 = vadd.xlane.f32.xlu0 %v1139_v2  ;;  %v1056_v3 = vpop.xlane.xlu0 %1055  ;;  %v1059_v4 = vpop.xlane.xlu1 %1058  ;;  %v1081_v40 = vsel %vm1041_vm2, %v5385_v38, 0.0  ;;  %v1084_v41 = vsel %vm1041_vm2, %v5387_v39, 0.0 }
 0x195   : > { %v1095_v6 = vmul.f32 0.03125, %v1056_v3  ;;  %v1096_v7 = vmul.f32 0.03125, %v1059_v4  ;;  %v1124_v8 = vmul.f32 %v5333_v0, %v5333_v0  ;;  %v1126_v9 = vmul.f32 %v5335_v1, %v5335_v1 }
 0x197   : > { %v5343_v10 = vsub.f32 %v1027_v42, %v1095_v6  ;;  %v5345_v11 = vsub.f32 %v1028_v43, %v1096_v7  ;;  %v1142_v12 = vsel %vm1041_vm2, %v1124_v8, 0.0  ;;  %v1148_v15 = vsel %vm1041_vm2, %v1126_v9, 0.0  ;;  %v5393_v42 = vld [vmem:[#allocation2 + $0x78] sm:$0xff] }
 0x198   : > { %1146 = vadd.xlane.f32.xlu0 %v1145_v5  ;;  %1143 = vadd.xlane.f32.xlu1 %v1142_v12  ;;  %v1062_v13 = vpop.xlane.xlu0 %1061  ;;  %v1065_v14 = vpop.xlane.xlu1 %1064  ;;  %v1087_v43 = vsel %vm1041_vm2, %v5393_v42, 0.0 }
 0x199   : > { %v1097_v16 = vmul.f32 0.03125, %v1062_v13  ;;  %v1098_v17 = vmul.f32 0.03125, %v1065_v14  ;;  %v1127_v18 = vmul.f32 %v5343_v10, %v5343_v10  ;;  %v1128_v19 = vmul.f32 %v5345_v11, %v5345_v11 }
 0x19b   : > { %v5353_v20 = vsub.f32 %v1029_v48, %v1097_v16  ;;  %v5355_v21 = vsub.f32 %v1030_v49, %v1098_v17  ;;  %v1151_v22 = vsel %vm1041_vm2, %v1127_v18, 0.0  ;;  %v1154_v23 = vsel %vm1041_vm2, %v1128_v19, 0.0 }
 0x19c   : > { %1149 = vadd.xlane.f32.xlu1 %v1148_v15  ;;  %1152 = vadd.xlane.f32.xlu0 %v1151_v22  ;;  %v5404_v15 = vld [vmem:[%s6779_s22] ss:$0 sm:$0xff]  ;;  %s5015_s22 = smov 48  }
 0x19d   : > { %v1129_v24 = vmul.f32 %v5353_v20, %v5353_v20  ;;  %v1130_v25 = vmul.f32 %v5355_v21, %v5355_v21 }
 0x19f   : > { %v1157_v28 = vsel %vm1041_vm2, %v1129_v24, 0.0  ;;  %v1160_v29 = vsel %vm1041_vm2, %v1130_v25, 0.0 }
 0x1a0   : > { %1155 = vadd.xlane.f32.xlu1 %v1154_v23  ;;  %1158 = vadd.xlane.f32.xlu0 %v1157_v28 }
 0x1a4   : > { %1161 = vadd.xlane.f32.xlu1 %v1160_v29  ;;  %1067 = vadd.xlane.f32.xlu0 %v1066_v30 }
 0x1a8   : > { %1070 = vadd.xlane.f32.xlu1 %v1069_v33  ;;  %1073 = vadd.xlane.f32.xlu0 %v1072_v34 }
 0x1ac   : > { %1076 = vadd.xlane.f32.xlu1 %v1075_v36  ;;  %1079 = vadd.xlane.f32.xlu0 %v1078_v37 }
 0x1b0   : > { %1082 = vadd.xlane.f32.xlu1 %v1081_v40  ;;  %1085 = vadd.xlane.f32.xlu0 %v1084_v41 }
 0x1b4   : > { %1088 = vadd.xlane.f32.xlu1 %v1087_v43 }
 0x21d   : > { %v1141_v46 = vpop.xlane.xlu0 %1140 }
 0x21e   : > { %v1187_v47 = vmul.f32 0.03125, %v1141_v46 }
 0x220   : > { %v1203_v48 = vadd.f32 1e-05, %v1187_v47 }
 0x221   : > { %v1144_v49 = vpop.xlane.xlu1 %1143  ;;  %v1147_v50 = vpop.xlane.xlu0 %1146 }
 0x222   : > { %4715 = vrsqrt.f32 %v1203_v48  ;;  %v1188_v51 = vmul.f32 0.03125, %v1144_v49  ;;  %v1189_v52 = vmul.f32 0.03125, %v1147_v50 }
 0x224   : > { %v1204_v53 = vadd.f32 1e-05, %v1188_v51  ;;  %v1205_v54 = vadd.f32 1e-05, %v1189_v52 }
 0x225   : > { %v1150_v55 = vpop.xlane.xlu1 %1149  ;;  %v1153_v58 = vpop.xlane.xlu0 %1152 }
 0x226   : > { %4717 = vrsqrt.f32 %v1204_v53  ;;  %v1190_v59 = vmul.f32 0.03125, %v1150_v55  ;;  %v1191_v60 = vmul.f32 0.03125, %v1153_v58 }
 0x227   : > { %4719 = vrsqrt.f32 %v1205_v54 }
 0x228   : > { %v1206_v61 = vadd.f32 1e-05, %v1190_v59  ;;  %v1207_v62 = vadd.f32 1e-05, %v1191_v60 }
 0x229   : > { %v1156_v63 = vpop.xlane.xlu1 %1155  ;;  %v1159_v2 = vpop.xlane.xlu0 %1158 }
 0x22a   : > { %4721 = vrsqrt.f32 %v1206_v61  ;;  %v1192_v3 = vmul.f32 0.03125, %v1156_v63  ;;  %v1193_v4 = vmul.f32 0.03125, %v1159_v2 }
 0x22b   : > { %4723 = vrsqrt.f32 %v1207_v62 }
 0x22c   : > { %v1208_v5 = vadd.f32 1e-05, %v1192_v3  ;;  %v1209_v6 = vadd.f32 1e-05, %v1193_v4 }
 0x22d   : > { %v1162_v7 = vpop.xlane.xlu1 %1161  ;;  %v1068_v8 = vpop.xlane.xlu0 %1067 }
 0x22e   : > { %4725 = vrsqrt.f32 %v1208_v5  ;;  %v1194_v9 = vmul.f32 0.03125, %v1162_v7  ;;  %v1099_v12 = vmul.f32 0.03125, %v1068_v8 }
 0x22f   : > { %v4716_v13 = vpop.eup %4715  ;;  %4727 = vrsqrt.f32 %v1209_v6 }
 0x230   : > { %v1210_v14 = vadd.f32 1e-05, %v1194_v9  ;;  %v1235_v16 = vmul.f32 %v4716_v13, %v5325_v56  ;;  %v5408_v17 = vsub.f32 %v5363_v26, %v1099_v12  ;;  %v5418_v56 = vld [vmem:[%s6780_s24] ss:$0 sm:$0xff] }
 0x231   : > { %v1071_v18 = vpop.xlane.xlu1 %1070  ;;  %v1074_v19 = vpop.xlane.xlu0 %1073 }
 0x232   : > { %4729 = vrsqrt.f32 %v1210_v14  ;;  %v1100_v22 = vmul.f32 0.03125, %v1071_v18  ;;  %v1101_v23 = vmul.f32 0.03125, %v1074_v19  ;;  %v1257_v25 = vmul.f32 %v5404_v15, %v1235_v16 }
 0x233   : > { %v4718_v24 = vpop.eup %4717  ;;  %v1131_v28 = vmul.f32 %v5408_v17, %v5408_v17 }
 0x234   : > { %v4720_v29 = vpop.eup %4719  ;;  %v1236_v26 = vmul.f32 %v4718_v24, %v5333_v0  ;;  %v5422_v30 = vsub.f32 %v5369_v31, %v1100_v22  ;;  %v5425_v33 = vsub.f32 %v5371_v32, %v1101_v23  ;;  %v1279_v31 = vadd.f32 %v5418_v56, %v1257_v25 }
 0x235   : > { %v1237_v34 = vmul.f32 %v4720_v29, %v5327_v57  ;;  %v1077_v36 = vpop.xlane.xlu1 %1076  ;;  %v1163_v37 = vsel %vm1041_vm2, %v1131_v28, 0.0  ;;  %v1080_v40 = vpop.xlane.xlu0 %1079 }
 0x236   : > { %v1258_v41 = vmul.f32 %v5404_v15, %v1236_v26  ;;  %v1102_v43 = vmul.f32 0.03125, %v1077_v36  ;;  %v1132_v44 = vmul.f32 %v5422_v30, %v5422_v30  ;;  %1164 = vadd.xlane.f32.xlu0 %v1163_v37  ;;  %v1103_v0 = vmul.f32 0.03125, %v1080_v40 }
 0x237   : > { %v4722_v45 = vpop.eup %4721  ;;  %v1259_v32 = vmul.f32 %v5404_v15, %v1237_v34  ;;  %v1133_v57 = vmul.f32 %v5425_v33, %v5425_v33 }
 0x238   : > { %v4724_v46 = vpop.eup %4723  ;;  %v1280_v47 = vadd.f32 %v5418_v56, %v1258_v41  ;;  %v1238_v48 = vmul.f32 %v4722_v45, %v5335_v1  ;;  %v5439_v49 = vsub.f32 %v5377_v35, %v1102_v43  ;;  %v1166_v50 = vsel %vm1041_vm2, %v1132_v44, 0.0 }
 0x239   : > { %v1239_v51 = vmul.f32 %v4724_v46, %v5343_v10  ;;  %1167 = vadd.xlane.f32.xlu1 %v1166_v50  ;;  %v1083_v52 = vpop.xlane.xlu1 %1082  ;;  %v5444_v53 = vsub.f32 %v5379_v27, %v1103_v0  ;;  %v1169_v54 = vsel %vm1041_vm2, %v1133_v57, 0.0  ;;  %v1086_v55 = vpop.xlane.xlu0 %1085  ;;  %v1281_v61 = vadd.f32 %v5418_v56, %v1259_v32 }
 0x23a   : > { %v1299_v58 = vpack.c.bf16 %v1280_v47, %v1279_v31  ;;  %v1260_v59 = vmul.f32 %v5404_v15, %v1238_v48  ;;  %v1104_v60 = vmul.f32 0.03125, %v1083_v52  ;;  %v1134_v1 = vmul.f32 %v5439_v49, %v5439_v49  ;;  %1170 = vadd.xlane.f32.xlu0 %v1169_v54 }
 0x23b   : > { %v4726_v35 = vpop.eup %4725  ;;  %v1261_v10 = vmul.f32 %v5404_v15, %v1239_v51  ;;  %v1105_v62 = vmul.f32 0.03125, %v1086_v55  ;;  %v1135_v27 = vmul.f32 %v5444_v53, %v5444_v53 }
 0x23c   : > { %v4728_v63 = vpop.eup %4727  ;;  %4402 = vmatprep.mubr.msk.bf16.mxu1 %vm1041_vm2, %v1299_v58  ;;  %v1282_v2 = vadd.f32 %v5418_v56, %v1260_v59  ;;  %v1240_v3 = vmul.f32 %v4726_v35, %v5345_v11  ;;  %v5458_v4 = vsub.f32 %v5385_v38, %v1104_v60  ;;  %v1172_v5 = vsel %vm1041_vm2, %v1134_v1, 0.0 }
 0x23d   : > { %v1241_v6 = vmul.f32 %v4728_v63, %v5353_v20  ;;  %1173 = vadd.xlane.f32.xlu1 %v1172_v5  ;;  %v1089_v7 = vpop.xlane.xlu1 %1088  ;;  %v5463_v8 = vsub.f32 %v5387_v39, %v1105_v62  ;;  %v1175_v9 = vsel %vm1041_vm2, %v1135_v27, 0.0  ;;  %v1283_v16 = vadd.f32 %v5418_v56, %v1261_v10 }
 0x23e   : > { %v1300_v12 = vpack.c.bf16 %v1282_v2, %v1281_v61  ;;  %v1262_v13 = vmul.f32 %v5404_v15, %v1240_v3  ;;  %v1106_v14 = vmul.f32 0.03125, %v1089_v7  ;;  %v1136_v11 = vmul.f32 %v5458_v4, %v5458_v4  ;;  %1176 = vadd.xlane.f32.xlu0 %v1175_v9 }
 0x23f   : > { %v4730_v38 = vpop.eup %4729  ;;  %v1263_v20 = vmul.f32 %v5404_v15, %v1241_v6  ;;  %v1137_v18 = vmul.f32 %v5463_v8, %v5463_v8 }
 0x240   : > { %4403 = vmatmul.mubr.msk.bf16.vlgmr.msra.gmra.mxu1 %vm1041_vm2, %v1300_v12  ;;  %v1284_v39 = vadd.f32 %v5418_v56, %v1262_v13  ;;  %v1242_v19 = vmul.f32 %v4730_v38, %v5355_v21  ;;  %v5477_v22 = vsub.f32 %v5393_v42, %v1106_v14  ;;  %v1178_v23 = vsel %vm1041_vm2, %v1136_v11, 0.0 }
 0x241   : > { %1179 = vadd.xlane.f32.xlu1 %v1178_v23  ;;  %v1181_v24 = vsel %vm1041_vm2, %v1137_v18, 0.0  ;;  %v1285_v26 = vadd.f32 %v5418_v56, %v1263_v20 }
 0x242   : > { %v1301_v25 = vpack.c.bf16 %v1284_v39, %v1283_v16  ;;  %v1264_v28 = vmul.f32 %v5404_v15, %v1242_v19  ;;  %v1138_v29 = vmul.f32 %v5477_v22, %v5477_v22  ;;  %1182 = vadd.xlane.f32.xlu0 %v1181_v24 }
 0x244   : > { %4406 = vmatprep.mubr.msk.bf16.mxu1 %vm1041_vm2, %v1301_v25  ;;  %v1286_v21 = vadd.f32 %v5418_v56, %v1264_v28  ;;  %v1184_v42 = vsel %vm1041_vm2, %v1138_v29, 0.0 }
 0x245   : > { %1185 = vadd.xlane.f32.xlu1 %v1184_v42 }
 0x246   : > { %v1302_v34 = vpack.c.bf16 %v1286_v21, %v1285_v26 }
 0x248   : > { %4407 = vmatmul.mubr.msk.bf16.gmra.mxu1 %vm1041_vm2, %v1302_v34 }
 0x2bf   : > { %v1165_v36 = vpop.xlane.xlu0 %1164 }
 0x2c0   : > { %v1195_v37 = vmul.f32 0.03125, %v1165_v36 }
 0x2c2   : > { %v1168_v40 = vpop.xlane.xlu1 %1167  ;;  %v1211_v41 = vadd.f32 1e-05, %v1195_v37 }
 0x2c3   : > { %v1196_v43 = vmul.f32 0.03125, %v1168_v40  ;;  %v1171_v44 = vpop.xlane.xlu0 %1170 }
 0x2c4   : > { %4731 = vrsqrt.f32 %v1211_v41  ;;  %v1197_v0 = vmul.f32 0.03125, %v1171_v44 }
 0x2c5   : > { %v1212_v45 = vadd.f32 1e-05, %v1196_v43 }
 0x2c6   : > { %v1174_v31 = vpop.xlane.xlu1 %1173  ;;  %v1213_v32 = vadd.f32 1e-05, %v1197_v0 }
 0x2c7   : > { %4733 = vrsqrt.f32 %v1212_v45  ;;  %v1198_v57 = vmul.f32 0.03125, %v1174_v31  ;;  %v1177_v46 = vpop.xlane.xlu0 %1176 }
 0x2c8   : > { %4735 = vrsqrt.f32 %v1213_v32  ;;  %v1199_v47 = vmul.f32 0.03125, %v1177_v46 }
 0x2c9   : > { %v1214_v48 = vadd.f32 1e-05, %v1198_v57 }
 0x2ca   : > { %v1180_v50 = vpop.xlane.xlu1 %1179  ;;  %v1215_v51 = vadd.f32 1e-05, %v1199_v47 }
 0x2cb   : > { %4737 = vrsqrt.f32 %v1214_v48  ;;  %v1200_v52 = vmul.f32 0.03125, %v1180_v50  ;;  %v1183_v54 = vpop.xlane.xlu0 %1182 }
 0x2cc   : > { %4739 = vrsqrt.f32 %v1215_v51  ;;  %v1201_v55 = vmul.f32 0.03125, %v1183_v54 }
 0x2cd   : > { %v1216_v58 = vadd.f32 1e-05, %v1200_v52 }
 0x2ce   : > { %v1186_v59 = vpop.xlane.xlu1 %1185  ;;  %v1217_v60 = vadd.f32 1e-05, %v1201_v55 }
 0x2cf   : > { %4741 = vrsqrt.f32 %v1216_v58  ;;  %v1202_v1 = vmul.f32 0.03125, %v1186_v59 }
 0x2d0   : > { %4743 = vrsqrt.f32 %v1217_v60 }
 0x2d1   : > { %v4732_v35 = vpop.eup %4731  ;;  %v1218_v61 = vadd.f32 1e-05, %v1202_v1 }
 0x2d2   : > { %v1243_v10 = vmul.f32 %v4732_v35, %v5408_v17 }
 0x2d3   : > { %4745 = vrsqrt.f32 %v1218_v61 }
 0x2d4   : > { %v4734_v62 = vpop.eup %4733  ;;  %v1265_v27 = vmul.f32 %v5404_v15, %v1243_v10 }
 0x2d5   : > { %v4736_v63 = vpop.eup %4735  ;;  %v1244_v2 = vmul.f32 %v4734_v62, %v5422_v30 }
 0x2d6   : > { %v1245_v3 = vmul.f32 %v4736_v63, %v5425_v33  ;;  %v1287_v6 = vadd.f32 %v5418_v56, %v1265_v27 }
 0x2d7   : > { %v1266_v5 = vmul.f32 %v5404_v15, %v1244_v2 }
 0x2d8   : > { %v4738_v7 = vpop.eup %4737  ;;  %v1267_v9 = vmul.f32 %v5404_v15, %v1245_v3 }
 0x2d9   : > { %v4740_v12 = vpop.eup %4739  ;;  %v1288_v13 = vadd.f32 %v5418_v56, %v1266_v5  ;;  %v1246_v17 = vmul.f32 %v4738_v7, %v5439_v49 }
 0x2da   : > { %v1247_v14 = vmul.f32 %v4740_v12, %v5444_v53  ;;  %v1289_v30 = vadd.f32 %v5418_v56, %v1267_v9 }
 0x2db   : > { %v1303_v11 = vpack.c.bf16 %v1288_v13, %v1287_v6  ;;  %v1268_v38 = vmul.f32 %v5404_v15, %v1246_v17 }
 0x2dc   : > { %v4742_v33 = vpop.eup %4741  ;;  %v1269_v16 = vmul.f32 %v5404_v15, %v1247_v14 }
 0x2dd   : > { %v4744_v20 = vpop.eup %4743  ;;  %4410 = vmatprep.mubr.msk.bf16.mxu1 %vm1041_vm2, %v1303_v11  ;;  %v1290_v18 = vadd.f32 %v5418_v56, %v1268_v38  ;;  %v1248_v39 = vmul.f32 %v4742_v33, %v5458_v4 }
 0x2de   : > { %v1249_v19 = vmul.f32 %v4744_v20, %v5463_v8  ;;  %v1291_v23 = vadd.f32 %v5418_v56, %v1269_v16 }
 0x2df   : > { %v1304_v49 = vpack.c.bf16 %v1290_v18, %v1289_v30  ;;  %v1270_v53 = vmul.f32 %v5404_v15, %v1248_v39 }
 0x2e0   : > { %v4746_v24 = vpop.eup %4745  ;;  %v1271_v25 = vmul.f32 %v5404_v15, %v1249_v19 }
 0x2e1   : > { %4411 = vmatmul.mubr.msk.bf16.gmra.mxu1 %vm1041_vm2, %v1304_v49  ;;  %v1292_v28 = vadd.f32 %v5418_v56, %v1270_v53  ;;  %v1250_v29 = vmul.f32 %v4746_v24, %v5477_v22  ;;  %v5522_v22 = vld [vmem:[%s6781_s18] ss:$0 sm:$0xff] }
 0x2e2   : > { %v1293_v8 = vadd.f32 %v5418_v56, %v1271_v25 }
 0x2e3   : > { %v1305_v26 = vpack.c.bf16 %v1292_v28, %v1291_v23  ;;  %v1272_v4 = vmul.f32 %v5404_v15, %v1250_v29 }
 0x2e5   : > { %4414 = vmatprep.mubr.msk.bf16.mxu1 %vm1041_vm2, %v1305_v26  ;;  %v1294_v21 = vadd.f32 %v5418_v56, %v1272_v4 }
 0x2e7   : > { %v1306_v42 = vpack.c.bf16 %v1294_v21, %v1293_v8 }
 0x2e9   : > { %4415 = vmatmul.mubr.msk.bf16.gmra.mxu1 %vm1041_vm2, %v1306_v42 }
 0x300   : > { %v4404_v34 = vpop.f32.mrf.mxu1 }
 0x301   : > { %v1393_v51 = vadd.f32 %v4404_v34, %v5522_v22 }
 0x302   : > { %v1384_v36 = vpop.f32.mrf.mxu1 }
 0x303   : > { %v1385_v15 = vadd.f32 %v5522_v22, %v1384_v36 }
 0x304   : > { %v4405_v37 = vpop.f32.mrf.mxu1 }
 0x305   : > { %v1396_v48 = vadd.f32 %v4405_v37, %v5522_v22 }
 0x306   : > { %v1387_v40 = vpop.f32.mrf.mxu1 }
 0x307   : > { %v1388_v41 = vadd.f32 %v5522_v22, %v1387_v40  ;;  %v5544_v52 = vpack.c.bf16 %v1396_v48, %v1393_v51 }
 0x308   : > { %v4408_v43 = vpop.f32.mrf.mxu1 }
 0x309   : > { %v5526_v56 = vpack.c.bf16 %v1388_v41, %v1385_v15  ;;  %v1409_v45 = vadd.f32 %v4408_v43, %v5522_v22 }
 0x30a   : > { %v1400_v44 = vpop.f32.mrf.mxu1 }
 0x30b   : > { %4426 = vmatprep.mubr.msk.bf16.mxu1 %vm1463_vm3, %v5526_v56  ;;  %v1401_v57 = vadd.f32 %v5522_v22, %v1400_v44 }
 0x30c   : > { %v4409_v0 = vpop.f32.mrf.mxu1 }
 0x30d   : > { %v1412_v31 = vadd.f32 %v4409_v0, %v5522_v22 }
 0x30e   : > { %v1403_v32 = vpop.f32.mrf.mxu1 }
 0x30f   : > { %v5533_v46 = vpack.c.bf16 %v1412_v31, %v1409_v45  ;;  %v1404_v47 = vadd.f32 %v5522_v22, %v1403_v32 }
 0x311   : > { %v5537_v50 = vpack.c.bf16 %v1404_v47, %v1401_v57  ;;  %1461 = vrot.lane.b32.xlu0 %v5533_v46, %s5011_s29 }
 0x313   : > { %1459 = vrot.lane.b32.xlu1 %v5537_v50, %s5011_s29 }
 0x315   : > { %1757 = vrot.lane.b32.xlu0 %v5533_v46, %s5012_s20 }
 0x317   : > { %1457 = vrot.lane.b32.xlu1 %v5544_v52, %s5011_s29 }
 0x319   : > { %1753 = vrot.lane.b32.xlu0 %v5544_v52, %s5012_s20 }
 0x31b   : > { %1455 = vrot.lane.b32.xlu1 %v5526_v56, %s5011_s29 }
 0x31d   : > { %1743 = vrot.lane.b32.xlu0 %v5526_v56, %s5013_s30 }
 0x31f   : > { %1755 = vrot.lane.b32.xlu1 %v5537_v50, %s5012_s20 }
 0x321   : > { %1747 = vrot.lane.b32.xlu0 %v5537_v50, %s5013_s30 }
 0x323   : > { %1751 = vrot.lane.b32.xlu1 %v5526_v56, %s5012_s20 }
 0x325   : > { %1660 = vrot.lane.b32.xlu0 %v5533_v46, %s5014_s2 }
 0x327   : > { %1745 = vrot.lane.b32.xlu1 %v5544_v52, %s5013_s30 }
 0x329   : > { %1656 = vrot.lane.b32.xlu0 %v5544_v52, %s5014_s2 }
 0x32b   : > { %1749 = vrot.lane.b32.xlu1 %v5533_v46, %s5013_s30 }
 0x32d   : > { %1654 = vrot.lane.b32.xlu0 %v5526_v56, %s5014_s2 }
 0x32f   : > { %1658 = vrot.lane.b32.xlu1 %v5537_v50, %s5014_s2 }
 0x383   : > { %v1462_v54 = vpop.permute.xlu0 %1461 }
 0x384   : > { %4616 = vmatprep.subr.msk.bf16.mxu1 %vm1463_vm3, %v1462_v54  ;;  %v1486_v55 = vsel %vm1463_vm3, %v1462_v54, 0 }
 0x385   : > { %v1460_v58 = vpop.permute.xlu1 %1459  ;;  %4419 = vmatpush3.bf16.xpose.msra.mxu1 %v1486_v55 }
 0x386   : > { %4617 = vmatprep.subr.msk.bf16.mxu1 %vm1463_vm3, %v1460_v58  ;;  %v1483_v35 = vsel %vm1463_vm3, %v1460_v58, 0 }
 0x387   : > { %v1758_v59 = vpop.permute.xlu0 %1757 }
 0x388   : > { %v1781_v14 = vsel %vm1463_vm3, %v1758_v59, 0 }
 0x389   : > { %v1458_v60 = vpop.permute.xlu1 %1457 }
 0x38a   : > { %v1480_v63 = vsel %vm1463_vm3, %v1458_v60, 0 }
 0x38b   : > { %v1754_v1 = vpop.permute.xlu0 %1753 }
 0x38c   : > { %v1775_v26 = vsel %vm1463_vm3, %v1754_v1, 0 }
 0x38d   : > { %v1456_v61 = vpop.permute.xlu1 %1455  ;;  %4421 = vmatpush3.bf16.xpose.msra.mxu1 %v1483_v35 }
 0x38e   : > { %4618 = vmatprep.subr.msk.bf16.mxu1 %vm1463_vm3, %v1458_v60  ;;  %v1477_v6 = vsel %vm1463_vm3, %v1456_v61, 0 }
 0x38f   : > { %v1744_v10 = vpop.permute.xlu0 %1743 }
 0x391   : > { %v1756_v62 = vpop.permute.xlu1 %1755 }
 0x392   : > { %v1778_v23 = vsel %vm1463_vm3, %v1756_v62, 0 }
 0x393   : > { %v1748_v27 = vpop.permute.xlu0 %1747 }
 0x395   : > { %v1752_v2 = vpop.permute.xlu1 %1751  ;;  %4423 = vmatpush3.bf16.xpose.msra.mxu1 %v1480_v63 }
 0x396   : > { %4619 = vmatprep.subr.msk.bf16.mxu1 %vm1463_vm3, %v1456_v61  ;;  %v1772_v4 = vsel %vm1463_vm3, %v1752_v2, 0 }
 0x397   : > { %v1661_v3 = vpop.permute.xlu0 %1660 }
 0x398   : > { %4434 = vmatprep.subr.bf16.mxu0 %v1661_v3 }
 0x399   : > { %v1746_v5 = vpop.permute.xlu1 %1745  ;;  %4435 = vmatpush3.bf16.msra.mxu0 %v1661_v3 }
 0x39b   : > { %v1657_v9 = vpop.permute.xlu0 %1656 }
 0x39d   : > { %v1750_v7 = vpop.permute.xlu1 %1749  ;;  %4425 = vmatpush3.bf16.xpose.msra.mxu1 %v1477_v6 }
 0x39e   : > { %4620 = vmatprep.subr.msk.bf16.mxu1 %vm1463_vm3, %v1758_v59 }
 0x39f   : > { %v1655_v16 = vpop.permute.xlu0 %1654 }
 0x3a1   : > { %v1659_v12 = vpop.permute.xlu1 %1658  ;;  %v4412_v13 = vpop.f32.mrf.mxu1 }
 0x3a2   : > { %4436 = vmatprep.subr.bf16.mxu0 %v1659_v12  ;;  %v1425_v11 = vadd.f32 %v4412_v13, %v5522_v22 }
 0x3a3   : > { %4437 = vmatpush3.bf16.msra.mxu0 %v1659_v12  ;;  %v1416_v17 = vpop.f32.mrf.mxu1 }
 0x3a4   : > { %4427 = vmatmul.mubr.msk.bf16.vlgmr.msra.gmra.mxu1 %vm1463_vm3, %v5544_v52  ;;  %4438 = vmatprep.subr.bf16.mxu0 %v1657_v9  ;;  %v1417_v30 = vadd.f32 %v5522_v22, %v1416_v17 }
 0x3a5   : > { %4430 = vmatprep.mubr.msk.bf16.mxu1 %vm1463_vm3, %v5537_v50  ;;  %4451 = vmatpush3.bf16.xpose.msra.mxu1 %v1781_v14  ;;  %v4413_v38 = vpop.f32.mrf.mxu1 }
 0x3a6   : > { %4621 = vmatprep.subr.msk.bf16.mxu1 %vm1463_vm3, %v1756_v62  ;;  %v1428_v33 = vadd.f32 %v4413_v38, %v5522_v22 }
 0x3a7   : > { %4439 = vmatpush3.bf16.msra.mxu0 %v1657_v9  ;;  %v1419_v20 = vpop.f32.mrf.mxu1 }
 0x3a8   : > { %4440 = vmatprep.subr.bf16.mxu0 %v1655_v16  ;;  %v5592_v18 = vpack.c.bf16 %v1428_v33, %v1425_v11  ;;  %v1420_v39 = vadd.f32 %v5522_v22, %v1419_v20 }
 0x3a9   : > { %v4416_v19 = vpop.f32.mrf.mxu1 }
 0x3aa   : > { %v5595_v49 = vpack.c.bf16 %v1420_v39, %v1417_v30  ;;  %v1441_v24 = vadd.f32 %v4416_v19, %v5522_v22 }
 0x3ab   : > { %4441 = vmatpush3.bf16.msra.mxu0 %v1655_v16  ;;  %v5597_v53 = vpop.f32.mrf.mxu1 }
 0x3ac   : > { %4431 = vmatmul.mubr.msk.bf16.gmra.mxu1 %vm1463_vm3, %v5533_v46 }
 0x3ad   : > { %4453 = vmatpush3.bf16.xpose.msra.mxu1 %v1778_v23  ;;  %4458 = vmatprep.mubr.msk.bf16.mxu1 %vm1463_vm3, %v1744_v10  ;;  %v4417_v25 = vpop.f32.mrf.mxu1 }
 0x3ae   : > { %4622 = vmatprep.subr.msk.bf16.mxu1 %vm1463_vm3, %v1754_v1  ;;  %v1444_v28 = vadd.f32 %v4417_v25, %v5522_v22 }
 0x3af   : > { %v5614_v8 = vpop.f32.mrf.mxu1 }
 0x3b0   : > { %v5606_v29 = vpack.c.bf16 %v1444_v28, %v1441_v24 }
 0x3b5   : > { %4455 = vmatpush3.bf16.xpose.msra.mxu1 %v1775_v26 }
 0x3b6   : > { %4623 = vmatprep.subr.msk.bf16.mxu1 %vm1463_vm3, %v1752_v2 }
 0x3bd   : > { %4457 = vmatpush3.bf16.xpose.msra.mxu1 %v1772_v4 }
 0x3c4   : > { %4459 = vmatmul.mubr.msk.bf16.vlgmr.msra.gmra.mxu1 %vm1463_vm3, %v1746_v5 }
 0x3c5   : > { %4462 = vmatprep.mubr.msk.bf16.mxu1 %vm1463_vm3, %v1748_v27 }
 0x3cc   : > { %4463 = vmatmul.mubr.msk.bf16.gmra.mxu1 %vm1463_vm3, %v1750_v7 }
 0x464   : > { %v4428_v21 = vpop.f32.mrf.mxu1 }
 0x465   : > { %v5616_v42 = vmul.f32 0.25, %v4428_v21 }
 0x466   : > { %v1522_v34 = vpop.f32.mrf.mxu1 }
 0x467   : > { %v5618_v36 = vmul.f32 0.25, %v1522_v34  ;;  %v1568_v37 = vsel %vm1561_vm4, %v5616_v42, -inf }
 0x468   : > { %1569 = vmax.xlane.f32.xlu0 %v1568_v37  ;;  %v4429_v40 = vpop.f32.mrf.mxu1 }
 0x469   : > { %v5622_v41 = vmul.f32 0.25, %v4429_v40  ;;  %v1562_v44 = vsel %vm1561_vm4, %v5618_v36, -inf }
 0x46a   : > { %v1525_v15 = vpop.f32.mrf.mxu1 }
 0x46b   : > { %v5624_v43 = vmul.f32 0.25, %v1525_v15  ;;  %v1571_v57 = vsel %vm1561_vm4, %v5622_v41, -inf }
 0x46c   : > { %1563 = vmax.xlane.f32.xlu0 %v1562_v44  ;;  %v4432_v0 = vpop.f32.mrf.mxu1 }
 0x46d   : > { %v1565_v45 = vsel %vm1561_vm4, %v5624_v43, -inf  ;;  %v5630_v32 = vmul.f32 0.25, %v4432_v0 }
 0x46e   : > { %1566 = vmax.xlane.f32.xlu1 %v1565_v45  ;;  %v1538_v31 = vpop.f32.mrf.mxu1 }
 0x46f   : > { %v5636_v54 = vmul.f32 0.25, %v1538_v31  ;;  %v1580_v58 = vsel %vm1561_vm4, %v5630_v32, -inf }
 0x470   : > { %1572 = vmax.xlane.f32.xlu0 %v1571_v57  ;;  %v4433_v47 = vpop.f32.mrf.mxu1 }
 0x471   : > { %v5634_v48 = vmul.f32 0.25, %v4433_v47  ;;  %v1574_v60 = vsel %vm1561_vm4, %v5636_v54, -inf }
 0x472   : > { %v1541_v51 = vpop.f32.mrf.mxu1 }
 0x473   : > { %v5638_v55 = vmul.f32 0.25, %v1541_v51  ;;  %v1583_v59 = vsel %vm1561_vm4, %v5634_v48, -inf }
 0x474   : > { %1581 = vmax.xlane.f32.xlu0 %v1580_v58  ;;  %1584 = vmax.xlane.f32.xlu1 %v1583_v59 }
 0x475   : > { %v1577_v1 = vsel %vm1561_vm4, %v5638_v55, -inf }
 0x478   : > { %1575 = vmax.xlane.f32.xlu0 %v1574_v60  ;;  %1578 = vmax.xlane.f32.xlu1 %v1577_v1 }
 0x484   : > { %v4460_v35 = vpop.f32.mrf.mxu1 }
 0x485   : > { %v5648_v61 = vmul.f32 0.25, %v4460_v35 }
 0x486   : > { %v1817_v10 = vpop.f32.mrf.mxu1 }
 0x487   : > { %v5650_v62 = vmul.f32 0.25, %v1817_v10  ;;  %v1862_v27 = vsel %vm1561_vm4, %v5648_v61, -inf }
 0x488   : > { %1863 = vmax.xlane.f32.xlu0 %v1862_v27  ;;  %v4461_v2 = vpop.f32.mrf.mxu1 }
 0x489   : > { %1952 = vrot.lane.b32.xlu1 %v5537_v50, %s5015_s22  ;;  %v1856_v63 = vsel %vm1561_vm4, %v5650_v62, -inf  ;;  %v5660_v6 = vmul.f32 0.25, %v4461_v2 }
 0x48a   : > { %v1820_v3 = vpop.f32.mrf.mxu1 }
 0x48b   : > { %v5662_v9 = vmul.f32 0.25, %v1820_v3  ;;  %v1865_v12 = vsel %vm1561_vm4, %v5660_v6, -inf }
 0x48c   : > { %1857 = vmax.xlane.f32.xlu0 %v1856_v63  ;;  %v4464_v5 = vpop.f32.mrf.mxu1 }
 0x48d   : > { %v1859_v17 = vsel %vm1561_vm4, %v5662_v9, -inf  ;;  %v5676_v30 = vmul.f32 0.25, %v4464_v5 }
 0x48e   : > { %v1833_v7 = vpop.f32.mrf.mxu1 }
 0x48f   : > { %v5678_v33 = vmul.f32 0.25, %v1833_v7  ;;  %v1874_v16 = vsel %vm1561_vm4, %v5676_v30, -inf }
 0x490   : > { %v4465_v13 = vpop.f32.mrf.mxu1 }
 0x491   : > { %v5666_v50 = vmul.f32 0.25, %v4465_v13  ;;  %v1868_v20 = vsel %vm1561_vm4, %v5678_v33, -inf }
 0x492   : > { %v1836_v14 = vpop.f32.mrf.mxu1 }
 0x493   : > { %v5670_v11 = vmul.f32 0.25, %v1836_v14 }
 0x495   : > { %v1871_v38 = vsel %vm1561_vm4, %v5670_v11, -inf }
 0x4a2   : > { %1954 = vrot.lane.b32.xlu0 %v5533_v46, %s5015_s22  ;;  %v1877_v46 = vsel %vm1561_vm4, %v5666_v50, -inf }
 0x4ad   : > { %1866 = vmax.xlane.f32.xlu1 %v1865_v12 }
 0x4b1   : > { %1860 = vmax.xlane.f32.xlu1 %v1859_v17 }
 0x4b5   : > { %1878 = vmax.xlane.f32.xlu1 %v1877_v46 }
 0x4b9   : > { %1872 = vmax.xlane.f32.xlu1 %v1871_v38 }
 0x4c1   : > { %1875 = vmax.xlane.f32.xlu0 %v1874_v16 }
 0x4c5   : > { %1869 = vmax.xlane.f32.xlu0 %v1868_v20 }
 0x4ca   : > { %1948 = vrot.lane.b32.xlu1 %v5526_v56, %s5015_s22 }
 0x4db   : > { %1950 = vrot.lane.b32.xlu0 %v5544_v52, %s5015_s22 }
 0x4f1   : > { %v1570_v39 = vpop.xlane.xlu0 %1569 }
 0x4f2   : > { %v1588_v19 = vsub.f32 %v5616_v42, %v1570_v39 }
 0x4f4   : > { %v1598_v23 = vmul.f32 1.442695, %v1588_v19 }
 0x4f5   : > { %v1564_v24 = vpop.xlane.xlu0 %1563 }
 0x4f6   : > { %4747 = vpow2.f32 %v1598_v23  ;;  %v1586_v25 = vsub.f32 %v5618_v36, %v1564_v24 }
 0x4f7   : > { %v1567_v28 = vpop.xlane.xlu1 %1566 }
 0x4f8   : > { %v1594_v26 = vmul.f32 1.442695, %v1586_v25  ;;  %v1587_v4 = vsub.f32 %v5624_v43, %v1567_v28 }
 0x4f9   : > { %v1573_v21 = vpop.xlane.xlu0 %1572 }
 0x4fa   : > { %4749 = vpow2.f32 %v1594_v26  ;;  %v1589_v34 = vsub.f32 %v5622_v41, %v1573_v21  ;;  %v1596_v56 = vmul.f32 1.442695, %v1587_v4 }
 0x4fc   : > { %v1600_v37 = vmul.f32 1.442695, %v1589_v34 }
 0x4fd   : > { %v1585_v40 = vpop.xlane.xlu1 %1584  ;;  %v1582_v52 = vpop.xlane.xlu0 %1581 }
 0x4fe   : > { %4751 = vpow2.f32 %v1600_v37  ;;  %v1593_v42 = vsub.f32 %v5634_v48, %v1585_v40  ;;  %v1592_v15 = vsub.f32 %v5630_v32, %v1582_v52 }
 0x4ff   : > { %4753 = vpow2.f32 %v1596_v56 }
 0x500   : > { %v1608_v44 = vmul.f32 1.442695, %v1593_v42  ;;  %v1606_v36 = vmul.f32 1.442695, %v1592_v15 }
 0x501   : > { %v1579_v0 = vpop.xlane.xlu1 %1578  ;;  %v1576_v45 = vpop.xlane.xlu0 %1575 }
 0x502   : > { %v1591_v43 = vsub.f32 %v5638_v55, %v1579_v0  ;;  %v1590_v31 = vsub.f32 %v5636_v54, %v1576_v45  ;;  %4755 = vpow2.f32 %v1606_v36 }
 0x503   : > { %v5696_v57 = vpop.eup %4747  ;;  %4757 = vpow2.f32 %v1608_v44 }
 0x504   : > { %v1604_v41 = vmul.f32 1.442695, %v1591_v43  ;;  %v1602_v47 = vmul.f32 1.442695, %v1590_v31  ;;  %v1616_v48 = vsel %vm1561_vm4, %v5696_v57, 0.0 }
 0x505   : > { %1617 = vadd.xlane.f32.xlu0 %v1616_v48  ;;  %v5741_v20 = vpop.permute.xlu1 %1952  ;;  %v1433_v48 = vadd.f32 %v5522_v22, %v5597_v53 }
 0x506   : > { %4759 = vpow2.f32 %v1602_v47 }
 0x507   : > { %v5700_v32 = vpop.eup %4749  ;;  %4761 = vpow2.f32 %v1604_v41 }
 0x508   : > { %v1610_v51 = vsel %vm1561_vm4, %v5700_v32, 0.0 }
 0x509   : > { %1611 = vadd.xlane.f32.xlu0 %v1610_v51  ;;  %v1436_v51 = vadd.f32 %v5522_v22, %v5614_v8 }
 0x50b   : > { %v5704_v55 = vpop.eup %4751 }
 0x50c   : > { %v1619_v54 = vsel %vm1561_vm4, %v5704_v55, 0.0  ;;  %v5708_v58 = vpop.eup %4753 }
 0x50d   : > { %1620 = vadd.xlane.f32.xlu1 %v1619_v54  ;;  %v1613_v60 = vsel %vm1561_vm4, %v5708_v58, 0.0  ;;  %v5777_v54 = vpack.c.bf16 %v1436_v51, %v1433_v48 }
 0x50f   : > { %v5710_v59 = vpop.eup %4755 }
 0x510   : > { %v5714_v1 = vpop.eup %4757  ;;  %v1628_v35 = vsel %vm1561_vm4, %v5710_v59, 0.0 }
 0x511   : > { %1614 = vadd.xlane.f32.xlu1 %v1613_v60  ;;  %v1864_v10 = vpop.xlane.xlu0 %1863  ;;  %1629 = vadd.xlane.f32.xlu0 %v1628_v35  ;;  %v1631_v3 = vsel %vm1561_vm4, %v5714_v1, 0.0 }
 0x512   : > { %v1882_v27 = vsub.f32 %v5648_v61, %v1864_v10 }
 0x513   : > { %v5719_v63 = vpop.eup %4759 }
 0x514   : > { %v1892_v2 = vmul.f32 1.442695, %v1882_v27  ;;  %v5723_v5 = vpop.eup %4761  ;;  %v1622_v7 = vsel %vm1561_vm4, %v5719_v63, 0.0 }
 0x515   : > { %1632 = vadd.xlane.f32.xlu1 %v1631_v3  ;;  %v1858_v12 = vpop.xlane.xlu0 %1857  ;;  %1623 = vadd.xlane.f32.xlu0 %v1622_v7  ;;  %v1625_v61 = vsel %vm1561_vm4, %v5723_v5, 0.0 }
 0x516   : > { %4763 = vpow2.f32 %v1892_v2  ;;  %v1880_v13 = vsub.f32 %v5650_v62, %v1858_v12 }
 0x518   : > { %v1888_v17 = vmul.f32 1.442695, %v1880_v13 }
 0x519   : > { %1626 = vadd.xlane.f32.xlu1 %v1625_v61  ;;  %v5730_v14 = vpop.permute.xlu0 %1954 }
 0x51a   : > { %4765 = vpow2.f32 %v1888_v17  ;;  %4466 = vmatprep.subr.bf16.mxu0 %v5730_v14 }
 0x523   : > { %v5733_v46 = vpop.eup %4763 }
 0x524   : > { %v1910_v38 = vsel %vm1561_vm4, %v5733_v46, 0.0 }
 0x525   : > { %1911 = vadd.xlane.f32.xlu1 %v1910_v38 }
 0x527   : > { %v5737_v16 = vpop.eup %4765 }
 0x528   : > { %v1904_v62 = vsel %vm1561_vm4, %v5737_v16, 0.0 }
 0x529   : > { %1905 = vadd.xlane.f32.xlu1 %v1904_v62 }
 0x536   : > { %v1867_v39 = vpop.xlane.xlu1 %1866 }
 0x537   : > { %v1883_v19 = vsub.f32 %v5660_v6, %v1867_v39 }
 0x539   : > { %v1894_v23 = vmul.f32 1.442695, %v1883_v19 }
 0x53a   : > { %v1861_v24 = vpop.xlane.xlu1 %1860 }
 0x53b   : > { %4767 = vpow2.f32 %v1894_v23  ;;  %v1881_v25 = vsub.f32 %v5662_v9, %v1861_v24 }
 0x53d   : > { %v1890_v28 = vmul.f32 1.442695, %v1881_v25 }
 0x53e   : > { %v1879_v26 = vpop.xlane.xlu1 %1878 }
 0x53f   : > { %4769 = vpow2.f32 %v1890_v28  ;;  %v1887_v21 = vsub.f32 %v5666_v50, %v1879_v26 }
 0x541   : > { %v1902_v52 = vmul.f32 1.442695, %v1887_v21 }
 0x542   : > { %v1873_v56 = vpop.xlane.xlu1 %1872 }
 0x543   : > { %v1885_v9 = vsub.f32 %v5670_v11, %v1873_v56 }
 0x545   : > { %v1898_v36 = vmul.f32 1.442695, %v1885_v9 }
 0x546   : > { %v1949_v53 = vpop.permute.xlu1 %1948 }
 0x548   : > { %v5745_v4 = vpop.eup %4767 }
 0x549   : > { %v1913_v34 = vsel %vm1561_vm4, %v5745_v4, 0.0 }
 0x54a   : > { %1914 = vadd.xlane.f32.xlu1 %v1913_v34  ;;  %v1876_v37 = vpop.xlane.xlu0 %1875 }
 0x54b   : > { %v1886_v6 = vsub.f32 %v5676_v30, %v1876_v37 }
 0x54c   : > { %v5751_v40 = vpop.eup %4769 }
 0x54d   : > { %v1900_v42 = vmul.f32 1.442695, %v1886_v6  ;;  %v1907_v15 = vsel %vm1561_vm4, %v5751_v40, 0.0 }
 0x54e   : > { %1908 = vadd.xlane.f32.xlu1 %v1907_v15  ;;  %v1870_v44 = vpop.xlane.xlu0 %1869 }
 0x54f   : > { %4771 = vpow2.f32 %v1900_v42  ;;  %v1884_v50 = vsub.f32 %v5678_v33, %v1870_v44 }
 0x550   : > { %4773 = vpow2.f32 %v1902_v52 }
 0x551   : > { %v1896_v0 = vmul.f32 1.442695, %v1884_v50 }
 0x552   : > { %v1951_v60 = vpop.permute.xlu0 %1950 }
 0x553   : > { %4775 = vpow2.f32 %v1896_v0 }
 0x554   : > { %4777 = vpow2.f32 %v1898_v36 }
 0x55c   : > { %v5757_v30 = vpop.eup %4771 }
 0x55d   : > { %v1922_v45 = vsel %vm1561_vm4, %v5757_v30, 0.0  ;;  %v5761_v11 = vpop.eup %4773 }
 0x55e   : > { %1923 = vadd.xlane.f32.xlu0 %v1922_v45  ;;  %v1925_v31 = vsel %vm1561_vm4, %v5761_v11, 0.0 }
 0x560   : > { %v5763_v43 = vpop.eup %4775 }
 0x561   : > { %v1916_v33 = vsel %vm1561_vm4, %v5763_v43, 0.0  ;;  %v5769_v41 = vpop.eup %4777 }
 0x562   : > { %1926 = vadd.xlane.f32.xlu0 %v1925_v31  ;;  %1917 = vadd.xlane.f32.xlu1 %v1916_v33  ;;  %v1919_v47 = vsel %vm1561_vm4, %v5769_v41, 0.0 }
 0x566   : > { %1920 = vadd.xlane.f32.xlu0 %v1919_v47 }
 0x573   : > { %2089 = vrot.lane.b32.xlu1 %v5777_v54, %s5011_s29 }
 0x577   : > { %2087 = vrot.lane.b32.xlu1 %v5592_v18, %s5011_s29 }
 0x57b   : > { %2085 = vrot.lane.b32.xlu1 %v5595_v49, %s5011_s29 }
 0x57c   : > { %2091 = vrot.lane.b32.xlu0 %v5606_v29, %s5011_s29 }
 0x58e   : > { %v1618_v35 = vpop.xlane.xlu0 %1617 }
 0x592   : > { %v1612_v10 = vpop.xlane.xlu0 %1611 }
 0x596   : > { %v1621_v27 = vpop.xlane.xlu1 %1620 }
 0x597   : > { %4779 = vrcp.f32 %v1621_v27 }
 0x598   : > { %4781 = vrcp.f32 %v1612_v10 }
 0x599   : > { %4783 = vrcp.f32 %v1618_v35 }
 0x59a   : > { %v1615_v22 = vpop.xlane.xlu1 %1614  ;;  %v1630_v8 = vpop.xlane.xlu0 %1629 }
 0x59b   : > { %4785 = vrcp.f32 %v1615_v22 }
 0x59e   : > { %v1633_v2 = vpop.xlane.xlu1 %1632  ;;  %v1624_v3 = vpop.xlane.xlu0 %1623 }
 0x59f   : > { %4787 = vrcp.f32 %v1633_v2 }
 0x5a0   : > { %4789 = vrcp.f32 %v1624_v3 }
 0x5a1   : > { %4791 = vrcp.f32 %v1630_v8 }
 0x5a2   : > { %v1627_v7 = vpop.xlane.xlu1 %1626 }
 0x5a3   : > { %4793 = vrcp.f32 %v1627_v7 }
 0x5a4   : > { %v4780_v12 = vpop.eup %4779 }
 0x5a5   : > { %v4782_v13 = vpop.eup %4781  ;;  %v1645_v38 = vmul.f32 %v4780_v12, %v5704_v55 }
 0x5a6   : > { %v4784_v17 = vpop.eup %4783  ;;  %v1642_v62 = vmul.f32 %v4782_v13, %v5700_v32 }
 0x5a7   : > { %v1644_v19 = vmul.f32 %v4784_v17, %v5696_v57 }
 0x5a8   : > { %v4786_v61 = vpop.eup %4785 }
 0x5a9   : > { %v1643_v39 = vmul.f32 %v4786_v61, %v5708_v58  ;;  %v1651_v24 = vpack.c.bf16 %v1645_v38, %v1644_v19 }
 0x5ab   : > { %v1650_v23 = vpack.c.bf16 %v1643_v39, %v1642_v62 }
 0x5ac   : > { %v4788_v25 = vpop.eup %4787 }
 0x5ad   : > { %4442 = vmatprep.mubr.msk.bf16.mxu0 %vm1561_vm4, %v1650_v23  ;;  %v4790_v28 = vpop.eup %4789  ;;  %v1649_v32 = vmul.f32 %v4788_v25, %v5714_v1 }
 0x5ae   : > { %4443 = vmatmul.mubr.msk.bf16.vlgmr.msra.gmra.mxu0 %vm1561_vm4, %v1651_v24  ;;  %v4792_v26 = vpop.eup %4791  ;;  %v1646_v55 = vmul.f32 %v4790_v28, %v5719_v63 }
 0x5af   : > { %4467 = vmatpush3.bf16.msra.mxu0 %v5730_v14  ;;  %v1648_v58 = vmul.f32 %v4792_v26, %v5710_v59  ;;  %v1912_v14 = vpop.xlane.xlu1 %1911 }
 0x5b0   : > { %v4794_v21 = vpop.eup %4793  ;;  %4468 = vmatprep.subr.bf16.mxu0 %v5741_v20 }
 0x5b1   : > { %v1647_v57 = vmul.f32 %v4794_v21, %v5723_v5  ;;  %v1653_v56 = vpack.c.bf16 %v1649_v32, %v1648_v58 }
 0x5b3   : > { %4469 = vmatpush3.bf16.msra.mxu0 %v5741_v20  ;;  %v1652_v34 = vpack.c.bf16 %v1647_v57, %v1646_v55  ;;  %v1906_v1 = vpop.xlane.xlu1 %1905 }
 0x5b4   : > { %4470 = vmatprep.subr.bf16.mxu0 %v1951_v60 }
 0x5b5   : > { %4446 = vmatprep.mubr.msk.bf16.mxu0 %vm1561_vm4, %v1652_v34 }
 0x5b6   : > { %4447 = vmatmul.mubr.msk.bf16.gmra.mxu0 %vm1561_vm4, %v1653_v56 }
 0x5b7   : > { %4471 = vmatpush3.bf16.msra.mxu0 %v1951_v60 }
 0x5b8   : > { %4472 = vmatprep.subr.bf16.mxu0 %v1949_v53 }
 0x5bb   : > { %4473 = vmatpush3.bf16.msra.mxu0 %v1949_v53 }
 0x5d3   : > { %v1915_v37 = vpop.xlane.xlu1 %1914 }
 0x5d4   : > { %4795 = vrcp.f32 %v1915_v37 }
 0x5d5   : > { %4797 = vrcp.f32 %v1906_v1 }
 0x5d6   : > { %4799 = vrcp.f32 %v1912_v14 }
 0x5d7   : > { %v1909_v63 = vpop.xlane.xlu1 %1908 }
 0x5d8   : > { %4801 = vrcp.f32 %v1909_v63 }
 0x5e1   : > { %v4796_v59 = vpop.eup %4795 }
 0x5e2   : > { %v4798_v5 = vpop.eup %4797  ;;  %v1939_v52 = vmul.f32 %v4796_v59, %v5745_v4 }
 0x5e3   : > { %v4800_v20 = vpop.eup %4799  ;;  %v1936_v9 = vmul.f32 %v4798_v5, %v5737_v16 }
 0x5e4   : > { %v1938_v15 = vmul.f32 %v4800_v20, %v5733_v46 }
 0x5e5   : > { %v4802_v6 = vpop.eup %4801 }
 0x5e6   : > { %v1937_v42 = vmul.f32 %v4802_v6, %v5751_v40  ;;  %v1945_v36 = vpack.c.bf16 %v1939_v52, %v1938_v15 }
 0x5e7   : > { %v1924_v44 = vpop.xlane.xlu0 %1923 }
 0x5e8   : > { %v1944_v50 = vpack.c.bf16 %v1937_v42, %v1936_v9 }
 0x5ea   : > { %4474 = vmatprep.mubr.msk.bf16.mxu0 %vm1561_vm4, %v1944_v50 }
 0x5eb   : > { %v1918_v0 = vpop.xlane.xlu1 %1917  ;;  %4475 = vmatmul.mubr.msk.bf16.vlgmr.msra.gmra.mxu0 %vm1561_vm4, %v1945_v36  ;;  %v1927_v45 = vpop.xlane.xlu0 %1926 }
 0x5ec   : > { %4803 = vrcp.f32 %v1927_v45 }
 0x5ed   : > { %4805 = vrcp.f32 %v1918_v0 }
 0x5ee   : > { %4807 = vrcp.f32 %v1924_v44 }
 0x5ef   : > { %v1921_v31 = vpop.xlane.xlu0 %1920  ;;  %v2090_v46 = vpop.permute.xlu1 %2089 }
 0x5f0   : > { %4809 = vrcp.f32 %v1921_v31  ;;  %v2112_v48 = vsel %vm1463_vm3, %v2090_v46, 0 }
 0x5f3   : > { %v2092_v4 = vpop.permute.xlu0 %2091  ;;  %v2088_v60 = vpop.permute.xlu1 %2087 }
 0x5f4   : > { %v2115_v16 = vsel %vm1463_vm3, %v2092_v4, 0  ;;  %4624 = vmatprep.subr.msk.bf16.mxu0 %vm1463_vm3, %v2092_v4  ;;  %v2109_v2 = vsel %vm1463_vm3, %v2088_v60, 0 }
 0x5f5   : > { %4483 = vmatpush3.bf16.xpose.msra.mxu0 %v2115_v16 }
 0x5f6   : > { %4625 = vmatprep.subr.msk.bf16.mxu0 %vm1463_vm3, %v2090_v46 }
 0x5f9   : > { %v4804_v40 = vpop.eup %4803 }
 0x5fa   : > { %v4806_v33 = vpop.eup %4805  ;;  %v1943_v35 = vmul.f32 %v4804_v40, %v5761_v11  ;;  %v2086_v11 = vpop.permute.xlu1 %2085 }
 0x5fb   : > { %v4808_v47 = vpop.eup %4807  ;;  %v1940_v53 = vmul.f32 %v4806_v33, %v5763_v43  ;;  %v2106_v43 = vsel %vm1463_vm3, %v2086_v11, 0 }
 0x5fc   : > { %v1942_v27 = vmul.f32 %v4808_v47, %v5757_v30 }
 0x5fd   : > { %v4810_v51 = vpop.eup %4809  ;;  %4485 = vmatpush3.bf16.xpose.msra.mxu0 %v2112_v48 }
 0x5fe   : > { %4626 = vmatprep.subr.msk.bf16.mxu0 %vm1463_vm3, %v2088_v60  ;;  %v1941_v10 = vmul.f32 %v4810_v51, %v5769_v41  ;;  %v1947_v8 = vpack.c.bf16 %v1943_v35, %v1942_v27 }
 0x600   : > { %v1946_v22 = vpack.c.bf16 %v1941_v10, %v1940_v53 }
 0x602   : > { %4478 = vmatprep.mubr.msk.bf16.mxu0 %vm1561_vm4, %v1946_v22 }
 0x603   : > { %4479 = vmatmul.mubr.msk.bf16.gmra.mxu0 %vm1561_vm4, %v1947_v8 }
 0x604   : > { %4490 = vmatprep.mubr.msk.bf16.mxu0 %vm1463_vm3, %v5595_v49 }
 0x605   : > { %4487 = vmatpush3.bf16.xpose.msra.mxu0 %v2109_v2 }
 0x606   : > { %4627 = vmatprep.subr.msk.bf16.mxu0 %vm1463_vm3, %v2086_v11 }
 0x60d   : > { %4489 = vmatpush3.bf16.xpose.msra.mxu0 %v2106_v43 }
 0x614   : > { %4491 = vmatmul.mubr.msk.bf16.vlgmr.msra.gmra.mxu0 %vm1463_vm3, %v5592_v18 }
 0x615   : > { %4494 = vmatprep.mubr.msk.bf16.mxu0 %vm1463_vm3, %v5777_v54 }
 0x61c   : > { %4495 = vmatmul.mubr.msk.bf16.gmra.mxu0 %vm1463_vm3, %v5606_v29 }
 0x66e   : > { %v5830_v30 = vpop.f32.mrf.mxu0 }
 0x670   : > { %v5832_v41 = vpop.f32.mrf.mxu0 }
 0x672   : > { %v5834_v3 = vpop.f32.mrf.mxu0 }
 0x674   : > { %v5836_v7 = vpop.f32.mrf.mxu0 }
 0x676   : > { %v5838_v12 = vpop.f32.mrf.mxu0 }
 0x678   : > { %v5840_v13 = vpop.f32.mrf.mxu0 }
 0x67a   : > { %v5842_v17 = vpop.f32.mrf.mxu0 }
 0x67c   : > { %v5844_v61 = vpop.f32.mrf.mxu0 }
 0x6ab   : > { %v5846_v38 = vpop.f32.mrf.mxu0 }
 0x6ad   : > { %v5848_v62 = vpop.f32.mrf.mxu0 }
 0x6af   : > { %v5850_v39 = vpop.f32.mrf.mxu0 }
 0x6b0   : > { %v4670_v19 = vpack.i.bf16 %v5850_v39, %v5846_v38 }
 0x6b1   : > { %v5854_v23 = vpop.f32.mrf.mxu0 }
 0x6b2   : > { %v4665_v24 = vpack.i.bf16 %v5854_v23, %v5848_v62 }
 0x6c3   : > { %v5858_v25 = vpop.f32.mrf.mxu0 }
 0x6c5   : > { %v5860_v28 = vpop.f32.mrf.mxu0 }
 0x6c7   : > { %v5862_v26 = vpop.f32.mrf.mxu0 }
 0x6c8   : > { %v4680_v21 = vpack.i.bf16 %v5862_v26, %v5858_v25 }
 0x6c9   : > { %v5866_v32 = vpop.f32.mrf.mxu0 }
 0x6ca   : > { %v4675_v55 = vpack.i.bf16 %v5866_v32, %v5860_v28 }
 0x6d4   : > { %v4492_v57 = vpop.f32.mrf.mxu0 }
 0x6d5   : > { %v2184_v14 = vmul.f32 0.25, %v4492_v57 }
 0x6d6   : > { %v2151_v58 = vpop.f32.mrf.mxu0 }
 0x6d7   : > { %v2182_v34 = vmul.f32 0.25, %v2151_v58  ;;  %v2196_v20 = vsel %vm1561_vm4, %v2184_v14, -inf }
 0x6d8   : > { %v4493_v56 = vpop.f32.mrf.mxu0 }
 0x6d9   : > { %v2190_v1 = vsel %vm1561_vm4, %v2182_v34, -inf  ;;  %v2185_v5 = vmul.f32 0.25, %v4493_v56 }
 0x6da   : > { %2191 = vmax.xlane.f32.xlu0 %v2190_v1  ;;  %v2154_v37 = vpop.f32.mrf.mxu0 }
 0x6db   : > { %v2183_v63 = vmul.f32 0.25, %v2154_v37  ;;  %v2199_v44 = vsel %vm1561_vm4, %v2185_v5, -inf }
 0x6dc   : > { %v4496_v59 = vpop.f32.mrf.mxu0 }
 0x6dd   : > { %v2193_v6 = vsel %vm1561_vm4, %v2183_v63, -inf  ;;  %v2188_v42 = vmul.f32 0.25, %v4496_v59 }
 0x6de   : > { %2197 = vmax.xlane.f32.xlu0 %v2196_v20  ;;  %2194 = vmax.xlane.f32.xlu1 %v2193_v6  ;;  %v2167_v52 = vpop.f32.mrf.mxu0 }
 0x6df   : > { %v2186_v45 = vmul.f32 0.25, %v2167_v52  ;;  %v2208_v31 = vsel %vm1561_vm4, %v2188_v42, -inf }
 0x6e0   : > { %v4497_v9 = vpop.f32.mrf.mxu0 }
 0x6e1   : > { %v2189_v15 = vmul.f32 0.25, %v4497_v9  ;;  %v2202_v16 = vsel %vm1561_vm4, %v2186_v45, -inf }
 0x6e2   : > { %2200 = vmax.xlane.f32.xlu0 %v2199_v44  ;;  %v2170_v50 = vpop.f32.mrf.mxu0 }
 0x6e3   : > { %v2187_v36 = vmul.f32 0.25, %v2170_v50  ;;  %v2211_v0 = vsel %vm1561_vm4, %v2189_v15, -inf }
 0x6e4   : > { %2212 = vmax.xlane.f32.xlu1 %v2211_v0 }
 0x6e5   : > { %v2205_v4 = vsel %vm1561_vm4, %v2187_v36, -inf }
 0x6e6   : > { %2209 = vmax.xlane.f32.xlu0 %v2208_v31 }
 0x6e8   : > { %2206 = vmax.xlane.f32.xlu1 %v2205_v4 }
 0x6ea   : > { %2203 = vmax.xlane.f32.xlu0 %v2202_v16 }
 0x6f9   : > { %2286 = vrot.lane.b32.xlu1 %v5777_v54, %s5014_s2 }
 0x6fd   : > { %2284 = vrot.lane.b32.xlu1 %v5592_v18, %s5014_s2 }
 0x700   : > { %2288 = vrot.lane.b32.xlu0 %v5606_v29, %s5014_s2 }
 0x701   : > { %2282 = vrot.lane.b32.xlu1 %v5595_v49, %s5014_s2  ;;  %s6785_s2 = sld [smem:[#allocation12_spill]] (!%p4248_p6) }
 0x763   : > { %v2192_v46 = vpop.xlane.xlu0 %2191 }
 0x764   : > { %v2214_v40 = vsub.f32 %v2182_v34, %v2192_v46 }
 0x766   : > { %v2222_v51 = vmul.f32 1.442695, %v2214_v40 }
 0x767   : > { %v2198_v33 = vpop.xlane.xlu0 %2197  ;;  %v2195_v47 = vpop.xlane.xlu1 %2194 }
 0x768   : > { %v2216_v48 = vsub.f32 %v2184_v14, %v2198_v33  ;;  %v2215_v35 = vsub.f32 %v2183_v63, %v2195_v47 }
 0x76a   : > { %v2226_v60 = vmul.f32 1.442695, %v2216_v48  ;;  %v2224_v22 = vmul.f32 1.442695, %v2215_v35 }
 0x76b   : > { %v2201_v53 = vpop.xlane.xlu0 %2200 }
 0x76c   : > { %4811 = vpow2.f32 %v2226_v60  ;;  %v2217_v10 = vsub.f32 %v2185_v5, %v2201_v53 }
 0x76d   : > { %v2213_v27 = vpop.xlane.xlu1 %2212  ;;  %4813 = vpow2.f32 %v2222_v51 }
 0x76e   : > { %v2228_v8 = vmul.f32 1.442695, %v2217_v10  ;;  %v2221_v2 = vsub.f32 %v2189_v15, %v2213_v27 }
 0x76f   : > { %v2210_v11 = vpop.xlane.xlu0 %2209 }
 0x770   : > { %4815 = vpow2.f32 %v2228_v8  ;;  %v2220_v43 = vsub.f32 %v2188_v42, %v2210_v11  ;;  %v2236_v58 = vmul.f32 1.442695, %v2221_v2 }
 0x771   : > { %v2207_v57 = vpop.xlane.xlu1 %2206  ;;  %4817 = vpow2.f32 %v2224_v22 }
 0x772   : > { %v2234_v34 = vmul.f32 1.442695, %v2220_v43  ;;  %v2219_v56 = vsub.f32 %v2187_v36, %v2207_v57 }
 0x773   : > { %v2204_v14 = vpop.xlane.xlu0 %2203 }
 0x774   : > { %4819 = vpow2.f32 %v2234_v34  ;;  %v2218_v1 = vsub.f32 %v2186_v45, %v2204_v14  ;;  %v2232_v63 = vmul.f32 1.442695, %v2219_v56 }
 0x775   : > { %v2287_v37 = vpop.permute.xlu1 %2286  ;;  %4821 = vpow2.f32 %v2236_v58 }
 0x776   : > { %v2230_v59 = vmul.f32 1.442695, %v2218_v1 }
 0x777   : > { %v2289_v5 = vpop.permute.xlu0 %2288 }
 0x778   : > { %4823 = vpow2.f32 %v2230_v59  ;;  %4498 = vmatprep.subr.bf16.mxu1 %v2289_v5 }
 0x779   : > { %v5886_v20 = vpop.eup %4811  ;;  %4499 = vmatpush3.bf16.msra.mxu1 %v2289_v5  ;;  %4825 = vpow2.f32 %v2232_v63  ;;  %v2285_v9 = vpop.permute.xlu1 %2284 }
 0x77a   : > { %4500 = vmatprep.subr.bf16.mxu1 %v2287_v37  ;;  %v2244_v6 = vsel %vm1561_vm4, %v5886_v20, 0.0  ;;  %v4814_v52 = vpop.eup %4813 }
 0x77b   : > { %2245 = vadd.xlane.f32.xlu0 %v2244_v6  ;;  %v2238_v15 = vsel %vm1561_vm4, %v4814_v52, 0.0 }
 0x77d   : > { %v4816_v42 = vpop.eup %4815  ;;  %4501 = vmatpush3.bf16.msra.mxu1 %v2287_v37  ;;  %v2283_v0 = vpop.permute.xlu1 %2282 }
 0x77e   : > { %4502 = vmatprep.subr.bf16.mxu1 %v2285_v9  ;;  %v2247_v44 = vsel %vm1561_vm4, %v4816_v42, 0.0  ;;  %v4818_v50 = vpop.eup %4817 }
 0x77f   : > { %2239 = vadd.xlane.f32.xlu0 %v2238_v15  ;;  %2248 = vadd.xlane.f32.xlu1 %v2247_v44  ;;  %v2241_v31 = vsel %vm1561_vm4, %v4818_v50, 0.0 }
 0x781   : > { %v5892_v36 = vpop.eup %4819  ;;  %4503 = vmatpush3.bf16.msra.mxu1 %v2285_v9 }
 0x782   : > { %4504 = vmatprep.subr.bf16.mxu1 %v2283_v0  ;;  %v2256_v45 = vsel %vm1561_vm4, %v5892_v36, 0.0  ;;  %v4822_v4 = vpop.eup %4821 }
 0x783   : > { %2257 = vadd.xlane.f32.xlu0 %v2256_v45  ;;  %2242 = vadd.xlane.f32.xlu1 %v2241_v31  ;;  %v2259_v46 = vsel %vm1561_vm4, %v4822_v4, 0.0 }
 0x785   : > { %v4824_v16 = vpop.eup %4823  ;;  %4505 = vmatpush3.bf16.msra.mxu1 %v2283_v0 }
 0x786   : > { %v2250_v40 = vsel %vm1561_vm4, %v4824_v16, 0.0  ;;  %v4826_v33 = vpop.eup %4825 }
 0x787   : > { %2260 = vadd.xlane.f32.xlu0 %v2259_v46  ;;  %2251 = vadd.xlane.f32.xlu1 %v2250_v40  ;;  %v2253_v47 = vsel %vm1561_vm4, %v4826_v33, 0.0 }
 0x78b   : > { %2254 = vadd.xlane.f32.xlu0 %v2253_v47 }
 0x798   : > { %2383 = vrot.lane.b32.xlu1 %v5777_v54, %s5012_s20 }
 0x79c   : > { %2381 = vrot.lane.b32.xlu1 %v5592_v18, %s5012_s20 }
 0x7a0   : > { %2379 = vrot.lane.b32.xlu1 %v5595_v49, %s5012_s20 }
 0x7a1   : > { %2385 = vrot.lane.b32.xlu0 %v5606_v29, %s5012_s20 }
 0x7a4   : > { %2373 = vrot.lane.b32.xlu1 %v5592_v18, %s5013_s30 }
 0x7a5   : > { %2371 = vrot.lane.b32.xlu0 %v5595_v49, %s5013_s30 }
 0x7a8   : > { %2377 = vrot.lane.b32.xlu1 %v5606_v29, %s5013_s30 }
 0x7a9   : > { %2375 = vrot.lane.b32.xlu0 %v5777_v54, %s5013_s30  ;;  %s6784_s30 = scalar_lea.vmem %s6752_s15, %s5134_s0 }
 0x804   : > { %v2246_v48 = vpop.xlane.xlu0 %2245 }
 0x808   : > { %v2240_v51 = vpop.xlane.xlu0 %2239  ;;  %v2249_v60 = vpop.xlane.xlu1 %2248 }
 0x809   : > { %4827 = vrcp.f32 %v2249_v60 }
 0x80a   : > { %4829 = vrcp.f32 %v2240_v51 }
 0x80b   : > { %4831 = vrcp.f32 %v2246_v48 }
 0x80c   : > { %v2258_v35 = vpop.xlane.xlu0 %2257  ;;  %v2243_v53 = vpop.xlane.xlu1 %2242 }
 0x80d   : > { %4833 = vrcp.f32 %v2243_v53 }
 0x810   : > { %v2261_v10 = vpop.xlane.xlu0 %2260  ;;  %v2252_v27 = vpop.xlane.xlu1 %2251 }
 0x811   : > { %4835 = vrcp.f32 %v2261_v10 }
 0x812   : > { %4837 = vrcp.f32 %v2252_v27 }
 0x813   : > { %4839 = vrcp.f32 %v2258_v35 }
 0x814   : > { %v2255_v22 = vpop.xlane.xlu0 %2254  ;;  %v2384_v15 = vpop.permute.xlu1 %2383 }
 0x815   : > { %4841 = vrcp.f32 %v2255_v22  ;;  %v2406_v45 = vsel %vm1463_vm3, %v2384_v15, 0 }
 0x816   : > { %v4828_v8 = vpop.eup %4827 }
 0x817   : > { %v4830_v11 = vpop.eup %4829  ;;  %v2273_v58 = vmul.f32 %v4828_v8, %v4816_v42 }
 0x818   : > { %v2386_v2 = vpop.permute.xlu0 %2385  ;;  %v4832_v43 = vpop.eup %4831  ;;  %v2270_v34 = vmul.f32 %v4830_v11, %v4814_v52 }
 0x819   : > { %4628 = vmatprep.subr.msk.bf16.mxu1 %vm1463_vm3, %v2386_v2  ;;  %v2272_v14 = vmul.f32 %v4832_v43, %v5886_v20  ;;  %v2409_v6 = vsel %vm1463_vm3, %v2386_v2, 0  ;;  %v2382_v46 = vpop.permute.xlu1 %2381 }
 0x81a   : > { %v4834_v57 = vpop.eup %4833 }
 0x81b   : > { %v2271_v56 = vmul.f32 %v4834_v57, %v4818_v50  ;;  %v2279_v63 = vpack.c.bf16 %v2273_v58, %v2272_v14 }
 0x81c   : > { %v2372_v31 = vpop.permute.xlu0 %2371 }
 0x81d   : > { %v2278_v1 = vpack.c.bf16 %v2271_v56, %v2270_v34 }
 0x81e   : > { %v4836_v37 = vpop.eup %4835 }
 0x81f   : > { %v4838_v59 = vpop.eup %4837  ;;  %4506 = vmatprep.mubr.msk.bf16.mxu1 %vm1561_vm4, %v2278_v1  ;;  %v2277_v44 = vmul.f32 %v4836_v37, %v4822_v4  ;;  %v2380_v4 = vpop.permute.xlu1 %2379 }
 0x820   : > { %v4840_v5 = vpop.eup %4839  ;;  %4507 = vmatmul.mubr.msk.bf16.vlgmr.msra.gmra.mxu1 %vm1561_vm4, %v2279_v63  ;;  %v2274_v52 = vmul.f32 %v4838_v59, %v4824_v16  ;;  %v2403_v16 = vsel %vm1463_vm3, %v2382_v46, 0 }
 0x821   : > { %4515 = vmatpush3.bf16.xpose.msra.mxu1 %v2409_v6  ;;  %v2276_v50 = vmul.f32 %v4840_v5, %v5892_v36  ;;  %v2400_v36 = vsel %vm1463_vm3, %v2380_v4, 0 }
 0x822   : > { %v4842_v9 = vpop.eup %4841  ;;  %4629 = vmatprep.subr.msk.bf16.mxu1 %vm1463_vm3, %v2384_v15 }
 0x823   : > { %v2275_v42 = vmul.f32 %v4842_v9, %v4826_v33  ;;  %v2281_v0 = vpack.c.bf16 %v2277_v44, %v2276_v50  ;;  %v2374_v40 = vpop.permute.xlu1 %2373  ;;  %v2376_v33 = vpop.permute.xlu0 %2375 }
 0x825   : > { %v2280_v20 = vpack.c.bf16 %v2275_v42, %v2274_v52 }
 0x827   : > { %4510 = vmatprep.mubr.msk.bf16.mxu1 %vm1561_vm4, %v2280_v20  ;;  %v2378_v47 = vpop.permute.xlu1 %2377 }
 0x828   : > { %4511 = vmatmul.mubr.msk.bf16.gmra.mxu1 %vm1561_vm4, %v2281_v0 }
 0x829   : > { %4517 = vmatpush3.bf16.xpose.msra.mxu1 %v2406_v45  ;;  %4522 = vmatprep.mubr.msk.bf16.mxu1 %vm1463_vm3, %v2372_v31 }
 0x82a   : > { %4630 = vmatprep.subr.msk.bf16.mxu1 %vm1463_vm3, %v2382_v46 }
 0x831   : > { %4519 = vmatpush3.bf16.xpose.msra.mxu1 %v2403_v16 }
 0x832   : > { %4631 = vmatprep.subr.msk.bf16.mxu1 %vm1463_vm3, %v2380_v4 }
 0x839   : > { %4521 = vmatpush3.bf16.xpose.msra.mxu1 %v2400_v36 }
 0x840   : > { %4523 = vmatmul.mubr.msk.bf16.vlgmr.msra.gmra.mxu1 %vm1463_vm3, %v2374_v40 }
 0x841   : > { %4526 = vmatprep.mubr.msk.bf16.mxu1 %vm1463_vm3, %v2376_v33 }
 0x848   : > { %4527 = vmatmul.mubr.msk.bf16.gmra.mxu1 %vm1463_vm3, %v2378_v47 }
 0x8e0   : > { %v5934_v48 = vpop.f32.mrf.mxu1 }
 0x8e2   : > { %v5936_v51 = vpop.f32.mrf.mxu1 }
 0x8e4   : > { %v5938_v60 = vpop.f32.mrf.mxu1 }
 0x8e6   : > { %v5940_v35 = vpop.f32.mrf.mxu1 }
 0x8e8   : > { %v5942_v53 = vpop.f32.mrf.mxu1 }
 0x8ea   : > { %v5944_v10 = vpop.f32.mrf.mxu1 }
 0x8ec   : > { %v5946_v27 = vpop.f32.mrf.mxu1 }
 0x8ee   : > { %v5948_v22 = vpop.f32.mrf.mxu1 }
 0x900   : > { %v4524_v8 = vpop.f32.mrf.mxu1 }
 0x901   : > { %v2478_v57 = vmul.f32 0.25, %v4524_v8 }
 0x902   : > { %v2445_v2 = vpop.f32.mrf.mxu1 }
 0x903   : > { %v2476_v11 = vmul.f32 0.25, %v2445_v2  ;;  %v2490_v37 = vsel %vm1561_vm4, %v2478_v57, -inf }
 0x904   : > { %v4525_v43 = vpop.f32.mrf.mxu1 }
 0x905   : > { %v2484_v58 = vsel %vm1561_vm4, %v2476_v11, -inf  ;;  %v2479_v1 = vmul.f32 0.25, %v4525_v43 }
 0x906   : > { %2485 = vmax.xlane.f32.xlu0 %v2484_v58  ;;  %v2448_v34 = vpop.f32.mrf.mxu1 }
 0x907   : > { %v2477_v56 = vmul.f32 0.25, %v2448_v34  ;;  %v2493_v9 = vsel %vm1561_vm4, %v2479_v1, -inf }
 0x908   : > { %v4528_v14 = vpop.f32.mrf.mxu1 }
 0x909   : > { %v2487_v63 = vsel %vm1561_vm4, %v2477_v56, -inf  ;;  %v2482_v42 = vmul.f32 0.25, %v4528_v14 }
 0x90a   : > { %2491 = vmax.xlane.f32.xlu0 %v2490_v37  ;;  %2488 = vmax.xlane.f32.xlu1 %v2487_v63  ;;  %v2461_v59 = vpop.f32.mrf.mxu1 }
 0x90b   : > { %v2480_v6 = vmul.f32 0.25, %v2461_v59  ;;  %v2502_v0 = vsel %vm1561_vm4, %v2482_v42, -inf }
 0x90c   : > { %v4529_v5 = vpop.f32.mrf.mxu1 }
 0x90d   : > { %v2483_v44 = vmul.f32 0.25, %v4529_v5  ;;  %v2496_v20 = vsel %vm1561_vm4, %v2480_v6, -inf }
 0x90e   : > { %2494 = vmax.xlane.f32.xlu0 %v2493_v9  ;;  %v2464_v15 = vpop.f32.mrf.mxu1 }
 0x90f   : > { %v5954_v52 = vmul.f32 0.25, %v2464_v15  ;;  %v2505_v45 = vsel %vm1561_vm4, %v2483_v44, -inf }
 0x911   : > { %v2499_v50 = vsel %vm1561_vm4, %v5954_v52, -inf }
 0x912   : > { %2497 = vmax.xlane.f32.xlu0 %v2496_v20  ;;  %2500 = vmax.xlane.f32.xlu1 %v2499_v50 }
 0x916   : > { %2503 = vmax.xlane.f32.xlu0 %v2502_v0  ;;  %2506 = vmax.xlane.f32.xlu1 %v2505_v45 }
 0x98f   : > { %v2486_v31 = vpop.xlane.xlu0 %2485 }
 0x990   : > { %v2508_v46 = vsub.f32 %v2476_v11, %v2486_v31 }
 0x992   : > { %v2516_v40 = vmul.f32 1.442695, %v2508_v46 }
 0x993   : > { %v2492_v16 = vpop.xlane.xlu0 %2491  ;;  %v2489_v4 = vpop.xlane.xlu1 %2488 }
 0x994   : > { %v2510_v36 = vsub.f32 %v2478_v57, %v2492_v16  ;;  %v2509_v47 = vsub.f32 %v2477_v56, %v2489_v4 }
 0x996   : > { %v2520_v33 = vmul.f32 1.442695, %v2510_v36  ;;  %v2518_v43 = vmul.f32 1.442695, %v2509_v47 }
 0x997   : > { %v2495_v8 = vpop.xlane.xlu0 %2494 }
 0x998   : > { %4843 = vpow2.f32 %v2520_v33  ;;  %v2511_v2 = vsub.f32 %v2479_v1, %v2495_v8 }
 0x999   : > { %4845 = vpow2.f32 %v2516_v40 }
 0x99a   : > { %v2522_v58 = vmul.f32 1.442695, %v2511_v2 }
 0x99b   : > { %v2498_v34 = vpop.xlane.xlu0 %2497  ;;  %v2501_v31 = vpop.xlane.xlu1 %2500 }
 0x99c   : > { %4847 = vpow2.f32 %v2522_v58  ;;  %v2512_v14 = vsub.f32 %v2480_v6, %v2498_v34  ;;  %v2513_v4 = vsub.f32 %v5954_v52, %v2501_v31  ;;  %v4707_v58 = vld [vmem:[%s6782_s23 + $0x8] sm:$0xff]  }
 0x99d   : > { %4849 = vpow2.f32 %v2518_v43 }
 0x99e   : > { %v2524_v59 = vmul.f32 1.442695, %v2512_v14 }
 0x99f   : > { %v2504_v37 = vpop.xlane.xlu0 %2503  ;;  %v2507_v46 = vpop.xlane.xlu1 %2506 }
 0x9a0   : > { %v2514_v63 = vsub.f32 %v2482_v42, %v2504_v37  ;;  %v2515_v16 = vsub.f32 %v2483_v44, %v2507_v46 }
 0x9a2   : > { %v2528_v11 = vmul.f32 1.442695, %v2514_v63  ;;  %v2530_v36 = vmul.f32 1.442695, %v2515_v16  ;;  %v4708_v63 = vld [vmem:[%s6782_s23] sm:$0xff]   ;;  %s6786_s23 = sld [smem:[#allocation13_spill]] (!%p4248_p6) }
 0x9a4   : > { %4851 = vpow2.f32 %v2528_v11 }
 0x9a5   : > { %v5961_v5 = vpop.eup %4843  ;;  %4853 = vpow2.f32 %v2524_v59 }
 0x9a6   : > { %v2538_v57 = vsel %vm1561_vm4, %v5961_v5, 0.0  ;;  %v4846_v56 = vpop.eup %4845  ;;  %4855 = vpow2.f32 %v2530_v36 }
 0x9a7   : > { %2539 = vadd.xlane.f32.xlu0 %v2538_v57  ;;  %v2532_v9 = vsel %vm1561_vm4, %v4846_v56, 0.0 }
 0x9a9   : > { %v5965_v1 = vpop.eup %4847 }
 0x9aa   : > { %v2541_v6 = vsel %vm1561_vm4, %v5965_v1, 0.0  ;;  %v4850_v15 = vpop.eup %4849 }
 0x9ab   : > { %2533 = vadd.xlane.f32.xlu0 %v2532_v9  ;;  %2542 = vadd.xlane.f32.xlu1 %v2541_v6  ;;  %v2535_v42 = vsel %vm1561_vm4, %v4850_v15, 0.0 }
 0x9af   : > { %2536 = vadd.xlane.f32.xlu1 %v2535_v42 }
 0x9b1   : > { %v5971_v20 = vpop.eup %4851 }
 0x9b2   : > { %v2550_v50 = vsel %vm1561_vm4, %v5971_v20, 0.0  ;;  %v5975_v0 = vpop.eup %4853 }
 0x9b3   : > { %2551 = vadd.xlane.f32.xlu0 %v2550_v50  ;;  %v2544_v45 = vsel %vm1561_vm4, %v5975_v0, 0.0 }
 0x9b7   : > { %2545 = vadd.xlane.f32.xlu0 %v2544_v45 }
 0x9c0   : > { %2580 = vrot.lane.b32.xlu1 %v5777_v54, %s5015_s22  ;;  %v4856_v54 = vpop.eup %4855 }
 0x9c4   : > { %2578 = vrot.lane.b32.xlu1 %v5592_v18, %s5015_s22  ;;  %v2526_v18 = vmul.f32 1.442695, %v2513_v4 }
 0x9c6   : > { %4857 = vpow2.f32 %v2526_v18 }
 0x9cd   : > { %2582 = vrot.lane.b32.xlu0 %v5606_v29, %s5015_s22  ;;  %v2553_v29 = vsel %vm1561_vm4, %v4856_v54, 0.0 }
 0x9d1   : > { %4666 = vrot.lane.b32.xlu0 %v4665_v24, %s5016_s25 }
 0x9d3   : > { %v4858_v44 = vpop.eup %4857 }
 0x9d4   : > { %v2547_v40 = vsel %vm1561_vm4, %v4858_v44, 0.0 }
 0x9d5   : > { %4676 = vrot.lane.b32.xlu0 %v4675_v55, %s5016_s25 }
 0x9e8   : > { %2554 = vadd.xlane.f32.xlu1 %v2553_v29 }
 0x9ec   : > { %2548 = vadd.xlane.f32.xlu1 %v2547_v40 }
 0x9fd   : > { %2576 = vrot.lane.b32.xlu1 %v5595_v49, %s5015_s22 }
 0xa01   : > { %4671 = vrot.lane.b32.xlu1 %v4670_v19, %s5016_s25 }
 0xa05   : > { %4681 = vrot.lane.b32.xlu1 %v4680_v21, %s5016_s25 }
 0xa30   : > { %v2540_v62 = vpop.xlane.xlu0 %2539 }
 0xa34   : > { %v2534_v23 = vpop.xlane.xlu0 %2533  ;;  %v2543_v24 = vpop.xlane.xlu1 %2542 }
 0xa35   : > { %4859 = vrcp.f32 %v2534_v23 }
 0xa38   : > { %v2537_v28 = vpop.xlane.xlu1 %2536 }
 0xa39   : > { %4861 = vrcp.f32 %v2537_v28 }
 0xa3a   : > { %4863 = vrcp.f32 %v2543_v24 }
 0xa3b   : > { %4865 = vrcp.f32 %v2540_v62 }
 0xa3c   : > { %v2552_v32 = vpop.xlane.xlu0 %2551  ;;  %v2581_v49 = vpop.permute.xlu1 %2580 }
 0xa40   : > { %v2546_v55 = vpop.xlane.xlu0 %2545  ;;  %v2579_v25 = vpop.permute.xlu1 %2578 }
 0xa42   : > { %v4860_v52 = vpop.eup %4859 }
 0xa43   : > { %v2564_v38 = vmul.f32 %v4860_v52, %v4846_v56 }
 0xa44   : > { %v2583_v33 = vpop.permute.xlu0 %2582 }
 0xa45   : > { %4530 = vmatprep.subr.bf16.mxu0 %v2583_v33 }
 0xa46   : > { %v4862_v47 = vpop.eup %4861  ;;  %4531 = vmatpush3.bf16.msra.mxu0 %v2583_v33 }
 0xa47   : > { %4532 = vmatprep.subr.bf16.mxu0 %v2581_v49  ;;  %v2565_v39 = vmul.f32 %v4862_v47, %v4850_v15  ;;  %v4864_v21 = vpop.eup %4863 }
 0xa48   : > { %v4866_v2 = vpop.eup %4865  ;;  %v2567_v43 = vmul.f32 %v4864_v21, %v5965_v1  ;;  %v4667_v59 = vpop.permute.xlu0 %4666 }
 0xa49   : > { %v2572_v19 = vpack.c.bf16 %v2565_v39, %v2564_v38  ;;  %v2566_v14 = vmul.f32 %v4866_v2, %v5961_v5  ;;  %v4669_v56 = vunpack.i.h.bf16 %v4667_v59  ;;  %v4668_v9 = vunpack.i.l.bf16 %v4667_v59  ;;  %v4940_v59 = vld [vmem:[#allocation2 + $0x8] sm:$0xff] }
 0xa4a   : > { %4533 = vmatpush3.bf16.msra.mxu0 %v2581_v49 }
 0xa4b   : > { %4534 = vmatprep.subr.bf16.mxu0 %v2579_v25  ;;  %4538 = vmatprep.mubr.msk.bf16.mxu0 %vm1561_vm4, %v2572_v19  ;;  %v2573_v37 = vpack.c.bf16 %v2567_v43, %v2566_v14  ;;  %v2070_v50 = vsel %vm1463_vm3, %v5836_v7, %v4669_v56  ;;  %v2069_v45 = vsel %vm1463_vm3, %v5832_v41, %v4668_v9 }
 0xa4c   : > { %v4677_v16 = vpop.permute.xlu0 %4676  ;;  %v2709_v18 = vpack.c.bf16 %v2070_v50, %v2069_v45  ;;  %v4943_v50 = vld [vmem:[#allocation2 + $0x18] sm:$0xff] }
 0xa4e   : > { %4535 = vmatpush3.bf16.msra.mxu0 %v2579_v25 }
 0xa71   : > { %v2555_v26 = vpop.xlane.xlu1 %2554 }
 0xa72   : > { %4867 = vrcp.f32 %v2555_v26 }
 0xa73   : > { %4869 = vrcp.f32 %v2546_v55 }
 0xa74   : > { %4871 = vrcp.f32 %v2552_v32 }
 0xa75   : > { %v2549_v8 = vpop.xlane.xlu1 %2548 }
 0xa76   : > { %4873 = vrcp.f32 %v2549_v8 }
 0xa79   : > { %v2577_v34 = vpop.permute.xlu1 %2576 }
 0xa7a   : > { %4536 = vmatprep.subr.bf16.mxu0 %v2577_v34 }
 0xa7b   : > { %4537 = vmatpush3.bf16.msra.mxu0 %v2577_v34  ;;  %v4939_v34 = vld [vmem:[#allocation2] sm:$0xff] }
 0xa7c   : > { %4546 = vmatprep.subr.bf16.mxu0 %v4707_v58 }
 0xa7d   : > { %v4672_v31 = vpop.permute.xlu1 %4671 }
 0xa7e   : > { %4539 = vmatmul.mubr.msk.bf16.vlgmr.msra.gmra.mxu0 %vm1561_vm4, %v2573_v37  ;;  %v4674_v29 = vunpack.i.h.bf16 %v4672_v31  ;;  %v4673_v40 = vunpack.i.l.bf16 %v4672_v31 }
 0xa7f   : > { %4547 = vmatpush3.bf16.msra.mxu0 %v4707_v58  ;;  %v4868_v11 = vpop.eup %4867 }
 0xa80   : > { %4548 = vmatprep.subr.bf16.mxu0 %v4708_v63  ;;  %v4870_v57 = vpop.eup %4869  ;;  %v2571_v15 = vmul.f32 %v4868_v11, %v4856_v54  ;;  %v4679_v54 = vunpack.i.h.bf16 %v4677_v16  ;;  %v2072_v41 = vsel %vm1463_vm3, %v5834_v3, %v4674_v29  ;;  %v2071_v7 = vsel %vm1463_vm3, %v5830_v30, %v4673_v40  ;;  %v4945_v29 = vld [vmem:[#allocation2 + $0x20] sm:$0xff] }
 0xa81   : > { %v4872_v6 = vpop.eup %4871  ;;  %v2568_v5 = vmul.f32 %v4870_v57, %v5975_v0  ;;  %v4678_v0 = vunpack.i.l.bf16 %v4677_v16  ;;  %v4682_v62 = vpop.permute.xlu1 %4681  ;;  %v2710_v23 = vpack.c.bf16 %v2072_v41, %v2071_v7  ;;  %v4941_v57 = vld [vmem:[#allocation2 + $0x10] sm:$0xff] }
 0xa82   : > { %v2570_v46 = vmul.f32 %v4872_v6, %v5971_v20  ;;  %v2074_v20 = vsel %vm1463_vm3, %v5844_v61, %v4679_v54  ;;  %v4684_v28 = vunpack.i.h.bf16 %v4682_v62  ;;  %v4683_v32 = vunpack.i.l.bf16 %v4682_v62  ;;  %v4946_v7 = vld [vmem:[#allocation2 + $0x30] sm:$0xff] }
 0xa83   : > { %v4874_v1 = vpop.eup %4873  ;;  %4549 = vmatpush3.bf16.msra.mxu0 %v4708_v63  ;;  %v6045_v63 = vld [vmem:[%s6783_s28] ss:$0 sm:$0xff]  ;;  %s6787_s28 = sld [smem:[#allocation14_spill]] (!%p4248_p6) }
 0xa84   : > { %v2569_v42 = vmul.f32 %v4874_v1, %v4858_v44  ;;  %v2575_v36 = vpack.c.bf16 %v2571_v15, %v2570_v46  ;;  %v2073_v44 = vsel %vm1463_vm3, %v5840_v13, %v4678_v0  ;;  %v2076_v3 = vsel %vm1463_vm3, %v5842_v17, %v4684_v28  ;;  %v4942_v15 = vld [vmem:[#allocation2 + $0x28] sm:$0xff]  ;;  %v4944_v46 = vld [vmem:[#allocation2 + $0x38] sm:$0xff] }
 0xa85   : > { %v2711_v24 = vpack.c.bf16 %v2074_v20, %v2073_v44  ;;  %v2075_v30 = vsel %vm1463_vm3, %v5838_v12, %v4683_v32 }
 0xa86   : > { %v2574_v4 = vpack.c.bf16 %v2569_v42, %v2568_v5  ;;  %v2712_v55 = vpack.c.bf16 %v2076_v3, %v2075_v30 }
 0xa88   : > { %4542 = vmatprep.mubr.msk.bf16.mxu0 %vm1561_vm4, %v2574_v4 }
 0xa89   : > { %4543 = vmatmul.mubr.msk.bf16.gmra.mxu0 %vm1561_vm4, %v2575_v36 }
 0xa8a   : > { %4550 = vmatprep.mubr.msk.bf16.mxu0 %vm1041_vm2, %v2709_v18 }
 0xa91   : > { %4551 = vmatmul.mubr.msk.bf16.vlgmr.msra.gmra.mxu0 %vm1041_vm2, %v2710_v23 }
 0xa92   : > { %4554 = vmatprep.mubr.msk.bf16.mxu0 %vm1041_vm2, %v2711_v24 }
 0xa99   : > { %4555 = vmatmul.mubr.msk.bf16.gmra.mxu0 %vm1041_vm2, %v2712_v55 }
 0xb3e   : > { %v4540_v61 = vpop.f32.mrf.mxu0 }
 0xb40   : > { %v2634_v13 = vpop.f32.mrf.mxu0 }
 0xb42   : > { %v4541_v52 = vpop.f32.mrf.mxu0 }
 0xb43   : > { %v4690_v49 = vpack.i.bf16 %v4541_v52, %v4540_v61 }
 0xb44   : > { %v2637_v33 = vpop.f32.mrf.mxu0 }
 0xb45   : > { %v4685_v47 = vpack.i.bf16 %v2637_v33, %v2634_v13  ;;  %4691 = vrot.lane.b32.xlu1 %v4690_v49, %s5016_s25 }
 0xb47   : > { %4686 = vrot.lane.b32.xlu0 %v4685_v47, %s5016_s25 }
 0xb49   : > { %v4544_v38 = vpop.f32.mrf.mxu0 }
 0xb4b   : > { %v2650_v39 = vpop.f32.mrf.mxu0 }
 0xb4d   : > { %v4545_v17 = vpop.f32.mrf.mxu0 }
 0xb4e   : > { %v4700_v19 = vpack.i.bf16 %v4545_v17, %v4544_v38 }
 0xb4f   : > { %v2653_v25 = vpop.f32.mrf.mxu0 }
 0xb50   : > { %v4695_v12 = vpack.i.bf16 %v2653_v25, %v2650_v39  ;;  %4701 = vrot.lane.b32.xlu1 %v4700_v19, %s5016_s25 }
 0xb51   : > { %v4552_v26 = vpop.f32.mrf.mxu0 }
 0xb52   : > { %4696 = vrot.lane.b32.xlu0 %v4695_v12, %s5016_s25  ;;  %v2852_v56 = vadd.f32 %v4941_v57, %v4552_v26 }
 0xb53   : > { %v2787_v21 = vpop.f32.mrf.mxu0 }
 0xb54   : > { %v2850_v14 = vadd.f32 %v4939_v34, %v2787_v21  ;;  %v6054_v42 = vadd.f32 %v6045_v63, %v2852_v56 }
 0xb55   : > { %v4553_v8 = vpop.f32.mrf.mxu0 }
 0xb56   : > { %v6048_v9 = vadd.f32 %v6045_v63, %v2850_v14  ;;  %v2853_v45 = vadd.f32 %v4943_v50, %v4553_v8  ;;  %v2897_v54 = vsel %vm1041_vm2, %v6054_v42, 0.0 }
 0xb57   : > { %v2790_v2 = vpop.f32.mrf.mxu0 }
 0xb58   : > { %v2851_v11 = vadd.f32 %v4940_v59, %v2790_v2  ;;  %v2891_v31 = vsel %vm1041_vm2, %v6048_v9, 0.0  ;;  %v6064_v18 = vadd.f32 %v6045_v63, %v2853_v45  ;;  %v4948_v59 = vld [vmem:[#allocation2 + $0x40] sm:$0xff] }
 0xb59   : > { %v4556_v43 = vpop.f32.mrf.mxu0 }
 0xb5a   : > { %v6051_v1 = vadd.f32 %v6045_v63, %v2851_v11  ;;  %v2856_v20 = vadd.f32 %v4946_v7, %v4556_v43  ;;  %v2900_v62 = vsel %vm1041_vm2, %v6064_v18, 0.0 }
 0xb5b   : > { %v2803_v58 = vpop.f32.mrf.mxu0 }
 0xb5c   : > { %v2894_v36 = vsel %vm1041_vm2, %v6051_v1, 0.0  ;;  %v2854_v40 = vadd.f32 %v4945_v29, %v2803_v58  ;;  %v6081_v24 = vadd.f32 %v6045_v63, %v2856_v20  ;;  %v4951_v20 = vld [vmem:[#allocation2 + $0x70] sm:$0xff] }
 0xb5d   : > { %v4557_v37 = vpop.f32.mrf.mxu0 }
 0xb5e   : > { %v2857_v16 = vadd.f32 %v4944_v46, %v4557_v37  ;;  %v6074_v44 = vadd.f32 %v6045_v63, %v2854_v40  ;;  %v2909_v32 = vsel %vm1041_vm2, %v6081_v24, 0.0  ;;  %v4947_v37 = vld [vmem:[#allocation2 + $0x50] sm:$0xff] }
 0xb5f   : > { %v2806_v6 = vpop.f32.mrf.mxu0 }
 0xb60   : > { %v2855_v5 = vadd.f32 %v4942_v15, %v2806_v6  ;;  %v6069_v0 = vadd.f32 %v6045_v63, %v2857_v16  ;;  %v2903_v28 = vsel %vm1041_vm2, %v6074_v44, 0.0  ;;  %v4949_v6 = vld [vmem:[#allocation2 + $0x58] sm:$0xff] }
 0xb62   : > { %v6059_v4 = vadd.f32 %v6045_v63, %v2855_v5  ;;  %v2912_v23 = vsel %vm1041_vm2, %v6069_v0, 0.0  ;;  %v4950_v5 = vld [vmem:[#allocation2 + $0x48] sm:$0xff] }
 0xb64   : > { %v2906_v41 = vsel %vm1041_vm2, %v6059_v4, 0.0 }
 0xb71   : > { %2892 = vadd.xlane.f32.xlu0 %v2891_v31 }
 0xb74   : > { %2895 = vadd.xlane.f32.xlu1 %v2894_v36 }
 0xb75   : > { %2898 = vadd.xlane.f32.xlu0 %v2897_v54 }
 0xb78   : > { %2907 = vadd.xlane.f32.xlu1 %v2906_v41 }
 0xb79   : > { %2901 = vadd.xlane.f32.xlu0 %v2900_v62 }
 0xb7c   : > { %2913 = vadd.xlane.f32.xlu1 %v2912_v23  ;;  %v4952_v23 = vld [vmem:[#allocation2 + $0x60] sm:$0xff] }
 0xb7d   : > { %2904 = vadd.xlane.f32.xlu0 %v2903_v28 }
 0xb81   : > { %2910 = vadd.xlane.f32.xlu0 %v2909_v32 }
 0xbb7   : > { %v4692_v3 = vpop.permute.xlu1 %4691 }
 0xbb8   : > { %v4694_v30 = vunpack.i.h.bf16 %v4692_v3  ;;  %v4693_v55 = vunpack.i.l.bf16 %v4692_v3 }
 0xbb9   : > { %v4687_v61 = vpop.permute.xlu0 %4686 }
 0xbba   : > { %v4689_v13 = vunpack.i.h.bf16 %v4687_v61  ;;  %v4688_v52 = vunpack.i.l.bf16 %v4687_v61  ;;  %v2700_v49 = vsel %vm1463_vm3, %v5938_v60, %v4694_v30  ;;  %v2699_v33 = vsel %vm1463_vm3, %v5934_v48, %v4693_v55 }
 0xbbb   : > { %v2714_v17 = vpack.c.bf16 %v2700_v49, %v2699_v33 }
 0xbbc   : > { %v2698_v47 = vsel %vm1463_vm3, %v5940_v35, %v4689_v13  ;;  %v2697_v38 = vsel %vm1463_vm3, %v5936_v51, %v4688_v52 }
 0xbbd   : > { %v2713_v39 = vpack.c.bf16 %v2698_v47, %v2697_v38  ;;  %v4953_v47 = vld [vmem:[#allocation2 + $0x78] sm:$0xff] }
 0xbbf   : > { %4558 = vmatprep.mubr.msk.bf16.mxu0 %vm1041_vm2, %v2713_v39  ;;  %v4954_v39 = vld [vmem:[#allocation2 + $0x68] sm:$0xff] }
 0xbc0   : > { %4559 = vmatmul.mubr.msk.bf16.gmra.mxu0 %vm1041_vm2, %v2714_v17 }
 0xbc2   : > { %v4702_v19 = vpop.permute.xlu1 %4701 }
 0xbc3   : > { %v4704_v25 = vunpack.i.h.bf16 %v4702_v19  ;;  %v4703_v12 = vunpack.i.l.bf16 %v4702_v19 }
 0xbc4   : > { %v4697_v26 = vpop.permute.xlu0 %4696 }
 0xbc5   : > { %v4699_v60 = vunpack.i.h.bf16 %v4697_v26  ;;  %v4698_v21 = vunpack.i.l.bf16 %v4697_v26  ;;  %v2704_v48 = vsel %vm1463_vm3, %v5946_v27, %v4704_v25  ;;  %v2703_v35 = vsel %vm1463_vm3, %v5942_v53, %v4703_v12 }
 0xbc6   : > { %v2716_v43 = vpack.c.bf16 %v2704_v48, %v2703_v35 }
 0xbc7   : > { %v2702_v51 = vsel %vm1463_vm3, %v5948_v22, %v4699_v60  ;;  %v2701_v8 = vsel %vm1463_vm3, %v5944_v10, %v4698_v21 }
 0xbc8   : > { %v2715_v2 = vpack.c.bf16 %v2702_v51, %v2701_v8 }
 0xbca   : > { %4562 = vmatprep.mubr.msk.bf16.mxu0 %vm1041_vm2, %v2715_v2 }
 0xbcb   : > { %4563 = vmatmul.mubr.msk.bf16.gmra.mxu0 %vm1041_vm2, %v2716_v43 }
 0xbfa   : > { %v2893_v58 = vpop.xlane.xlu0 %2892 }
 0xbfb   : > { %v2939_v54 = vmul.f32 0.03125, %v2893_v58 }
 0xbfd   : > { %v2896_v7 = vpop.xlane.xlu1 %2895  ;;  %v6131_v55 = vsub.f32 %v6048_v9, %v2939_v54 }
 0xbfe   : > { %v2899_v57 = vpop.xlane.xlu0 %2898  ;;  %v2940_v61 = vmul.f32 0.03125, %v2896_v7 }
 0xbff   : > { %v2941_v13 = vmul.f32 0.03125, %v2899_v57  ;;  %v2971_v48 = vmul.f32 %v6131_v55, %v6131_v55 }
 0xc00   : > { %v6142_v12 = vsub.f32 %v6051_v1, %v2940_v61 }
 0xc01   : > { %v6145_v26 = vsub.f32 %v6054_v42, %v2941_v13  ;;  %v2908_v60 = vpop.xlane.xlu1 %2907 }
 0xc02   : > { %v2902_v46 = vpop.xlane.xlu0 %2901  ;;  %v2944_v58 = vmul.f32 0.03125, %v2908_v60 }
 0xc03   : > { %v2942_v21 = vmul.f32 0.03125, %v2902_v46 }
 0xc04   : > { %v6170_v57 = vsub.f32 %v6059_v4, %v2944_v58 }
 0xc06   : > { %v2905_v52 = vpop.xlane.xlu0 %2904  ;;  %v2976_v46 = vmul.f32 %v6170_v57, %v6170_v57 }
 0xc07   : > { %v2943_v35 = vmul.f32 0.03125, %v2905_v52 }
 0xc08   : > { %v3002_v7 = vsel %vm1041_vm2, %v2976_v46, 0.0 }
 0xc0a   : > { %v2911_v43 = vpop.xlane.xlu0 %2910 }
 0xc80   : > { %v4560_v34 = vpop.f32.mrf.mxu0 }
 0xc81   : > { %v2860_v27 = vadd.f32 %v4947_v37, %v4560_v34  ;;  %v2987_v34 = vsel %vm1041_vm2, %v2971_v48, 0.0  ;;  %v2972_v37 = vmul.f32 %v6142_v12, %v6142_v12 }
 0xc82   : > { %v2819_v14 = vpop.f32.mrf.mxu0 }
 0xc83   : > { %v2858_v11 = vadd.f32 %v4948_v59, %v2819_v14  ;;  %v6111_v10 = vadd.f32 %v6045_v63, %v2860_v27  ;;  %v2973_v14 = vmul.f32 %v6145_v26, %v6145_v26  ;;  %v6165_v27 = vsub.f32 %v6074_v44, %v2943_v35 }
 0xc84   : > { %v4561_v53 = vpop.f32.mrf.mxu0  ;;  %v2945_v59 = vmul.f32 0.03125, %v2911_v43 }
 0xc85   : > { %v6108_v22 = vadd.f32 %v6045_v63, %v2858_v11  ;;  %v2861_v15 = vadd.f32 %v4949_v6, %v4561_v53  ;;  %v2921_v29 = vsel %vm1041_vm2, %v6111_v10, 0.0  ;;  %v2914_v53 = vpop.xlane.xlu1 %2913  ;;  %v2990_v6 = vsel %vm1041_vm2, %v2972_v37, 0.0 }
 0xc86   : > { %v2822_v56 = vpop.f32.mrf.mxu0 }
 0xc87   : > { %v2859_v50 = vadd.f32 %v4950_v5, %v2822_v56  ;;  %v2915_v45 = vsel %vm1041_vm2, %v6108_v22, 0.0  ;;  %v6119_v16 = vadd.f32 %v6045_v63, %v2861_v15  ;;  %v2993_v56 = vsel %vm1041_vm2, %v2973_v14, 0.0 }
 0xc88   : > { %2916 = vadd.xlane.f32.xlu0 %v2915_v45  ;;  %v2946_v15 = vmul.f32 0.03125, %v2914_v53  ;;  %v6175_v5 = vsub.f32 %v6081_v24, %v2945_v59 }
 0xc89   : > { %v6116_v31 = vadd.f32 %v6045_v63, %v2859_v50  ;;  %v2924_v3 = vsel %vm1041_vm2, %v6119_v16, 0.0  ;;  %v2975_v50 = vmul.f32 %v6165_v27, %v6165_v27 }
 0xc8a   : > { %v2977_v54 = vmul.f32 %v6175_v5, %v6175_v5 }
 0xc8b   : > { %v4564_v36 = vpop.f32.mrf.mxu0  ;;  %v2918_v40 = vsel %vm1041_vm2, %v6116_v31, 0.0 }
 0xc8c   : > { %2922 = vadd.xlane.f32.xlu0 %v2921_v29  ;;  %2919 = vadd.xlane.f32.xlu1 %v2918_v40  ;;  %v2864_v62 = vadd.f32 %v4951_v20, %v4564_v36  ;;  %v6184_v36 = vsub.f32 %v6069_v0, %v2946_v15  ;;  %v2999_v29 = vsel %vm1041_vm2, %v2975_v50, 0.0 }
 0xc8d   : > { %v2835_v41 = vpop.f32.mrf.mxu0 }
 0xc8e   : > { %v2862_v28 = vadd.f32 %v4952_v23, %v2835_v41  ;;  %v6134_v33 = vadd.f32 %v6045_v63, %v2864_v62  ;;  %v3005_v41 = vsel %vm1041_vm2, %v2977_v54, 0.0  ;;  %v2978_v20 = vmul.f32 %v6184_v36, %v6184_v36  ;;  %v4709_v23 = vld [vmem:[%s5174_s6 + $0x8] sm:$0xff]  }
 0xc8f   : > { %v4565_v32 = vpop.f32.mrf.mxu0  ;;  %4566 = vmatprep.subr.bf16.mxu1 %v4709_v23 }
 0xc90   : > { %v6128_v30 = vadd.f32 %v6045_v63, %v2862_v28  ;;  %2925 = vadd.xlane.f32.xlu1 %v2924_v3  ;;  %v2865_v38 = vadd.f32 %v4953_v47, %v4565_v32  ;;  %v2933_v8 = vsel %vm1041_vm2, %v6134_v33, 0.0  ;;  %v3008_v62 = vsel %vm1041_vm2, %v2978_v20, 0.0  ;;  %4567 = vmatpush3.bf16.msra.mxu1 %v4709_v23  ;;  %v4710_v28 = vld [vmem:[%s5174_s6] sm:$0xff]   ;;  %s6788_s6 = smov (!%p4248_p6), %s6787_s28 }
 0xc91   : > { %v2838_v49 = vpop.f32.mrf.mxu0  ;;  %4568 = vmatprep.subr.bf16.mxu1 %v4710_v28 }
 0xc92   : > { %v2863_v17 = vadd.f32 %v4954_v39, %v2838_v49  ;;  %v2927_v19 = vsel %vm1041_vm2, %v6128_v30, 0.0  ;;  %v6150_v51 = vadd.f32 %v6045_v63, %v2865_v38 }
 0xc93   : > { %2928 = vadd.xlane.f32.xlu0 %v2927_v19 }
 0xc94   : > { %v6139_v25 = vadd.f32 %v6045_v63, %v2863_v17  ;;  %v6162_v63 = vsub.f32 %v6064_v18, %v2942_v21  ;;  %v2936_v11 = vsel %vm1041_vm2, %v6150_v51, 0.0  ;;  %4569 = vmatpush3.bf16.msra.mxu1 %v4710_v28 }
 0xc96   : > { %v2930_v2 = vsel %vm1041_vm2, %v6139_v25, 0.0  ;;  %v2974_v45 = vmul.f32 %v6162_v63, %v6162_v63 }
 0xc97   : > { %2934 = vadd.xlane.f32.xlu0 %v2933_v8  ;;  %2931 = vadd.xlane.f32.xlu1 %v2930_v2 }
 0xc98   : > { %v2996_v40 = vsel %vm1041_vm2, %v2974_v45, 0.0 }
 0xc9b   : > { %2988 = vadd.xlane.f32.xlu0 %v2987_v34  ;;  %2937 = vadd.xlane.f32.xlu1 %v2936_v11 }
 0xc9f   : > { %2994 = vadd.xlane.f32.xlu0 %v2993_v56  ;;  %2991 = vadd.xlane.f32.xlu1 %v2990_v6 }
 0xca3   : > { %3000 = vadd.xlane.f32.xlu0 %v2999_v29  ;;  %2997 = vadd.xlane.f32.xlu1 %v2996_v40 }
 0xca7   : > { %3006 = vadd.xlane.f32.xlu0 %v3005_v41  ;;  %3003 = vadd.xlane.f32.xlu1 %v3002_v7 }
 0xcab   : > { %3009 = vadd.xlane.f32.xlu1 %v3008_v62 }
 0xd11   : > { %v2917_v32 = vpop.xlane.xlu0 %2916 }
 0xd12   : > { %v2947_v3 = vmul.f32 0.03125, %v2917_v32 }
 0xd14   : > { %v6198_v61 = vsub.f32 %v6108_v22, %v2947_v3 }
 0xd15   : > { %v2923_v13 = vpop.xlane.xlu0 %2922  ;;  %v2920_v52 = vpop.xlane.xlu1 %2919 }
 0xd16   : > { %v2949_v49 = vmul.f32 0.03125, %v2923_v13  ;;  %v2948_v47 = vmul.f32 0.03125, %v2920_v52  ;;  %v2979_v38 = vmul.f32 %v6198_v61, %v6198_v61 }
 0xd18   : > { %v6203_v39 = vsub.f32 %v6111_v10, %v2949_v49  ;;  %v6206_v17 = vsub.f32 %v6116_v31, %v2948_v47  ;;  %v3011_v19 = vsel %vm1041_vm2, %v2979_v38, 0.0 }
 0xd19   : > { %v2926_v60 = vpop.xlane.xlu1 %2925  ;;  %3012 = vadd.xlane.f32.xlu0 %v3011_v19 }
 0xd1a   : > { %v2950_v21 = vmul.f32 0.03125, %v2926_v60  ;;  %v2981_v48 = vmul.f32 %v6203_v39, %v6203_v39  ;;  %v2980_v35 = vmul.f32 %v6206_v17, %v6206_v17 }
 0xd1c   : > { %v6214_v8 = vsub.f32 %v6119_v16, %v2950_v21  ;;  %v2929_v2 = vpop.xlane.xlu0 %2928  ;;  %v3017_v43 = vsel %vm1041_vm2, %v2981_v48, 0.0  ;;  %v3014_v58 = vsel %vm1041_vm2, %v2980_v35, 0.0 }
 0xd1d   : > { %v2951_v34 = vmul.f32 0.03125, %v2929_v2  ;;  %3018 = vadd.xlane.f32.xlu0 %v3017_v43  ;;  %3015 = vadd.xlane.f32.xlu1 %v3014_v58 }
 0xd1e   : > { %v2982_v14 = vmul.f32 %v6214_v8, %v6214_v8 }
 0xd1f   : > { %v6221_v37 = vsub.f32 %v6128_v30, %v2951_v34 }
 0xd20   : > { %v2935_v59 = vpop.xlane.xlu0 %2934  ;;  %v2932_v11 = vpop.xlane.xlu1 %2931  ;;  %v3020_v53 = vsel %vm1041_vm2, %v2982_v14, 0.0 }
 0xd21   : > { %v2953_v56 = vmul.f32 0.03125, %v2935_v59  ;;  %v2952_v6 = vmul.f32 0.03125, %v2932_v11  ;;  %3021 = vadd.xlane.f32.xlu1 %v3020_v53  ;;  %v2983_v15 = vmul.f32 %v6221_v37, %v6221_v37 }
 0xd23   : > { %v6227_v50 = vsub.f32 %v6134_v33, %v2953_v56  ;;  %v6230_v45 = vsub.f32 %v6139_v25, %v2952_v6  ;;  %v3023_v46 = vsel %vm1041_vm2, %v2983_v15, 0.0 }
 0xd24   : > { %3024 = vadd.xlane.f32.xlu0 %v3023_v46  ;;  %v2989_v29 = vpop.xlane.xlu0 %2988  ;;  %v2938_v40 = vpop.xlane.xlu1 %2937 }
 0xd25   : > { %v3035_v54 = vmul.f32 0.03125, %v2989_v29  ;;  %v2954_v41 = vmul.f32 0.03125, %v2938_v40  ;;  %v2985_v7 = vmul.f32 %v6227_v50, %v6227_v50  ;;  %v2984_v20 = vmul.f32 %v6230_v45, %v6230_v45 }
 0xd27   : > { %v3051_v62 = vadd.f32 1e-05, %v3035_v54  ;;  %v6238_v23 = vsub.f32 %v6150_v51, %v2954_v41  ;;  %v3029_v28 = vsel %vm1041_vm2, %v2985_v7, 0.0  ;;  %v3026_v32 = vsel %vm1041_vm2, %v2984_v20, 0.0  ;;  %v6251_v54 = vld [vmem:[%s759_s16] ss:$0 sm:$0xff] }
 0xd28   : > { %3030 = vadd.xlane.f32.xlu0 %v3029_v28  ;;  %v2995_v3 = vpop.xlane.xlu0 %2994  ;;  %3027 = vadd.xlane.f32.xlu1 %v3026_v32  ;;  %v2992_v13 = vpop.xlane.xlu1 %2991  ;;  %v6260_v28 = vld [vmem:[%s762_s26] ss:$0 sm:$0xff] }
 0xd29   : > { %4875 = vrsqrt.f32 %v3051_v62  ;;  %v3037_v52 = vmul.f32 0.03125, %v2995_v3  ;;  %v3036_v49 = vmul.f32 0.03125, %v2992_v13  ;;  %v2986_v47 = vmul.f32 %v6238_v23, %v6238_v23 }
 0xd2b   : > { %v3053_v38 = vadd.f32 1e-05, %v3037_v52  ;;  %v3052_v19 = vadd.f32 1e-05, %v3036_v49  ;;  %v3032_v60 = vsel %vm1041_vm2, %v2986_v47, 0.0 }
 0xd2c   : > { %v3001_v21 = vpop.xlane.xlu0 %3000  ;;  %3033 = vadd.xlane.f32.xlu1 %v3032_v60  ;;  %v2998_v48 = vpop.xlane.xlu1 %2997 }
 0xd2d   : > { %4877 = vrsqrt.f32 %v3053_v38  ;;  %v3039_v35 = vmul.f32 0.03125, %v3001_v21  ;;  %v3038_v2 = vmul.f32 0.03125, %v2998_v48 }
 0xd2e   : > { %4879 = vrsqrt.f32 %v3052_v19 }
 0xd2f   : > { %v3055_v43 = vadd.f32 1e-05, %v3039_v35  ;;  %v3054_v58 = vadd.f32 1e-05, %v3038_v2 }
 0xd30   : > { %v3007_v34 = vpop.xlane.xlu0 %3006  ;;  %v3004_v14 = vpop.xlane.xlu1 %3003 }
 0xd31   : > { %4881 = vrsqrt.f32 %v3055_v43  ;;  %v3041_v59 = vmul.f32 0.03125, %v3007_v34  ;;  %v3040_v11 = vmul.f32 0.03125, %v3004_v14 }
 0xd32   : > { %4883 = vrsqrt.f32 %v3054_v58 }
 0xd33   : > { %v3057_v53 = vadd.f32 1e-05, %v3041_v59  ;;  %v3056_v56 = vadd.f32 1e-05, %v3040_v11 }
 0xd34   : > { %v3010_v6 = vpop.xlane.xlu1 %3009 }
 0xd35   : > { %4885 = vrsqrt.f32 %v3057_v53  ;;  %v3042_v15 = vmul.f32 0.03125, %v3010_v6 }
 0xd36   : > { %v4876_v46 = vpop.eup %4875  ;;  %4887 = vrsqrt.f32 %v3056_v56 }
 0xd37   : > { %v3058_v29 = vadd.f32 1e-05, %v3042_v15  ;;  %v3083_v40 = vmul.f32 %v4876_v46, %v6131_v55 }
 0xd39   : > { %4889 = vrsqrt.f32 %v3058_v29  ;;  %v3105_v20 = vmul.f32 %v6251_v54, %v3083_v40 }
 0xd3a   : > { %v4878_v41 = vpop.eup %4877 }
 0xd3b   : > { %v4880_v7 = vpop.eup %4879  ;;  %v3085_v62 = vmul.f32 %v4878_v41, %v6145_v26  ;;  %v3127_v52 = vadd.f32 %v6260_v28, %v3105_v20  ;;  %v4712_v41 = vld [vmem:[%s5184_s21 + $0x10] sm:$0xff]  }
 0xd3c   : > { %v3084_v55 = vmul.f32 %v4880_v7, %v6142_v12 }
 0xd3d   : > { %v3107_v49 = vmul.f32 %v6251_v54, %v3085_v62 }
 0xd3e   : > { %v4882_v32 = vpop.eup %4881  ;;  %v3106_v3 = vmul.f32 %v6251_v54, %v3084_v55 }
 0xd3f   : > { %v4884_v13 = vpop.eup %4883  ;;  %v3087_v38 = vmul.f32 %v4882_v32, %v6165_v27  ;;  %v3129_v35 = vadd.f32 %v6260_v28, %v3107_v49 }
 0xd40   : > { %v3086_v47 = vmul.f32 %v4884_v13, %v6162_v63  ;;  %v3128_v26 = vadd.f32 %v6260_v28, %v3106_v3  ;;  %v4713_v13 = vld [vmem:[%s5184_s21 + $0x8] sm:$0xff]  }
 0xd41   : > { %v3109_v63 = vmul.f32 %v6251_v54, %v3087_v38  ;;  %v4714_v38 = vld [vmem:[%s5184_s21] sm:$0xff]  }
 0xd42   : > { %v4886_v19 = vpop.eup %4885  ;;  %v3108_v60 = vmul.f32 %v6251_v54, %v3086_v47  ;;  %v3147_v21 = vpack.c.bf16 %v3128_v26, %v3127_v52 }
 0xd43   : > { %v4888_v48 = vpop.eup %4887  ;;  %v3089_v12 = vmul.f32 %v4886_v19, %v6175_v5  ;;  %v3131_v5 = vadd.f32 %v6260_v28, %v3109_v63 }
 0xd44   : > { %4570 = vmatprep.mubr.msk.bf16.mxu1 %vm1041_vm2, %v3147_v21  ;;  %v3130_v2 = vadd.f32 %v6260_v28, %v3108_v60  ;;  %v3088_v43 = vmul.f32 %v4888_v48, %v6170_v57 }
 0xd45   : > { %v3111_v59 = vmul.f32 %v6251_v54, %v3089_v12 }
 0xd46   : > { %v4890_v58 = vpop.eup %4889  ;;  %v3148_v27 = vpack.c.bf16 %v3130_v2, %v3129_v35  ;;  %v3110_v34 = vmul.f32 %v6251_v54, %v3088_v43 }
 0xd47   : > { %v3090_v14 = vmul.f32 %v4890_v58, %v6184_v36  ;;  %v3133_v56 = vadd.f32 %v6260_v28, %v3111_v59  ;;  %v4711_v36 = vld [vmem:[%s5184_s21 + $0x18] sm:$0xff]  }
 0xd48   : > { %4571 = vmatmul.mubr.msk.bf16.vlgmr.msra.gmra.mxu1 %vm1041_vm2, %v3148_v27  ;;  %v3132_v11 = vadd.f32 %v6260_v28, %v3110_v34  ;;  %4586 = vmatprep.subr.bf16.mxu0 %v4711_v36 }
 0xd49   : > { %v3112_v57 = vmul.f32 %v6251_v54, %v3090_v14  ;;  %4587 = vmatpush3.bf16.msra.mxu0 %v4711_v36 }
 0xd4a   : > { %v3149_v53 = vpack.c.bf16 %v3132_v11, %v3131_v5  ;;  %4588 = vmatprep.subr.bf16.mxu0 %v4712_v41 }
 0xd4b   : > { %v3134_v6 = vadd.f32 %v6260_v28, %v3112_v57 }
 0xd4c   : > { %4574 = vmatprep.mubr.msk.bf16.mxu1 %vm1041_vm2, %v3149_v53 }
 0xd4d   : > { %v3150_v15 = vpack.c.bf16 %v3134_v6, %v3133_v56  ;;  %4589 = vmatpush3.bf16.msra.mxu0 %v4712_v41 }
 0xd4e   : > { %4590 = vmatprep.subr.bf16.mxu0 %v4713_v13 }
 0xd50   : > { %4575 = vmatmul.mubr.msk.bf16.gmra.mxu1 %vm1041_vm2, %v3150_v15 }
 0xd51   : > { %4591 = vmatpush3.bf16.msra.mxu0 %v4713_v13 }
 0xd52   : > { %4592 = vmatprep.subr.bf16.mxu0 %v4714_v38 }
 0xd55   : > { %4593 = vmatpush3.bf16.msra.mxu0 %v4714_v38 }
 0xda2   : > { %v3013_v46 = vpop.xlane.xlu0 %3012 }
 0xda3   : > { %v3043_v29 = vmul.f32 0.03125, %v3013_v46 }
 0xda5   : > { %v3059_v40 = vadd.f32 1e-05, %v3043_v29 }
 0xda6   : > { %v3019_v7 = vpop.xlane.xlu0 %3018  ;;  %v3016_v20 = vpop.xlane.xlu1 %3015 }
 0xda7   : > { %4891 = vrsqrt.f32 %v3059_v40  ;;  %v3045_v62 = vmul.f32 0.03125, %v3019_v7  ;;  %v3044_v55 = vmul.f32 0.03125, %v3016_v20 }
 0xda9   : > { %v3061_v32 = vadd.f32 1e-05, %v3045_v62  ;;  %v3060_v3 = vadd.f32 1e-05, %v3044_v55 }
 0xdaa   : > { %v3022_v52 = vpop.xlane.xlu1 %3021 }
 0xdab   : > { %4893 = vrsqrt.f32 %v3061_v32  ;;  %v3046_v49 = vmul.f32 0.03125, %v3022_v52 }
 0xdac   : > { %4895 = vrsqrt.f32 %v3060_v3 }
 0xdad   : > { %v3062_v47 = vadd.f32 1e-05, %v3046_v49  ;;  %v3025_v26 = vpop.xlane.xlu0 %3024 }
 0xdae   : > { %v3047_v19 = vmul.f32 0.03125, %v3025_v26 }
 0xdaf   : > { %4897 = vrsqrt.f32 %v3062_v47 }
 0xdb0   : > { %v3063_v60 = vadd.f32 1e-05, %v3047_v19 }
 0xdb1   : > { %v3031_v21 = vpop.xlane.xlu0 %3030  ;;  %v3028_v48 = vpop.xlane.xlu1 %3027 }
 0xdb2   : > { %4899 = vrsqrt.f32 %v3063_v60  ;;  %v3049_v12 = vmul.f32 0.03125, %v3031_v21  ;;  %v3048_v35 = vmul.f32 0.03125, %v3028_v48 }
 0xdb4   : > { %v4892_v2 = vpop.eup %4891  ;;  %v3065_v43 = vadd.f32 1e-05, %v3049_v12  ;;  %v3064_v63 = vadd.f32 1e-05, %v3048_v35 }
 0xdb5   : > { %v3034_v58 = vpop.xlane.xlu1 %3033  ;;  %v3091_v34 = vmul.f32 %v4892_v2, %v6198_v61 }
 0xdb6   : > { %4901 = vrsqrt.f32 %v3065_v43  ;;  %v3050_v27 = vmul.f32 0.03125, %v3034_v58 }
 0xdb7   : > { %4903 = vrsqrt.f32 %v3064_v63  ;;  %v3113_v53 = vmul.f32 %v6251_v54, %v3091_v34 }
 0xdb8   : > { %v4894_v14 = vpop.eup %4893  ;;  %v3066_v59 = vadd.f32 1e-05, %v3050_v27 }
 0xdb9   : > { %v4896_v5 = vpop.eup %4895  ;;  %v3093_v11 = vmul.f32 %v4894_v14, %v6203_v39  ;;  %v3135_v61 = vadd.f32 %v6260_v28, %v3113_v53 }
 0xdba   : > { %4905 = vrsqrt.f32 %v3066_v59  ;;  %v3092_v57 = vmul.f32 %v4896_v5, %v6206_v17 }
 0xdbb   : > { %v3115_v36 = vmul.f32 %v6251_v54, %v3093_v11 }
 0xdbc   : > { %v4898_v56 = vpop.eup %4897  ;;  %v3114_v6 = vmul.f32 %v6251_v54, %v3092_v57 }
 0xdbd   : > { %v3094_v15 = vmul.f32 %v4898_v56, %v6214_v8  ;;  %v3137_v41 = vadd.f32 %v6260_v28, %v3115_v36 }
 0xdbe   : > { %v3136_v46 = vadd.f32 %v6260_v28, %v3114_v6 }
 0xdbf   : > { %v4900_v29 = vpop.eup %4899  ;;  %v3116_v40 = vmul.f32 %v6251_v54, %v3094_v15 }
 0xdc0   : > { %v3151_v39 = vpack.c.bf16 %v3136_v46, %v3135_v61  ;;  %v3095_v7 = vmul.f32 %v4900_v29, %v6221_v37 }
 0xdc1   : > { %v3138_v17 = vadd.f32 %v6260_v28, %v3116_v40 }
 0xdc2   : > { %4578 = vmatprep.mubr.msk.bf16.mxu1 %vm1041_vm2, %v3151_v39  ;;  %v3117_v3 = vmul.f32 %v6251_v54, %v3095_v7 }
 0xdc3   : > { %v4902_v20 = vpop.eup %4901  ;;  %v3152_v8 = vpack.c.bf16 %v3138_v17, %v3137_v41 }
 0xdc4   : > { %v4904_v62 = vpop.eup %4903  ;;  %v3097_v55 = vmul.f32 %v4902_v20, %v6227_v50  ;;  %v3139_v47 = vadd.f32 %v6260_v28, %v3117_v3 }
 0xdc5   : > { %4579 = vmatmul.mubr.msk.bf16.gmra.mxu1 %vm1041_vm2, %v3152_v8  ;;  %v3096_v32 = vmul.f32 %v4904_v62, %v6230_v45 }
 0xdc6   : > { %v3119_v37 = vmul.f32 %v6251_v54, %v3097_v55 }
 0xdc7   : > { %v4906_v13 = vpop.eup %4905  ;;  %v3118_v52 = vmul.f32 %v6251_v54, %v3096_v32 }
 0xdc8   : > { %v3098_v49 = vmul.f32 %v4906_v13, %v6238_v23  ;;  %v3141_v19 = vadd.f32 %v6260_v28, %v3119_v37  ;;  %v6324_v23 = vld [vmem:[%s770_s8] ss:$0 sm:$0xff] }
 0xdc9   : > { %v3140_v26 = vadd.f32 %v6260_v28, %v3118_v52 }
 0xdca   : > { %v3120_v50 = vmul.f32 %v6251_v54, %v3098_v49 }
 0xdcb   : > { %v3153_v38 = vpack.c.bf16 %v3140_v26, %v3139_v47 }
 0xdcc   : > { %v3142_v45 = vadd.f32 %v6260_v28, %v3120_v50 }
 0xdcd   : > { %4582 = vmatprep.mubr.msk.bf16.mxu1 %vm1041_vm2, %v3153_v38 }
 0xdce   : > { %v3154_v60 = vpack.c.bf16 %v3142_v45, %v3141_v19 }
 0xdd0   : > { %4583 = vmatmul.mubr.msk.bf16.gmra.mxu1 %vm1041_vm2, %v3154_v60 }
 0xe08   : > { %v4572_v21 = vpop.f32.mrf.mxu1 }
 0xe09   : > { %v6327_v48 = vadd.f32 %v4572_v21, %v6324_v23 }
 0xe0a   : > { %v3232_v54 = vpop.f32.mrf.mxu1 }
 0xe0b   : > { %v3297_v12 = vmul.f32 %v6327_v48, %v6327_v48  ;;  %v6332_v28 = vadd.f32 %v6324_v23, %v3232_v54 }
 0xe0c   : > { %v4573_v35 = vpop.f32.mrf.mxu1 }
 0xe0d   : > { %v3313_v2 = vmul.f32 %v3297_v12, %v6327_v48  ;;  %v3295_v43 = vmul.f32 %v6332_v28, %v6332_v28  ;;  %v6338_v63 = vadd.f32 %v4573_v35, %v6324_v23 }
 0xe0e   : > { %v3235_v58 = vpop.f32.mrf.mxu1 }
 0xe0f   : > { %v3329_v27 = vmul.f32 0.044715, %v3313_v2  ;;  %v3311_v34 = vmul.f32 %v3295_v43, %v6332_v28  ;;  %v3298_v14 = vmul.f32 %v6338_v63, %v6338_v63  ;;  %v6344_v59 = vadd.f32 %v6324_v23, %v3235_v58 }
 0xe10   : > { %v4576_v5 = vpop.f32.mrf.mxu1 }
 0xe11   : > { %v3345_v11 = vadd.f32 %v3329_v27, %v6327_v48  ;;  %v3327_v57 = vmul.f32 0.044715, %v3311_v34  ;;  %v3314_v53 = vmul.f32 %v3298_v14, %v6338_v63  ;;  %v3296_v56 = vmul.f32 %v6344_v59, %v6344_v59 }
 0xe12   : > { %v6351_v6 = vadd.f32 %v4576_v5, %v6324_v23  ;;  %v3248_v15 = vpop.f32.mrf.mxu1 }
 0xe13   : > { %v3361_v36 = vmul.f32 0.7978846, %v3345_v11  ;;  %v3343_v61 = vadd.f32 %v3327_v57, %v6332_v28  ;;  %v3330_v46 = vmul.f32 0.044715, %v3314_v53  ;;  %v3312_v29 = vmul.f32 %v3296_v56, %v6344_v59 }
 0xe14   : > { %v3301_v40 = vmul.f32 %v6351_v6, %v6351_v6  ;;  %v6358_v39 = vadd.f32 %v6324_v23, %v3248_v15  ;;  %v4577_v41 = vpop.f32.mrf.mxu1 }
 0xe15   : > { %v3359_v17 = vmul.f32 0.7978846, %v3343_v61  ;;  %v3346_v7 = vadd.f32 %v3330_v46, %v6338_v63  ;;  %v3328_v20 = vmul.f32 0.044715, %v3312_v29  ;;  %4907 = vtanh.f32 %v3361_v36 }
 0xe16   : > { %v3317_v8 = vmul.f32 %v3301_v40, %v6351_v6  ;;  %v3299_v62 = vmul.f32 %v6358_v39, %v6358_v39  ;;  %v3260_v55 = vadd.f32 %v4577_v41, %v6324_v23  ;;  %v3251_v32 = vpop.f32.mrf.mxu1 }
 0xe17   : > { %4909 = vtanh.f32 %v3359_v17  ;;  %v3362_v3 = vmul.f32 0.7978846, %v3346_v7  ;;  %v3344_v13 = vadd.f32 %v3328_v20, %v6344_v59  ;;  %v3252_v52 = vadd.f32 %v6324_v23, %v3251_v32 }
 0xe18   : > { %v3333_v49 = vmul.f32 0.044715, %v3317_v8  ;;  %v3315_v37 = vmul.f32 %v3299_v62, %v6358_v39  ;;  %v3302_v47 = vmul.f32 %v3260_v55, %v3260_v55 }
 0xe19   : > { %4911 = vtanh.f32 %v3362_v3  ;;  %v3360_v26 = vmul.f32 0.7978846, %v3344_v13  ;;  %v3300_v50 = vmul.f32 %v3252_v52, %v3252_v52 }
 0xe1a   : > { %v3349_v38 = vadd.f32 %v3333_v49, %v6351_v6  ;;  %v3331_v19 = vmul.f32 0.044715, %v3315_v37  ;;  %v3318_v45 = vmul.f32 %v3302_v47, %v3260_v55 }
 0xe1b   : > { %4913 = vtanh.f32 %v3360_v26  ;;  %v3316_v60 = vmul.f32 %v3300_v50, %v3252_v52 }
 0xe1c   : > { %v3365_v21 = vmul.f32 0.7978846, %v3349_v38  ;;  %v3347_v54 = vadd.f32 %v3331_v19, %v6358_v39  ;;  %v3334_v12 = vmul.f32 0.044715, %v3318_v45 }
 0xe1d   : > { %v3332_v35 = vmul.f32 0.044715, %v3316_v60 }
 0xe1e   : > { %4915 = vtanh.f32 %v3365_v21  ;;  %v3363_v2 = vmul.f32 0.7978846, %v3347_v54  ;;  %v3350_v43 = vadd.f32 %v3334_v12, %v3260_v55 }
 0xe1f   : > { %v3348_v58 = vadd.f32 %v3332_v35, %v3252_v52 }
 0xe20   : > { %4917 = vtanh.f32 %v3363_v2  ;;  %v3366_v27 = vmul.f32 0.7978846, %v3350_v43 }
 0xe21   : > { %v3364_v34 = vmul.f32 0.7978846, %v3348_v58 }
 0xe22   : > { %4919 = vtanh.f32 %v3366_v27  ;;  %v4908_v14 = vpop.eup %4907 }
 0xe23   : > { %4921 = vtanh.f32 %v3364_v34  ;;  %v3393_v53 = vadd.f32 1.0, %v4908_v14 }
 0xe24   : > { %v4910_v5 = vpop.eup %4909 }
 0xe25   : > { %v3391_v11 = vadd.f32 1.0, %v4910_v5  ;;  %v3409_v29 = vmul.f32 0.5, %v3393_v53 }
 0xe26   : > { %v4912_v57 = vpop.eup %4911 }
 0xe27   : > { %v3394_v56 = vadd.f32 1.0, %v4912_v57  ;;  %v3407_v36 = vmul.f32 0.5, %v3391_v11  ;;  %v3425_v62 = vmul.f32 %v3409_v29, %v6327_v48 }
 0xe28   : > { %v4914_v15 = vpop.eup %4913 }
 0xe29   : > { %v3410_v61 = vmul.f32 0.5, %v3394_v56  ;;  %v3392_v46 = vadd.f32 1.0, %v4914_v15  ;;  %v3423_v20 = vmul.f32 %v3407_v36, %v6332_v28 }
 0xe2b   : > { %v4916_v40 = vpop.eup %4915  ;;  %v3408_v41 = vmul.f32 0.5, %v3392_v46  ;;  %v3426_v17 = vmul.f32 %v3410_v61, %v6338_v63 }
 0xe2c   : > { %v3397_v32 = vadd.f32 1.0, %v4916_v40 }
 0xe2d   : > { %v4918_v7 = vpop.eup %4917  ;;  %v3424_v8 = vmul.f32 %v3408_v41, %v6344_v59  ;;  %v3448_v47 = vpack.c.bf16 %v3426_v17, %v3425_v62 }
 0xe2e   : > { %v3395_v3 = vadd.f32 1.0, %v4918_v7  ;;  %v3413_v19 = vmul.f32 0.5, %v3397_v32 }
 0xe2f   : > { %v4920_v13 = vpop.eup %4919  ;;  %v3447_v49 = vpack.c.bf16 %v3424_v8, %v3423_v20 }
 0xe30   : > { %v4922_v37 = vpop.eup %4921  ;;  %v3398_v26 = vadd.f32 1.0, %v4920_v13  ;;  %v3411_v50 = vmul.f32 0.5, %v3395_v3  ;;  %v3429_v60 = vmul.f32 %v3413_v19, %v6351_v6 }
 0xe31   : > { %v3396_v38 = vadd.f32 1.0, %v4922_v37  ;;  %4594 = vmatprep.mubr.msk.bf16.mxu0 %vm1561_vm4, %v3447_v49 }
 0xe32   : > { %v3414_v63 = vmul.f32 0.5, %v3398_v26  ;;  %4595 = vmatmul.mubr.msk.bf16.vlgmr.msra.gmra.mxu0 %vm1561_vm4, %v3448_v47  ;;  %v3427_v59 = vmul.f32 %v3411_v50, %v6358_v39 }
 0xe33   : > { %v3412_v28 = vmul.f32 0.5, %v3396_v38 }
 0xe34   : > { %v3430_v45 = vmul.f32 %v3414_v63, %v3260_v55 }
 0xe35   : > { %v3428_v48 = vmul.f32 %v3412_v28, %v3252_v52 }
 0xe36   : > { %v3450_v54 = vpack.c.bf16 %v3430_v45, %v3429_v60 }
 0xe37   : > { %v3449_v21 = vpack.c.bf16 %v3428_v48, %v3427_v59 }
 0xe39   : > { %4598 = vmatprep.mubr.msk.bf16.mxu0 %vm1561_vm4, %v3449_v21 }
 0xe3a   : > { %4599 = vmatmul.mubr.msk.bf16.gmra.mxu0 %vm1561_vm4, %v3450_v54 }
 0xe85   : > { %v4580_v12 = vpop.f32.mrf.mxu1 }
 0xe86   : > { %v6381_v35 = vadd.f32 %v4580_v12, %v6324_v23 }
 0xe87   : > { %v3264_v2 = vpop.f32.mrf.mxu1 }
 0xe88   : > { %v3305_v43 = vmul.f32 %v6381_v35, %v6381_v35  ;;  %v6386_v55 = vadd.f32 %v6324_v23, %v3264_v2 }
 0xe89   : > { %v4581_v39 = vpop.f32.mrf.mxu1 }
 0xe8a   : > { %v3321_v6 = vmul.f32 %v3305_v43, %v6381_v35  ;;  %v3303_v52 = vmul.f32 %v6386_v55, %v6386_v55  ;;  %v6392_v58 = vadd.f32 %v4581_v39, %v6324_v23 }
 0xe8b   : > { %v3267_v27 = vpop.f32.mrf.mxu1 }
 0xe8c   : > { %v3337_v34 = vmul.f32 0.044715, %v3321_v6  ;;  %v3319_v14 = vmul.f32 %v3303_v52, %v6386_v55  ;;  %v3306_v5 = vmul.f32 %v6392_v58, %v6392_v58  ;;  %v6398_v11 = vadd.f32 %v6324_v23, %v3267_v27 }
 0xe8e   : > { %v3353_v57 = vadd.f32 %v3337_v34, %v6381_v35  ;;  %v3335_v53 = vmul.f32 0.044715, %v3319_v14  ;;  %v3322_v56 = vmul.f32 %v3306_v5, %v6392_v58  ;;  %v3304_v15 = vmul.f32 %v6398_v11, %v6398_v11 }
 0xe90   : > { %v3369_v36 = vmul.f32 0.7978846, %v3353_v57  ;;  %v3351_v61 = vadd.f32 %v3335_v53, %v6386_v55  ;;  %v3338_v46 = vmul.f32 0.044715, %v3322_v56  ;;  %v3320_v29 = vmul.f32 %v3304_v15, %v6398_v11  ;;  %v4584_v40 = vpop.f32.mrf.mxu1 }
 0xe91   : > { %v6407_v41 = vadd.f32 %v4584_v40, %v6324_v23 }
 0xe92   : > { %v3367_v17 = vmul.f32 0.7978846, %v3351_v61  ;;  %v3354_v7 = vadd.f32 %v3338_v46, %v6392_v58  ;;  %v3336_v20 = vmul.f32 0.044715, %v3320_v29  ;;  %v3280_v8 = vpop.f32.mrf.mxu1  ;;  %4923 = vtanh.f32 %v3369_v36 }
 0xe93   : > { %v3309_v62 = vmul.f32 %v6407_v41, %v6407_v41  ;;  %v6413_v32 = vadd.f32 %v6324_v23, %v3280_v8 }
 0xe94   : > { %4925 = vtanh.f32 %v3367_v17  ;;  %v3370_v3 = vmul.f32 0.7978846, %v3354_v7  ;;  %v3352_v13 = vadd.f32 %v3336_v20, %v6398_v11  ;;  %v4585_v49 = vpop.f32.mrf.mxu1 }
 0xe95   : > { %v3325_v37 = vmul.f32 %v3309_v62, %v6407_v41  ;;  %v3307_v47 = vmul.f32 %v6413_v32, %v6413_v32  ;;  %v3292_v26 = vadd.f32 %v4585_v49, %v6324_v23 }
 0xe96   : > { %4927 = vtanh.f32 %v3370_v3  ;;  %v3368_v50 = vmul.f32 0.7978846, %v3352_v13  ;;  %v3283_v38 = vpop.f32.mrf.mxu1 }
 0xe97   : > { %v3341_v19 = vmul.f32 0.044715, %v3325_v37  ;;  %v3323_v63 = vmul.f32 %v3307_v47, %v6413_v32  ;;  %v3310_v28 = vmul.f32 %v3292_v26, %v3292_v26  ;;  %v3284_v45 = vadd.f32 %v6324_v23, %v3283_v38 }
 0xe98   : > { %4929 = vtanh.f32 %v3368_v50 }
 0xe99   : > { %v3357_v59 = vadd.f32 %v3341_v19, %v6407_v41  ;;  %v3339_v48 = vmul.f32 0.044715, %v3323_v63  ;;  %v3326_v60 = vmul.f32 %v3310_v28, %v3292_v26  ;;  %v3308_v21 = vmul.f32 %v3284_v45, %v3284_v45 }
 0xe9b   : > { %v3373_v54 = vmul.f32 0.7978846, %v3357_v59  ;;  %v3355_v12 = vadd.f32 %v3339_v48, %v6413_v32  ;;  %v3342_v2 = vmul.f32 0.044715, %v3326_v60  ;;  %v3324_v43 = vmul.f32 %v3308_v21, %v3284_v45 }
 0xe9d   : > { %v3371_v39 = vmul.f32 0.7978846, %v3355_v12  ;;  %v3358_v6 = vadd.f32 %v3342_v2, %v3292_v26  ;;  %v3340_v52 = vmul.f32 0.044715, %v3324_v43  ;;  %4931 = vtanh.f32 %v3373_v54  ;;  %v4247_v43 = vld [vmem:[%s6784_s30] ss:$0 sm:$0xff] }
 0xe9f   : > { %4933 = vtanh.f32 %v3371_v39  ;;  %v3374_v27 = vmul.f32 0.7978846, %v3358_v6  ;;  %v3356_v34 = vadd.f32 %v3340_v52, %v3284_v45  ;;  %v4924_v14 = vpop.eup %4923 }
 0xea0   : > { %v3401_v56 = vadd.f32 1.0, %v4924_v14 }
 0xea1   : > { %v4926_v23 = vpop.eup %4925  ;;  %4935 = vtanh.f32 %v3374_v27  ;;  %v3372_v5 = vmul.f32 0.7978846, %v3356_v34 }
 0xea2   : > { %v3399_v57 = vadd.f32 1.0, %v4926_v23  ;;  %v3417_v40 = vmul.f32 0.5, %v3401_v56 }
 0xea3   : > { %v4928_v53 = vpop.eup %4927  ;;  %4937 = vtanh.f32 %v3372_v5 }
 0xea4   : > { %v3402_v15 = vadd.f32 1.0, %v4928_v53  ;;  %v3415_v61 = vmul.f32 0.5, %v3399_v57  ;;  %v3433_v3 = vmul.f32 %v3417_v40, %v6381_v35 }
 0xea5   : > { %v4930_v36 = vpop.eup %4929 }
 0xea6   : > { %v3418_v46 = vmul.f32 0.5, %v3402_v15  ;;  %v3400_v29 = vadd.f32 1.0, %v4930_v36  ;;  %v3431_v20 = vmul.f32 %v3415_v61, %v6386_v55 }
 0xea8   : > { %v3416_v17 = vmul.f32 0.5, %v3400_v29  ;;  %v3434_v7 = vmul.f32 %v3418_v46, %v6392_v58 }
 0xeaa   : > { %v3432_v8 = vmul.f32 %v3416_v17, %v6398_v11  ;;  %v4932_v62 = vpop.eup %4931  ;;  %v3452_v47 = vpack.c.bf16 %v3434_v7, %v3433_v3 }
 0xeab   : > { %v3405_v38 = vadd.f32 1.0, %v4932_v62 }
 0xeac   : > { %v4934_v13 = vpop.eup %4933  ;;  %v3451_v49 = vpack.c.bf16 %v3432_v8, %v3431_v20 }
 0xead   : > { %v3403_v37 = vadd.f32 1.0, %v4934_v13  ;;  %v3421_v11 = vmul.f32 0.5, %v3405_v38 }
 0xeae   : > { %v4936_v50 = vpop.eup %4935  ;;  %4602 = vmatprep.mubr.msk.bf16.mxu0 %vm1561_vm4, %v3451_v49 }
 0xeaf   : > { %v3406_v19 = vadd.f32 1.0, %v4936_v50  ;;  %4603 = vmatmul.mubr.msk.bf16.gmra.mxu0 %vm1561_vm4, %v3452_v47  ;;  %v3419_v63 = vmul.f32 0.5, %v3403_v37  ;;  %v3437_v21 = vmul.f32 %v3421_v11, %v6407_v41 }
 0xeb0   : > { %v4938_v58 = vpop.eup %4937 }
 0xeb1   : > { %v3422_v55 = vmul.f32 0.5, %v3406_v19  ;;  %v3404_v28 = vadd.f32 1.0, %v4938_v58  ;;  %v3435_v35 = vmul.f32 %v3419_v63, %v6413_v32 }
 0xeb3   : > { %v3420_v59 = vmul.f32 0.5, %v3404_v28  ;;  %v3438_v48 = vmul.f32 %v3422_v55, %v3292_v26 }
 0xeb5   : > { %v3436_v60 = vmul.f32 %v3420_v59, %v3284_v45  ;;  %v3454_v12 = vpack.c.bf16 %v3438_v48, %v3437_v21 }
 0xeb7   : > { %v3453_v54 = vpack.c.bf16 %v3436_v60, %v3435_v35 }
 0xeb9   : > { %4606 = vmatprep.mubr.msk.bf16.mxu0 %vm1561_vm4, %v3453_v54 }
 0xeba   : > { %4607 = vmatmul.mubr.msk.bf16.gmra.mxu0 %vm1561_vm4, %v3454_v12 }
 0xef2   : > { %v4596_v2 = vpop.f32.mrf.mxu0 }
 0xef3   : > { %v3602_v39 = vadd.f32 %v4596_v2, %v6054_v42 }
 0xef4   : > { %v3537_v26 = vpop.f32.mrf.mxu0 }
 0xef5   : > { %v6440_v6 = vadd.f32 %v4247_v43, %v3602_v39  ;;  %v3600_v32 = vadd.f32 %v3537_v26, %v6048_v9 }
 0xef6   : > { %v4597_v41 = vpop.f32.mrf.mxu0 }
 0xef7   : > { %3641 = vst.msk [vmem:[#allocation2 + $0x10] sm:$0xff] %vm1041_vm2, %v6440_v6  ;;  %v6445_v45 = vadd.f32 %v4247_v43, %v3600_v32  ;;  %v3603_v52 = vadd.f32 %v4597_v41, %v6064_v18 }
 0xef8   : > { %v3540_v27 = vpop.f32.mrf.mxu0 }
 0xef9   : > { %3639 = vst.msk [vmem:[#allocation2] sm:$0xff] %vm1041_vm2, %v6445_v45  ;;  %v6450_v34 = vadd.f32 %v4247_v43, %v3603_v52  ;;  %v3601_v42 = vadd.f32 %v3540_v27, %v6051_v1 }
 0xefa   : > { %v4600_v14 = vpop.f32.mrf.mxu0 }
 0xefb   : > { %3642 = vst.msk [vmem:[#allocation2 + $0x18] sm:$0xff] %vm1041_vm2, %v6450_v34  ;;  %v6455_v9 = vadd.f32 %v4247_v43, %v3601_v42  ;;  %v3606_v23 = vadd.f32 %v4600_v14, %v6081_v24 }
 0xefc   : > { %v3553_v5 = vpop.f32.mrf.mxu0 }
 0xefd   : > { %3640 = vst.msk [vmem:[#allocation2 + $0x8] sm:$0xff] %vm1041_vm2, %v6455_v9  ;;  %v6460_v18 = vadd.f32 %v4247_v43, %v3606_v23  ;;  %v3604_v57 = vadd.f32 %v3553_v5, %v6074_v44 }
 0xefe   : > { %v4601_v53 = vpop.f32.mrf.mxu0 }
 0xeff   : > { %3645 = vst.msk [vmem:[#allocation2 + $0x30] sm:$0xff] %vm1041_vm2, %v6460_v18  ;;  %v6465_v1 = vadd.f32 %v4247_v43, %v3604_v57  ;;  %v3607_v56 = vadd.f32 %v4601_v53, %v6069_v0 }
 0xf00   : > { %v3556_v15 = vpop.f32.mrf.mxu0 }
 0xf01   : > { %3643 = vst.msk [vmem:[#allocation2 + $0x20] sm:$0xff] %vm1041_vm2, %v6465_v1  ;;  %v6470_v24 = vadd.f32 %v4247_v43, %v3607_v56  ;;  %v3605_v36 = vadd.f32 %v3556_v15, %v6059_v4 }
 0xf03   : > { %3646 = vst.msk [vmem:[#allocation2 + $0x38] sm:$0xff] %vm1041_vm2, %v6470_v24  ;;  %v6475_v44 = vadd.f32 %v4247_v43, %v3605_v36 }
 0xf05   : > { %3644 = vst.msk [vmem:[#allocation2 + $0x28] sm:$0xff] %vm1041_vm2, %v6475_v44 }
 0xf6f   : > { %v4604_v61 = vpop.f32.mrf.mxu0 }
 0xf70   : > { %v3610_v46 = vadd.f32 %v4604_v61, %v6111_v10 }
 0xf71   : > { %v3569_v0 = vpop.f32.mrf.mxu0 }
 0xf72   : > { %v6480_v29 = vadd.f32 %v4247_v43, %v3610_v46  ;;  %v3608_v40 = vadd.f32 %v3569_v0, %v6108_v22 }
 0xf73   : > { %v4605_v17 = vpop.f32.mrf.mxu0 }
 0xf74   : > { %3649 = vst.msk [vmem:[#allocation2 + $0x50] sm:$0xff] %vm1041_vm2, %v6480_v29  ;;  %v6485_v4 = vadd.f32 %v4247_v43, %v3608_v40  ;;  %v3611_v7 = vadd.f32 %v4605_v17, %v6119_v16 }
 0xf75   : > { %v3572_v20 = vpop.f32.mrf.mxu0 }
 0xf76   : > { %3647 = vst.msk [vmem:[#allocation2 + $0x40] sm:$0xff] %vm1041_vm2, %v6485_v4  ;;  %v6490_v8 = vadd.f32 %v4247_v43, %v3611_v7  ;;  %v3609_v10 = vadd.f32 %v3572_v20, %v6116_v31 }
 0xf78   : > { %3650 = vst.msk [vmem:[#allocation2 + $0x58] sm:$0xff] %vm1041_vm2, %v6490_v8  ;;  %v6495_v22 = vadd.f32 %v4247_v43, %v3609_v10 }
 0xf7a   : > { %3648 = vst.msk [vmem:[#allocation2 + $0x48] sm:$0xff] %vm1041_vm2, %v6495_v22  ;;  %v4608_v62 = vpop.f32.mrf.mxu0 }
 0xf7b   : > { %v3614_v3 = vadd.f32 %v4608_v62, %v6134_v33 }
 0xf7c   : > { %v3585_v16 = vpop.f32.mrf.mxu0 }
 0xf7d   : > { %v6500_v13 = vadd.f32 %v4247_v43, %v3614_v3  ;;  %v3612_v49 = vadd.f32 %v3585_v16, %v6128_v30 }
 0xf7e   : > { %v4609_v37 = vpop.f32.mrf.mxu0 }
 0xf7f   : > { %3653 = vst.msk [vmem:[#allocation2 + $0x70] sm:$0xff] %vm1041_vm2, %v6500_v13  ;;  %v6505_v31 = vadd.f32 %v4247_v43, %v3612_v49  ;;  %v3615_v47 = vadd.f32 %v4609_v37, %v6150_v51 }
 0xf80   : > { %v3588_v50 = vpop.f32.mrf.mxu0 }
 0xf81   : > { %3651 = vst.msk [vmem:[#allocation2 + $0x60] sm:$0xff] %vm1041_vm2, %v6505_v31  ;;  %v6510_v38 = vadd.f32 %v4247_v43, %v3615_v47  ;;  %v3613_v33 = vadd.f32 %v3588_v50, %v6139_v25  ;;  %3658 = sbr.rel (%p4248_p6) target bundleno = 4332 (0x10ec), region = 100 }
 0xf83   : > { %3654 = vst.msk [vmem:[#allocation2 + $0x78] sm:$0xff] %vm1041_vm2, %v6510_v38  ;;  %v6515_v30 = vadd.f32 %v4247_v43, %v3613_v33 }
 0xf85   : > { %3652 = vst.msk [vmem:[#allocation2 + $0x68] sm:$0xff] %vm1041_vm2, %v6515_v30 }
 0xf86   : > { %v3661_v51 = vsel %vm1041_vm2, %v6445_v45, 0.0  ;;  %v3685_v19 = vsel %vm1041_vm2, %v6485_v4, 0.0  ;;  %v3664_v25 = vsel %vm1041_vm2, %v6455_v9, 0.0  ;;  %v3688_v58 = vsel %vm1041_vm2, %v6495_v22, 0.0 }
 0xf87   : > { %3662 = vadd.xlane.f32.xlu0 %v3661_v51  ;;  %3686 = vadd.xlane.f32.xlu1 %v3685_v19  ;;  %v3667_v63 = vsel %vm1041_vm2, %v6440_v6, 0.0  ;;  %v3691_v55 = vsel %vm1041_vm2, %v6480_v29, 0.0  ;;  %v3670_v28 = vsel %vm1041_vm2, %v6450_v34, 0.0  ;;  %v3694_v11 = vsel %vm1041_vm2, %v6490_v8, 0.0 }
 0xf88   : > { %v3673_v59 = vsel %vm1041_vm2, %v6465_v1, 0.0  ;;  %v3697_v48 = vsel %vm1041_vm2, %v6505_v31, 0.0  ;;  %v3676_v35 = vsel %vm1041_vm2, %v6475_v44, 0.0  ;;  %v3700_v60 = vsel %vm1041_vm2, %v6515_v30, 0.0 }
 0xf89   : > { %v3679_v21 = vsel %vm1041_vm2, %v6460_v18, 0.0  ;;  %v3703_v54 = vsel %vm1041_vm2, %v6500_v13, 0.0  ;;  %v3682_v12 = vsel %vm1041_vm2, %v6470_v24, 0.0  ;;  %v3706_v2 = vsel %vm1041_vm2, %v6510_v38, 0.0 }
 0xf8a   : > { %vm3958_vm5 = vcmask 253952  }
 0xf8b   : > { %3665 = vadd.xlane.f32.xlu0 %v3664_v25  ;;  %3689 = vadd.xlane.f32.xlu1 %v3688_v58 }
 0xf8f   : > { %3668 = vadd.xlane.f32.xlu0 %v3667_v63  ;;  %3692 = vadd.xlane.f32.xlu1 %v3691_v55 }
 0xf93   : > { %3671 = vadd.xlane.f32.xlu0 %v3670_v28  ;;  %3695 = vadd.xlane.f32.xlu1 %v3694_v11 }
 0xf97   : > { %3674 = vadd.xlane.f32.xlu0 %v3673_v59  ;;  %3698 = vadd.xlane.f32.xlu1 %v3697_v48 }
 0xf9b   : > { %3677 = vadd.xlane.f32.xlu0 %v3676_v35  ;;  %3701 = vadd.xlane.f32.xlu1 %v3700_v60 }
 0xf9f   : > { %3680 = vadd.xlane.f32.xlu0 %v3679_v21  ;;  %3704 = vadd.xlane.f32.xlu1 %v3703_v54 }
 0xfa3   : > { %3683 = vadd.xlane.f32.xlu0 %v3682_v12  ;;  %3707 = vadd.xlane.f32.xlu1 %v3706_v2 }
0x1010   : > { %v3663_v43 = vpop.xlane.xlu0 %3662  ;;  %v3687_v39 = vpop.xlane.xlu1 %3686 }
0x1011   : > { %v3709_v26 = vmul.f32 0.03125, %v3663_v43  ;;  %v3717_v32 = vmul.f32 0.03125, %v3687_v39 }
0x1013   : > { %v6553_v41 = vsub.f32 %v6445_v45, %v3709_v26  ;;  %v6556_v52 = vsub.f32 %v6485_v4, %v3717_v32 }
0x1014   : > { %v3666_v27 = vpop.xlane.xlu0 %3665  ;;  %v3690_v42 = vpop.xlane.xlu1 %3689 }
0x1015   : > { %v3710_v14 = vmul.f32 0.03125, %v3666_v27  ;;  %v3718_v23 = vmul.f32 0.03125, %v3690_v42  ;;  %v3741_v5 = vmul.f32 %v6553_v41, %v6553_v41  ;;  %v3749_v57 = vmul.f32 %v6556_v52, %v6556_v52 }
0x1017   : > { %v6563_v53 = vsub.f32 %v6455_v9, %v3710_v14  ;;  %v6566_v56 = vsub.f32 %v6495_v22, %v3718_v23  ;;  %v3757_v45 = vsel %vm1041_vm2, %v3741_v5, 0.0  ;;  %v3781_v61 = vsel %vm1041_vm2, %v3749_v57, 0.0 }
0x1018   : > { %3758 = vadd.xlane.f32.xlu0 %v3757_v45  ;;  %v3669_v15 = vpop.xlane.xlu0 %3668  ;;  %v3693_v36 = vpop.xlane.xlu1 %3692 }
0x1019   : > { %v3711_v46 = vmul.f32 0.03125, %v3669_v15  ;;  %v3719_v0 = vmul.f32 0.03125, %v3693_v36  ;;  %v3742_v40 = vmul.f32 %v6563_v53, %v6563_v53  ;;  %v3750_v17 = vmul.f32 %v6566_v56, %v6566_v56 }
0x101b   : > { %v6575_v9 = vsub.f32 %v6440_v6, %v3711_v46  ;;  %v6578_v4 = vsub.f32 %v6480_v29, %v3719_v0  ;;  %v3760_v7 = vsel %vm1041_vm2, %v3742_v40, 0.0  ;;  %v3784_v22 = vsel %vm1041_vm2, %v3750_v17, 0.0 }
0x101c   : > { %3782 = vadd.xlane.f32.xlu0 %v3781_v61  ;;  %3761 = vadd.xlane.f32.xlu1 %v3760_v7  ;;  %v3672_v20 = vpop.xlane.xlu0 %3671  ;;  %v3696_v10 = vpop.xlane.xlu1 %3695 }
0x101d   : > { %v3712_v62 = vmul.f32 0.03125, %v3672_v20  ;;  %v3720_v3 = vmul.f32 0.03125, %v3696_v10  ;;  %v3743_v16 = vmul.f32 %v6575_v9, %v6575_v9  ;;  %v3751_v6 = vmul.f32 %v6578_v4, %v6578_v4 }
0x101f   : > { %v6587_v49 = vsub.f32 %v6450_v34, %v3712_v62  ;;  %v6590_v29 = vsub.f32 %v6490_v8, %v3720_v3  ;;  %v3763_v37 = vsel %vm1041_vm2, %v3743_v16, 0.0  ;;  %v3787_v33 = vsel %vm1041_vm2, %v3751_v6, 0.0 }
0x1020   : > { %3785 = vadd.xlane.f32.xlu1 %v3784_v22  ;;  %3764 = vadd.xlane.f32.xlu0 %v3763_v37  ;;  %v3675_v47 = vpop.xlane.xlu0 %3674  ;;  %v3699_v50 = vpop.xlane.xlu1 %3698 }
0x1021   : > { %v3713_v51 = vmul.f32 0.03125, %v3675_v47  ;;  %v3721_v19 = vmul.f32 0.03125, %v3699_v50  ;;  %v3744_v25 = vmul.f32 %v6587_v49, %v6587_v49  ;;  %v3752_v34 = vmul.f32 %v6590_v29, %v6590_v29 }
0x1023   : > { %v6599_v58 = vsub.f32 %v6465_v1, %v3713_v51  ;;  %v6602_v8 = vsub.f32 %v6505_v31, %v3721_v19  ;;  %v3766_v63 = vsel %vm1041_vm2, %v3744_v25, 0.0  ;;  %v3790_v11 = vsel %vm1041_vm2, %v3752_v34, 0.0 }
0x1024   : > { %3788 = vadd.xlane.f32.xlu1 %v3787_v33  ;;  %3767 = vadd.xlane.f32.xlu0 %v3766_v63  ;;  %v3678_v55 = vpop.xlane.xlu0 %3677  ;;  %v3702_v28 = vpop.xlane.xlu1 %3701 }
0x1025   : > { %v3714_v59 = vmul.f32 0.03125, %v3678_v55  ;;  %v3722_v48 = vmul.f32 0.03125, %v3702_v28  ;;  %v3745_v35 = vmul.f32 %v6599_v58, %v6599_v58  ;;  %v3753_v1 = vmul.f32 %v6602_v8, %v6602_v8 }
0x1027   : > { %v6611_v60 = vsub.f32 %v6475_v44, %v3714_v59  ;;  %v6614_v31 = vsub.f32 %v6515_v30, %v3722_v48  ;;  %v3769_v21 = vsel %vm1041_vm2, %v3745_v35, 0.0  ;;  %v3793_v2 = vsel %vm1041_vm2, %v3753_v1, 0.0 }
0x1028   : > { %3791 = vadd.xlane.f32.xlu1 %v3790_v11  ;;  %3770 = vadd.xlane.f32.xlu0 %v3769_v21  ;;  %v3681_v54 = vpop.xlane.xlu0 %3680  ;;  %v3705_v12 = vpop.xlane.xlu1 %3704 }
0x1029   : > { %v3715_v43 = vmul.f32 0.03125, %v3681_v54  ;;  %v3723_v39 = vmul.f32 0.03125, %v3705_v12  ;;  %v3746_v26 = vmul.f32 %v6611_v60, %v6611_v60  ;;  %v3754_v44 = vmul.f32 %v6614_v31, %v6614_v31 }
0x102b   : > { %v6623_v32 = vsub.f32 %v6460_v18, %v3715_v43  ;;  %v6626_v30 = vsub.f32 %v6500_v13, %v3723_v39  ;;  %v3772_v27 = vsel %vm1041_vm2, %v3746_v26, 0.0  ;;  %v3796_v23 = vsel %vm1041_vm2, %v3754_v44, 0.0 }
0x102c   : > { %3794 = vadd.xlane.f32.xlu1 %v3793_v2  ;;  %3773 = vadd.xlane.f32.xlu0 %v3772_v27  ;;  %v3684_v42 = vpop.xlane.xlu0 %3683  ;;  %v3708_v14 = vpop.xlane.xlu1 %3707 }
0x102d   : > { %v3716_v5 = vmul.f32 0.03125, %v3684_v42  ;;  %v3724_v57 = vmul.f32 0.03125, %v3708_v14  ;;  %v3747_v45 = vmul.f32 %v6623_v32, %v6623_v32  ;;  %v3755_v18 = vmul.f32 %v6626_v30, %v6626_v30 }
0x102f   : > { %v6635_v15 = vsub.f32 %v6470_v24, %v3716_v5  ;;  %v6638_v13 = vsub.f32 %v6510_v38, %v3724_v57  ;;  %v3775_v36 = vsel %vm1041_vm2, %v3747_v45, 0.0  ;;  %v3799_v61 = vsel %vm1041_vm2, %v3755_v18, 0.0 }
0x1030   : > { %3797 = vadd.xlane.f32.xlu1 %v3796_v23  ;;  %3776 = vadd.xlane.f32.xlu0 %v3775_v36 }
0x1031   : > { %v3748_v46 = vmul.f32 %v6635_v15, %v6635_v15  ;;  %v3756_v0 = vmul.f32 %v6638_v13, %v6638_v13 }
0x1033   : > { %v3778_v40 = vsel %vm1041_vm2, %v3748_v46, 0.0  ;;  %v3802_v24 = vsel %vm1041_vm2, %v3756_v0, 0.0 }
0x1034   : > { %3800 = vadd.xlane.f32.xlu1 %v3799_v61  ;;  %3779 = vadd.xlane.f32.xlu0 %v3778_v40 }
0x1038   : > { %3803 = vadd.xlane.f32.xlu1 %v3802_v24 }
0x10a1   : > { %v3759_v38 = vpop.xlane.xlu0 %3758 }
0x10a2   : > { %v3805_v17 = vmul.f32 0.03125, %v3759_v38 }
0x10a4   : > { %v3821_v62 = vadd.f32 1e-05, %v3805_v17 }
0x10a5   : > { %v3762_v7 = vpop.xlane.xlu1 %3761  ;;  %v3783_v20 = vpop.xlane.xlu0 %3782 }
0x10a6   : > { %v3806_v10 = vmul.f32 0.03125, %v3762_v7  ;;  %v3813_v22 = vmul.f32 0.03125, %v3783_v20  ;;  %4955 = vrsqrt.f32 %v3821_v62  ;;  %v6654_v62 = vld [vmem:[%s6785_s2] ss:$0 sm:$0xff] }
0x10a8   : > { %v3822_v6 = vadd.f32 1e-05, %v3806_v10  ;;  %v3829_v50 = vadd.f32 1e-05, %v3813_v22 }
0x10a9   : > { %v3786_v3 = vpop.xlane.xlu1 %3785  ;;  %v3765_v16 = vpop.xlane.xlu0 %3764 }
0x10aa   : > { %v3814_v37 = vmul.f32 0.03125, %v3786_v3  ;;  %v3807_v47 = vmul.f32 0.03125, %v3765_v16  ;;  %4957 = vrsqrt.f32 %v3822_v6 }
0x10ab   : > { %4959 = vrsqrt.f32 %v3829_v50 }
0x10ac   : > { %v3823_v33 = vadd.f32 1e-05, %v3807_v47  ;;  %v3830_v51 = vadd.f32 1e-05, %v3814_v37 }
0x10ad   : > { %v3789_v19 = vpop.xlane.xlu1 %3788  ;;  %v3768_v25 = vpop.xlane.xlu0 %3767 }
0x10ae   : > { %v3815_v34 = vmul.f32 0.03125, %v3789_v19  ;;  %v3808_v63 = vmul.f32 0.03125, %v3768_v25  ;;  %4961 = vrsqrt.f32 %v3823_v33 }
0x10af   : > { %4963 = vrsqrt.f32 %v3830_v51 }
0x10b0   : > { %v3831_v55 = vadd.f32 1e-05, %v3815_v34  ;;  %v3824_v28 = vadd.f32 1e-05, %v3808_v63 }
0x10b1   : > { %v3792_v11 = vpop.xlane.xlu1 %3791  ;;  %v3771_v59 = vpop.xlane.xlu0 %3770 }
0x10b2   : > { %4965 = vrsqrt.f32 %v3831_v55  ;;  %v3816_v48 = vmul.f32 0.03125, %v3792_v11  ;;  %v3809_v35 = vmul.f32 0.03125, %v3771_v59 }
0x10b3   : > { %4967 = vrsqrt.f32 %v3824_v28  ;;  %v4956_v42 = vpop.eup %4955 }
0x10b4   : > { %v3832_v1 = vadd.f32 1e-05, %v3816_v48  ;;  %v3825_v21 = vadd.f32 1e-05, %v3809_v35  ;;  %v3853_v7 = vmul.f32 %v4956_v42, %v6553_v41 }
0x10b5   : > { %v3795_v54 = vpop.xlane.xlu1 %3794  ;;  %v3774_v12 = vpop.xlane.xlu0 %3773 }
0x10b6   : > { %4969 = vrsqrt.f32 %v3832_v1  ;;  %v3817_v2 = vmul.f32 0.03125, %v3795_v54  ;;  %v3810_v43 = vmul.f32 0.03125, %v3774_v12  ;;  %v3875_v51 = vmul.f32 %v6654_v62, %v3853_v7 }
0x10b7   : > { %4971 = vrsqrt.f32 %v3825_v21  ;;  %v4958_v23 = vpop.eup %4957 }
0x10b8   : > { %v3833_v39 = vadd.f32 1e-05, %v3817_v2  ;;  %v3826_v26 = vadd.f32 1e-05, %v3810_v43  ;;  %v4960_v57 = vpop.eup %4959  ;;  %v3854_v40 = vmul.f32 %v4958_v23, %v6563_v53 }
0x10b9   : > { %v3798_v44 = vpop.xlane.xlu1 %3797  ;;  %v3777_v27 = vpop.xlane.xlu0 %3776  ;;  %v3861_v3 = vmul.f32 %v4960_v57, %v6556_v52  ;;  %v6666_v52 = vld [vmem:[%s6786_s23] ss:$0 sm:$0xff] }
0x10ba   : > { %4973 = vrsqrt.f32 %v3833_v39  ;;  %v3818_v14 = vmul.f32 0.03125, %v3798_v44  ;;  %v3811_v5 = vmul.f32 0.03125, %v3777_v27  ;;  %v3876_v6 = vmul.f32 %v6654_v62, %v3854_v40 }
0x10bb   : > { %4975 = vrsqrt.f32 %v3826_v26  ;;  %v4962_v18 = vpop.eup %4961  ;;  %v3883_v63 = vmul.f32 %v6654_v62, %v3861_v3  ;;  %v3897_v48 = vadd.f32 %v6666_v52, %v3875_v51 }
0x10bc   : > { %v3834_v45 = vadd.f32 1e-05, %v3818_v14  ;;  %v3827_v36 = vadd.f32 1e-05, %v3811_v5  ;;  %v4964_v0 = vpop.eup %4963  ;;  %v3855_v20 = vmul.f32 %v4962_v18, %v6575_v9 }
0x10bd   : > { %v3801_v61 = vpop.xlane.xlu1 %3800  ;;  %v3780_v46 = vpop.xlane.xlu0 %3779  ;;  %v3862_v53 = vmul.f32 %v4964_v0, %v6566_v56  ;;  %v3905_v2 = vadd.f32 %v6666_v52, %v3883_v63  ;;  %v3913_v42 = vsel %vm1041_vm2, %v3897_v48, 0.0 }
0x10be   : > { %4977 = vrsqrt.f32 %v3834_v45  ;;  %v3819_v24 = vmul.f32 0.03125, %v3801_v61  ;;  %v3812_v22 = vmul.f32 0.03125, %v3780_v46  ;;  %v3877_v19 = vmul.f32 %v6654_v62, %v3855_v20 }
0x10bf   : > { %v4966_v38 = vpop.eup %4965  ;;  %4979 = vrsqrt.f32 %v3827_v36  ;;  %v3884_v56 = vmul.f32 %v6654_v62, %v3862_v53  ;;  %v3934_v36 = vsel %vm1041_vm2, %v3905_v2, 0.0 }
0x10c0   : > { %v4968_v17 = vpop.eup %4967  ;;  %v3835_v10 = vadd.f32 1e-05, %v3819_v24  ;;  %v3828_v41 = vadd.f32 1e-05, %v3812_v22  ;;  %v3863_v9 = vmul.f32 %v4966_v38, %v6578_v4  ;;  %v3898_v4 = vadd.f32 %v6666_v52, %v3876_v6 }
0x10c1   : > { %v3804_v16 = vpop.xlane.xlu1 %3803  ;;  %v3856_v37 = vmul.f32 %v4968_v17, %v6587_v49  ;;  %v3899_v35 = vadd.f32 %v6666_v52, %v3877_v19  ;;  %v3906_v1 = vadd.f32 %v6666_v52, %v3884_v56 }
0x10c2   : > { %4981 = vrsqrt.f32 %v3835_v10  ;;  %v3820_v50 = vmul.f32 0.03125, %v3804_v16  ;;  %v3885_v11 = vmul.f32 %v6654_v62, %v3863_v9  ;;  %v3914_v12 = vsel %vm1041_vm2, %v3898_v4, 0.0 }
0x10c3   : > { %v4970_v47 = vpop.eup %4969  ;;  %4983 = vrsqrt.f32 %v3828_v41  ;;  %v3878_v55 = vmul.f32 %v6654_v62, %v3856_v37  ;;  %v3916_v14 = vsel %vm1041_vm2, %v3899_v35, 0.0  ;;  %v3915_v5 = vadd.f32 %v3914_v12, %v3913_v42 }
0x10c4   : > { %v4972_v33 = vpop.eup %4971  ;;  %v3864_v49 = vmul.f32 %v4970_v47, %v6590_v29  ;;  %v3836_v34 = vadd.f32 1e-05, %v3820_v50  ;;  %v3907_v26 = vadd.f32 %v6666_v52, %v3885_v11  ;;  %v3935_v57 = vsel %vm1041_vm2, %v3906_v1, 0.0 }
0x10c5   : > { %v3857_v25 = vmul.f32 %v4972_v33, %v6599_v58  ;;  %v3900_v43 = vadd.f32 %v6666_v52, %v3878_v55  ;;  %v3917_v24 = vadd.f32 %v3916_v14, %v3915_v5  ;;  %v3936_v7 = vadd.f32 %v3935_v57, %v3934_v36 }
0x10c6   : > { %4985 = vrsqrt.f32 %v3836_v34  ;;  %v3886_v21 = vmul.f32 %v6654_v62, %v3864_v49  ;;  %v3937_v38 = vsel %vm1041_vm2, %v3907_v26, 0.0 }
0x10c7   : > { %v4974_v28 = vpop.eup %4973  ;;  %v3879_v29 = vmul.f32 %v6654_v62, %v3857_v25  ;;  %v3918_v61 = vsel %vm1041_vm2, %v3900_v43, 0.0  ;;  %v3938_v6 = vadd.f32 %v3937_v38, %v3936_v7 }
0x10c8   : > { %v4976_v59 = vpop.eup %4975  ;;  %v3865_v58 = vmul.f32 %v4974_v28, %v6602_v8  ;;  %v3908_v45 = vadd.f32 %v6666_v52, %v3886_v21  ;;  %v3919_v22 = vadd.f32 %v3918_v61, %v3917_v24 }
0x10c9   : > { %v3858_v54 = vmul.f32 %v4976_v59, %v6611_v60  ;;  %v3901_v60 = vadd.f32 %v6666_v52, %v3879_v29 }
0x10ca   : > { %v3887_v44 = vmul.f32 %v6654_v62, %v3865_v58  ;;  %v3939_v3 = vsel %vm1041_vm2, %v3908_v45, 0.0 }
0x10cb   : > { %v4978_v39 = vpop.eup %4977  ;;  %v3880_v27 = vmul.f32 %v6654_v62, %v3858_v54  ;;  %v3920_v20 = vsel %vm1041_vm2, %v3901_v60, 0.0 }
0x10cc   : > { %v4980_v8 = vpop.eup %4979  ;;  %v3866_v23 = vmul.f32 %v4978_v39, %v6614_v31  ;;  %v3909_v31 = vadd.f32 %v6666_v52, %v3887_v44  ;;  %v3921_v9 = vadd.f32 %v3920_v20, %v3919_v22 }
0x10cd   : > { %v3859_v18 = vmul.f32 %v4980_v8, %v6623_v32  ;;  %v3902_v46 = vadd.f32 %v6666_v52, %v3880_v27 }
0x10ce   : > { %v3888_v0 = vmul.f32 %v6654_v62, %v3866_v23  ;;  %v3941_v50 = vsel %vm1041_vm2, %v3909_v31, 0.0 }
0x10cf   : > { %v4982_v40 = vpop.eup %4981  ;;  %v3881_v17 = vmul.f32 %v6654_v62, %v3859_v18  ;;  %v3922_v37 = vsel %vm1041_vm2, %v3902_v46, 0.0 }
0x10d0   : > { %v3867_v32 = vmul.f32 %v4982_v40, %v6626_v30  ;;  %v4984_v10 = vpop.eup %4983  ;;  %v3910_v53 = vadd.f32 %v6666_v52, %v3888_v0  ;;  %v3940_v30 = vadd.f32 %v3939_v3, %v3938_v6  ;;  %v3923_v49 = vadd.f32 %v3922_v37, %v3921_v9 }
0x10d1   : > { %v3903_v16 = vadd.f32 %v6666_v52, %v3881_v17  ;;  %v3860_v47 = vmul.f32 %v4984_v10, %v6635_v15 }
0x10d2   : > { %v3889_v41 = vmul.f32 %v6654_v62, %v3867_v32  ;;  %v3943_v25 = vsel %vm1041_vm2, %v3910_v53, 0.0  ;;  %v3942_v4 = vadd.f32 %v3941_v50, %v3940_v30 }
0x10d3   : > { %v4986_v33 = vpop.eup %4985  ;;  %v3924_v51 = vsel %vm1041_vm2, %v3903_v16, 0.0  ;;  %v3882_v56 = vmul.f32 %v6654_v62, %v3860_v47 }
0x10d4   : > { %v3911_v19 = vadd.f32 %v6666_v52, %v3889_v41  ;;  %v3868_v34 = vmul.f32 %v4986_v33, %v6638_v13  ;;  %v3925_v15 = vadd.f32 %v3924_v51, %v3923_v49  ;;  %v3944_v11 = vadd.f32 %v3943_v25, %v3942_v4 }
0x10d5   : > { %v3904_v63 = vadd.f32 %v6666_v52, %v3882_v56 }
0x10d6   : > { %v3945_v55 = vsel %vm1041_vm2, %v3911_v19, 0.0  ;;  %v3890_v28 = vmul.f32 %v6654_v62, %v3868_v34 }
0x10d7   : > { %v3926_v59 = vsel %vm1041_vm2, %v3904_v63, 0.0  ;;  %v3946_v29 = vadd.f32 %v3945_v55, %v3944_v11 }
0x10d8   : > { %v3927_v48 = vadd.f32 %v3926_v59, %v3925_v15  ;;  %v3912_v35 = vadd.f32 %v6666_v52, %v3890_v28 }
0x10da   : > { %v3928_v58 = vrot.slane %v3927_v48, 4  ;;  %v3947_v1 = vsel %vm1041_vm2, %v3912_v35, 0.0 }
0x10db   : > { %v3948_v21 = vadd.f32 %v3947_v1, %v3946_v29 }
0x10dc   : > { %v3929_v13 = vadd.f32 %v3928_v58, %v3927_v48 }
0x10dd   : > { %v3949_v54 = vrot.slane %v3948_v21, 4 }
0x10de   : > { %v3930_v12 = vrot.slane %v3929_v13, 2 }
0x10df   : > { %v3950_v2 = vadd.f32 %v3949_v54, %v3948_v21 }
0x10e0   : > { %v3931_v43 = vadd.f32 %v3930_v12, %v3929_v13 }
0x10e1   : > { %v3951_v39 = vrot.slane %v3950_v2, 2 }
0x10e2   : > { %v3932_v26 = vrot.slane %v3931_v43, 1 }
0x10e3   : > { %v3952_v44 = vadd.f32 %v3951_v39, %v3950_v2 }
0x10e4   : > { %v3933_v62 = vadd.f32 %v3932_v26, %v3931_v43 }
0x10e5   : > { %v3953_v27 = vrot.slane %v3952_v44, 1 }
0x10e6   : > { %v3956_v8 = vmul.f32 0.015625, %v3933_v62 }
0x10e7   : > { %v3954_v42 = vadd.f32 %v3953_v27, %v3952_v44 }
0x10e8   : > { %3959 = vst.msk [vmem:[%s6787_s28] sm:$0x1] %vm3958_vm5, %v3956_v8 }
0x10e9   : > { %v3957_v52 = vmul.f32 0.015625, %v3954_v42 }
0x10eb   : > { %3960 = vst.msk [vmem:[%s6788_s6 + $0x1] sm:$0x1] %vm3958_vm5, %v3957_v52 }
0x10ec PF: > { %s6789_s20 = sld [smem:[#allocation4_spill]] }
0x10ed   : > { %s6790_s27 = sld [smem:[#allocation3_spill]] }
0x10ee   : > { %s6791_s28 = sld [smem:[#allocation5_spill]] }
0x10f2   : > { %s28_s29 = sadd.s32 1, %s6789_s20  }
0x10f3   : > { %p25_p7 = scmp.ge.s32.totalorder %s28_s29, 4  }
0x10f5   :  { %27 = sbr.rel (!%p25_p7) target bundleno = 9 (0x9), region = 166 }

</bundles_post_ra>
